<compile_context>
chip_gen: v7x
topology: tpu7x:2x2x1
jax: 0.10.0
libtpu: 0.0.40
codegen_flags: <defaults>
</compile_context>

<pallas_src>
import functools

import jax
import jax.numpy as jnp
from jax import lax
from jax.experimental import pallas as pl
from jax.experimental.pallas import tpu as pltpu


def _round_up(x, m):
    return ((x + m - 1) // m) * m


def _bigru_stream_kernel(t_real, embf_ref, embb_ref, h0_ref, wih_ref, whh_ref,
                         bhh_ref, outf_ref, outb_ref, hf_sc, hb_sc, gi_ref):
    """One time-chunk of the bidirectional GRU.

    embf_ref : (Tc*Bp, Ep)    bf16   fwd-direction chunk (chunk i), bias lane folded in
    embb_ref : (Tc*Bp, Ep)    bf16   bwd-direction chunk (chunk nchunks-1-i)
    h0_ref   : (2, Bp, Hp)    f32    initial hidden (both directions)
    wih_ref  : (2, Ep, 3Hp)   bf16   input weights per direction, b_ih in row E
    whh_ref  : (2, Hp, 3Hp)   bf16   recurrent weights per direction
    bhh_ref  : (2, 1, 3Hp)    f32    recurrent biases
    outf_ref : (Tc, Bp, Hp)   bf16   fwd outputs for chunk i
    outb_ref : (Tc, Bp, Hp)   bf16   bwd outputs for chunk nchunks-1-i
    hf_sc    : (Bp, Hp)       f32    fwd hidden carried across grid steps
    hb_sc    : (Bp, Hp)       f32    bwd hidden carried across grid steps
    gi_ref   : (Tc*Bp, 6Hp)   bf16   per-chunk input projections (both directions)
    """
    i = pl.program_id(0)
    nchunks = pl.num_programs(0)
    Tc, Bp, Hp = outf_ref.shape
    G = 3 * Hp

    @pl.when(i == 0)
    def _():
        hf_sc[...] = h0_ref[0]
        hb_sc[...] = h0_ref[1]

    # ---- Phase 1 (per chunk): input projection for both directions, one MXU GEMM
    # each; b_ih arrives via the 1.0 bias lane of emb. Stored bf16 (halves VMEM/vst).
    gi_ref[:, 0:G] = jnp.dot(
        embf_ref[...], wih_ref[0], preferred_element_type=jnp.float32
    ).astype(gi_ref.dtype)
    gi_ref[:, G:2 * G] = jnp.dot(
        embb_ref[...], wih_ref[1], preferred_element_type=jnp.float32
    ).astype(gi_ref.dtype)

    # ---- Hoisted recurrent weights / biases (broadcast once per chunk, not per step).
    whh_f = whh_ref[0]
    whh_b = whh_ref[1]
    bhh_f = jnp.broadcast_to(bhh_ref[0], (Bp, G))
    bhh_b = jnp.broadcast_to(bhh_ref[1], (Bp, G))

    chunk_b_base = (nchunks - 1 - i) * Tc   # global time offset of the bwd chunk

    def gru_cell(gi, h, h_bf, whh, bhh):
        # PyTorch GRU: r = s(gi_r+gh_r); z = s(gi_z+gh_z); n = tanh(gi_n + r*gh_n)
        gh = jnp.dot(h_bf, whh, preferred_element_type=jnp.float32) + bhh   # (Bp,3Hp) f32
        r = jax.nn.sigmoid(gi[:, 0:Hp] + gh[:, 0:Hp])
        z = jax.nn.sigmoid(gi[:, Hp:2 * Hp] + gh[:, Hp:2 * Hp])
        n = jnp.tanh(gi[:, 2 * Hp:3 * Hp] + r * gh[:, 2 * Hp:3 * Hp])
        return (1.0 - z) * n + z * h

    def step(j, carry):
        hf, hf_bf, hb, hb_bf = carry
        lf = j
        lb = Tc - 1 - j
        rf = pl.multiple_of(lf * Bp, Bp)
        rb = pl.multiple_of(lb * Bp, Bp)
        gi_f = gi_ref[pl.ds(rf, Bp), 0:G]          # lane/tile-aligned bf16 slices
        gi_b = gi_ref[pl.ds(rb, Bp), G:2 * G]
        hf_new = gru_cell(gi_f, hf, hf_bf, whh_f, bhh_f)   # two independent chains ->
        hb_cand = gru_cell(gi_b, hb, hb_bf, whh_b, bhh_b)  # interleaved for ILP
        # Backward direction meets the time-padding (t >= T) first: keep carry there.
        hb_new = jnp.where(chunk_b_base + lb < t_real, hb_cand, hb)
        outf_ref[lf] = hf_new.astype(outf_ref.dtype)
        outb_ref[lb] = hb_new.astype(outb_ref.dtype)
        return (hf_new, hf_new.astype(jnp.bfloat16),
                hb_new, hb_new.astype(jnp.bfloat16))

    hf0 = hf_sc[...]
    hb0 = hb_sc[...]
    hf_fin, _, hb_fin, _ = lax.fori_loop(
        0, Tc, step,
        (hf0, hf0.astype(jnp.bfloat16), hb0, hb0.astype(jnp.bfloat16)),
        unroll=(True if Tc <= 8 else 2))
    hf_sc[...] = hf_fin
    hb_sc[...] = hb_fin


def init_encoder_params(key, embed_size, hidden_size):
    """Deterministic synthetic parameters with PyTorch nn.GRU shapes/init range."""
    k = 1.0 / jnp.sqrt(jnp.float32(hidden_size))
    shapes = {
        "w_ih_f": (3 * hidden_size, embed_size),
        "w_hh_f": (3 * hidden_size, hidden_size),
        "b_ih_f": (3 * hidden_size,),
        "b_hh_f": (3 * hidden_size,),
        "w_ih_b": (3 * hidden_size, embed_size),
        "w_hh_b": (3 * hidden_size, hidden_size),
        "b_ih_b": (3 * hidden_size,),
        "b_hh_b": (3 * hidden_size,),
    }
    params = {}
    keys = jax.random.split(key, len(shapes))
    for sub, (name, shape) in zip(keys, sorted(shapes.items())):
        params[name] = jax.random.uniform(sub, shape, jnp.float32, minval=-k, maxval=k)
    params["hidden_size"] = hidden_size
    return params


def _pick_chunk(T, Bp, Ep, Hp, budget_bytes=6 << 20):
    """Chunk length so that the in-flight per-chunk buffers stay well under VMEM."""
    G = 3 * Hp
    per_t = Bp * (2 * 2 * Ep * 2       # two emb operands, double-buffered, bf16
                  + 2 * 2 * Hp * 2     # two bf16 output operands, double-buffered
                  + 2 * G * 2)         # bf16 gi scratch (both directions)
    return int(max(1, min(T, budget_bytes // max(per_t, 1))))


def _vmem_limit_bytes(vmem_bytes):
    """footprint + 25% headroom, capped at 3/4 of the generation's physical VMEM."""
    try:
        kind = jax.devices()[0].device_kind.lower()
    except Exception:  # pragma: no cover - defensive
        kind = ""
    physical = 128 * 1024 * 1024 if ("v5" in kind or "v6" in kind) else 64 * 1024 * 1024
    return int(min(physical * 3 // 4, max(8 << 20, int(vmem_bytes * 1.25))))


def encoder_rnn_forward(embedded, hidden, params):
    """Matches EncoderRNN.forward(embedded, hidden, input_lengths=None), bidi=True."""
    T, B, E = embedded.shape
    H = params["hidden_size"]
    Hp = _round_up(H, 128)            # lane-align each gate
    Ep = _round_up(E + 1, 128)        # +1 bias lane, lane/K-align the input GEMM
    Bp = _round_up(B, 16)             # bf16 sublane packing (16 rows per tile)
    G = 3 * Hp
    f32, bf16 = jnp.float32, jnp.bfloat16

    Tc = _pick_chunk(T, Bp, Ep, Hp)
    nchunks = pl.cdiv(T, Tc)
    Tp = nchunks * Tc

    # ---- Weight prep (torch (3H, rows) layout -> transposed, per-gate 128-padded).
    def prep_wih(w, b):
        out = jnp.zeros((Ep, G), f32)
        for g in range(3):
            wg = w[g * H:(g + 1) * H, :].T.astype(f32)            # (E, H)
            out = out.at[:E, g * Hp:g * Hp + H].set(wg)
            out = out.at[E, g * Hp:g * Hp + H].set(b[g * H:(g + 1) * H].astype(f32))
        return out

    def prep_whh(w):
        out = jnp.zeros((Hp, G), f32)
        for g in range(3):
            out = out.at[:H, g * Hp:g * Hp + H].set(w[g * H:(g + 1) * H, :].T.astype(f32))
        return out

    def prep_bhh(b):
        out = jnp.zeros((1, G), f32)
        for g in range(3):
            out = out.at[0, g * Hp:g * Hp + H].set(b[g * H:(g + 1) * H].astype(f32))
        return out

    wih = jnp.stack([prep_wih(params["w_ih_f"], params["b_ih_f"]),
                     prep_wih(params["w_ih_b"], params["b_ih_b"])]).astype(bf16)  # (2,Ep,G)
    whh = jnp.stack([prep_whh(params["w_hh_f"]),
                     prep_whh(params["w_hh_b"])]).astype(bf16)                    # (2,Hp,G)
    bhh = jnp.stack([prep_bhh(params["b_hh_f"]),
                     prep_bhh(params["b_hh_b"])])                                 # (2,1,G) f32

    # ---- Input prep: pad, add the constant 1.0 bias lane, flatten to lane-dense 2D.
    emb_p = jnp.zeros((Tp, Bp, Ep), f32)
    emb_p = emb_p.at[:T, :B, :E].set(embedded.astype(f32))
    emb_p = emb_p.at[:, :, E].set(1.0)                       # bias lane -> folds b_ih
    emb2d = emb_p.reshape(Tp * Bp, Ep).astype(bf16)

    h0 = jnp.zeros((2, Bp, Hp), f32).at[:, :B, :H].set(hidden.astype(f32))

    # ---- VMEM footprint (streamed design; double-buffered chunk operands).
    bytes_stream = 2 * (2 * Tc * Bp * Ep * 2) + 2 * (2 * Tc * Bp * Hp * 2)
    bytes_weights = 2 * (wih.size * 2 + whh.size * 2 + bhh.size * 4 + h0.size * 4)
    bytes_scratch = 2 * Bp * Hp * 4 + Tc * Bp * 2 * G * 2
    vmem_limit = _vmem_limit_bytes(bytes_stream + bytes_weights + bytes_scratch)

    flops = int(2 * (Tp * Bp) * Ep * G * 2            # two input GEMMs over all chunks
                + Tp * 2 * 2 * Bp * Hp * G            # recurrent matmuls
                + Tp * 2 * Bp * G * 8)                # gate arithmetic
    transcendentals = int(Tp * 2 * Bp * G)
    bytes_acc = int(2 * Tp * Bp * Ep * 2 + 2 * Tp * Bp * Hp * 2 +
                    wih.size * 2 + whh.size * 2 + bhh.size * 4 + h0.size * 4)

    kernel = functools.partial(_bigru_stream_kernel, T)

    outf, outb = pl.pallas_call(
        kernel,
        out_shape=(jax.ShapeDtypeStruct((Tp, Bp, Hp), bf16),
                   jax.ShapeDtypeStruct((Tp, Bp, Hp), bf16)),
        grid=(nchunks,),
        in_specs=[
            pl.BlockSpec((Tc * Bp, Ep), lambda i: (i, 0)),                 # emb, fwd chunk
            pl.BlockSpec((Tc * Bp, Ep), lambda i: (nchunks - 1 - i, 0)),   # emb, bwd chunk
            pl.BlockSpec((2, Bp, Hp), lambda i: (0, 0, 0)),                # h0 (resident)
            pl.BlockSpec((2, Ep, G), lambda i: (0, 0, 0)),                 # wih (resident)
            pl.BlockSpec((2, Hp, G), lambda i: (0, 0, 0)),                 # whh (resident)
            pl.BlockSpec((2, 1, G), lambda i: (0, 0, 0)),                  # bhh (resident)
        ],
        out_specs=(
            pl.BlockSpec((Tc, Bp, Hp), lambda i: (i, 0, 0)),               # fwd outputs
            pl.BlockSpec((Tc, Bp, Hp), lambda i: (nchunks - 1 - i, 0, 0)), # bwd outputs
        ),
        scratch_shapes=[
            pltpu.VMEM((Bp, Hp), jnp.float32),        # fwd hidden carry
            pltpu.VMEM((Bp, Hp), jnp.float32),        # bwd hidden carry
            pltpu.VMEM((Tc * Bp, 2 * G), bf16),       # per-chunk input projections
        ],
        compiler_params=pltpu.CompilerParams(
            dimension_semantics=("arbitrary",),
            vmem_limit_bytes=vmem_limit),
        cost_estimate=pl.CostEstimate(flops=flops, transcendentals=transcendentals,
                                      bytes_accessed=bytes_acc),
    )(emb2d, emb2d, h0, wih, whh, bhh)

    out_f = outf[:T, :B, :H].astype(f32)             # (T, B, H) forward
    out_b = outb[:T, :B, :H].astype(f32)             # (T, B, H) backward
    output = jnp.concatenate([out_f, out_b], axis=-1)                      # (T, B, 2H)
    hidden_out = jnp.concatenate([out_f[T - 1], out_b[0]], axis=-1)[None]  # (1, B, 2H)
    return output, hidden_out


def _ref_bigru(embedded, hidden, params):
    """Pure-JAX f32 reference matching torch.nn.GRU(bidirectional=True) semantics."""
    H = params["hidden_size"]

    def run_dir(emb_seq, h0, w_ih, w_hh, b_ih, b_hh):
        def cell(h, x):
            gi = x @ w_ih.T + b_ih
            gh = h @ w_hh.T + b_hh
            r = jax.nn.sigmoid(gi[:, :H] + gh[:, :H])
            z = jax.nn.sigmoid(gi[:, H:2 * H] + gh[:, H:2 * H])
            n = jnp.tanh(gi[:, 2 * H:] + r * gh[:, 2 * H:])
            h_new = (1.0 - z) * n + z * h
            return h_new, h_new
        return lax.scan(cell, h0, emb_seq)

    hf_last, out_f = run_dir(embedded, hidden[0], params["w_ih_f"], params["w_hh_f"],
                             params["b_ih_f"], params["b_hh_f"])
    hb_last, out_b_rev = run_dir(embedded[::-1], hidden[1], params["w_ih_b"],
                                 params["w_hh_b"], params["b_ih_b"], params["b_hh_b"])
    out_b = out_b_rev[::-1]
    output = jnp.concatenate([out_f, out_b], axis=-1)
    hidden_out = jnp.concatenate([hf_last, hb_last], axis=-1)[None]
    return output, hidden_out


if __name__ == "__main__":
    T, B, E, H = 8, 2, 16, 32

    key = jax.random.PRNGKey(0)
    k_params, k_emb = jax.random.split(key)

    params = init_encoder_params(k_params, embed_size=E, hidden_size=H)
    embedded = jax.random.normal(k_emb, (T, B, E), dtype=jnp.float32)
    # EncoderRNN.init_hidden: zeros of shape (num_directions=2, B, H)
    hidden0 = jnp.zeros((2, B, H), dtype=jnp.float32)

    output, hidden = encoder_rnn_forward(embedded, hidden0, params)
    jax.block_until_ready((output, hidden))

    assert output.shape == (T, B, 2 * H)
    assert hidden.shape == (1, B, 2 * H)

    ref_out, ref_hid = _ref_bigru(embedded, hidden0, params)
    err = max(float(jnp.max(jnp.abs(output - ref_out))),
              float(jnp.max(jnp.abs(hidden - ref_hid))))
    assert err < 5e-2, f"numerical mismatch vs reference: {err}"
    print("KERNEL_OK")
</pallas_src>

<mosaic_0001>
module attributes {stable_mosaic.version = 11 : i64} {
  func.func @_bigru_stream_kernel(%arg0: i32, %arg1: memref<128x128xbf16, #tpu.memory_space<vmem>>, %arg2: memref<128x128xbf16, #tpu.memory_space<vmem>>, %arg3: memref<2x16x128xf32, #tpu.memory_space<vmem>>, %arg4: memref<2x128x384xbf16, #tpu.memory_space<vmem>>, %arg5: memref<2x128x384xbf16, #tpu.memory_space<vmem>>, %arg6: memref<2x1x384xf32, #tpu.memory_space<vmem>>, %arg7: memref<8x16x128xbf16, #tpu.memory_space<vmem>>, %arg8: memref<8x16x128xbf16, #tpu.memory_space<vmem>>, %arg9: memref<16x128xf32, #tpu.memory_space<vmem>>, %arg10: memref<16x128xf32, #tpu.memory_space<vmem>>, %arg11: memref<128x768xbf16, #tpu.memory_space<vmem>>) attributes {dimension_semantics = [#tpu.dimension_semantics<arbitrary>], iteration_bounds = array<i64: 1>, scalar_prefetch = 0 : i64, scratch_operands = 3 : i64, tpu.core_type = #tpu.core_type<tc>, window_params = [{transform_indices = @transform_0, window_bounds = array<i64: 128, 128>}, {transform_indices = @transform_1, window_bounds = array<i64: 128, 128>}, {pipeline_mode = #tpu.pipeline_mode<synchronous>, transform_indices = @transform_2, window_bounds = array<i64: 2, 16, 128>}, {pipeline_mode = #tpu.pipeline_mode<synchronous>, transform_indices = @transform_3, window_bounds = array<i64: 2, 128, 384>}, {pipeline_mode = #tpu.pipeline_mode<synchronous>, transform_indices = @transform_4, window_bounds = array<i64: 2, 128, 384>}, {pipeline_mode = #tpu.pipeline_mode<synchronous>, transform_indices = @transform_5, window_bounds = array<i64: 2, 1, 384>}, {transform_indices = @transform_6, window_bounds = array<i64: 8, 16, 128>}, {transform_indices = @transform_7, window_bounds = array<i64: 8, 16, 128>}]} {
    %c0_i32 = arith.constant 0 : i32
    %0 = arith.cmpi eq, %arg0, %c0_i32 : i32
    %1 = arith.extui %0 : i1 to i32
    %c0_i32_0 = arith.constant 0 : i32
    %2 = arith.cmpi ne, %1, %c0_i32_0 : i32
    scf.if %2 {
      %c0_179 = arith.constant 0 : index
      %c0_180 = arith.constant 0 : index
      %c0_181 = arith.constant 0 : index
      %723 = vector.load %arg3[%c0_179, %c0_180, %c0_181] : memref<2x16x128xf32, #tpu.memory_space<vmem>>, vector<1x16x128xf32>
      %724 = vector.shape_cast %723 : vector<1x16x128xf32> to vector<16x128xf32>
      %c0_182 = arith.constant 0 : index
      %c0_183 = arith.constant 0 : index
      %725 = vector.load %arg9[%c0_182, %c0_183] : memref<16x128xf32, #tpu.memory_space<vmem>>, vector<16x128xf32>
      tpu.vector_store %arg9[%c0_182, %c0_183], %724 {strides = array<i32>} : memref<16x128xf32, #tpu.memory_space<vmem>>, vector<16x128xf32>,
      %c1_184 = arith.constant 1 : index
      %c0_185 = arith.constant 0 : index
      %c0_186 = arith.constant 0 : index
      %726 = vector.load %arg3[%c1_184, %c0_185, %c0_186] : memref<2x16x128xf32, #tpu.memory_space<vmem>>, vector<1x16x128xf32>
      %727 = vector.shape_cast %726 : vector<1x16x128xf32> to vector<16x128xf32>
      %c0_187 = arith.constant 0 : index
      %c0_188 = arith.constant 0 : index
      %728 = vector.load %arg10[%c0_187, %c0_188] : memref<16x128xf32, #tpu.memory_space<vmem>>, vector<16x128xf32>
      tpu.vector_store %arg10[%c0_187, %c0_188], %727 {strides = array<i32>} : memref<16x128xf32, #tpu.memory_space<vmem>>, vector<16x128xf32>,
    } else {
    }
    %c0 = arith.constant 0 : index
    %c0_1 = arith.constant 0 : index
    %3 = vector.load %arg1[%c0, %c0_1] : memref<128x128xbf16, #tpu.memory_space<vmem>>, vector<128x128xbf16>
    %c0_2 = arith.constant 0 : index
    %c0_3 = arith.constant 0 : index
    %c0_4 = arith.constant 0 : index
    %4 = vector.load %arg4[%c0_2, %c0_3, %c0_4] : memref<2x128x384xbf16, #tpu.memory_space<vmem>>, vector<1x128x384xbf16>
    %5 = vector.shape_cast %4 : vector<1x128x384xbf16> to vector<128x384xbf16>
    %cst = arith.constant dense<0.000000e+00> : vector<128x384xf32>
    %6 = tpu.matmul %3, %5, %cst {dimension_numbers = #tpu.dot_dimension_numbers<[1], [0], [0], [1], [0, 0, 1, 1], [], []>} : vector<128x128xbf16>, vector<128x384xbf16>, vector<128x384xf32> -> vector<128x384xf32>
    %7 = arith.truncf %6 : vector<128x384xf32> to vector<128x384xbf16>
    %c0_5 = arith.constant 0 : index
    %c0_6 = arith.constant 0 : index
    %8 = vector.load %arg11[%c0_5, %c0_6] : memref<128x768xbf16, #tpu.memory_space<vmem>>, vector<128x384xbf16>
    tpu.vector_store %arg11[%c0_5, %c0_6], %7 {strides = array<i32>} : memref<128x768xbf16, #tpu.memory_space<vmem>>, vector<128x384xbf16>,
    %c0_7 = arith.constant 0 : index
    %c0_8 = arith.constant 0 : index
    %9 = vector.load %arg2[%c0_7, %c0_8] : memref<128x128xbf16, #tpu.memory_space<vmem>>, vector<128x128xbf16>
    %c1 = arith.constant 1 : index
    %c0_9 = arith.constant 0 : index
    %c0_10 = arith.constant 0 : index
    %10 = vector.load %arg4[%c1, %c0_9, %c0_10] : memref<2x128x384xbf16, #tpu.memory_space<vmem>>, vector<1x128x384xbf16>
    %11 = vector.shape_cast %10 : vector<1x128x384xbf16> to vector<128x384xbf16>
    %cst_11 = arith.constant dense<0.000000e+00> : vector<128x384xf32>
    %12 = tpu.matmul %9, %11, %cst_11 {dimension_numbers = #tpu.dot_dimension_numbers<[1], [0], [0], [1], [0, 0, 1, 1], [], []>} : vector<128x128xbf16>, vector<128x384xbf16>, vector<128x384xf32> -> vector<128x384xf32>
    %13 = arith.truncf %12 : vector<128x384xf32> to vector<128x384xbf16>
    %c0_12 = arith.constant 0 : index
    %c384 = arith.constant 384 : index
    %14 = vector.load %arg11[%c0_12, %c384] : memref<128x768xbf16, #tpu.memory_space<vmem>>, vector<128x384xbf16>
    tpu.vector_store %arg11[%c0_12, %c384], %13 {strides = array<i32>} : memref<128x768xbf16, #tpu.memory_space<vmem>>, vector<128x384xbf16>,
    %c0_13 = arith.constant 0 : index
    %c0_14 = arith.constant 0 : index
    %c0_15 = arith.constant 0 : index
    %15 = vector.load %arg5[%c0_13, %c0_14, %c0_15] : memref<2x128x384xbf16, #tpu.memory_space<vmem>>, vector<1x128x384xbf16>
    %16 = vector.shape_cast %15 : vector<1x128x384xbf16> to vector<128x384xbf16>
    %c1_16 = arith.constant 1 : index
    %c0_17 = arith.constant 0 : index
    %c0_18 = arith.constant 0 : index
    %17 = vector.load %arg5[%c1_16, %c0_17, %c0_18] : memref<2x128x384xbf16, #tpu.memory_space<vmem>>, vector<1x128x384xbf16>
    %18 = vector.shape_cast %17 : vector<1x128x384xbf16> to vector<128x384xbf16>
    %c0_19 = arith.constant 0 : index
    %c0_20 = arith.constant 0 : index
    %c0_21 = arith.constant 0 : index
    %19 = vector.load %arg6[%c0_19, %c0_20, %c0_21] : memref<2x1x384xf32, #tpu.memory_space<vmem>>, vector<1x1x384xf32>
    %20 = vector.shape_cast %19 : vector<1x1x384xf32> to vector<1x384xf32>
    %21 = vector.shape_cast %20 : vector<1x384xf32> to vector<1x384xf32>
    %22 = vector.broadcast %21 : vector<1x384xf32> to vector<16x384xf32>
    %c1_22 = arith.constant 1 : index
    %c0_23 = arith.constant 0 : index
    %c0_24 = arith.constant 0 : index
    %23 = vector.load %arg6[%c1_22, %c0_23, %c0_24] : memref<2x1x384xf32, #tpu.memory_space<vmem>>, vector<1x1x384xf32>
    %24 = vector.shape_cast %23 : vector<1x1x384xf32> to vector<1x384xf32>
    %25 = vector.shape_cast %24 : vector<1x384xf32> to vector<1x384xf32>
    %26 = vector.broadcast %25 : vector<1x384xf32> to vector<16x384xf32>
    %c0_i32_25 = arith.constant 0 : i32
    %27 = arith.subi %c0_i32_25, %arg0 : i32
    %c8_i32 = arith.constant 8 : i32
    %28 = arith.muli %27, %c8_i32 : i32
    %c0_26 = arith.constant 0 : index
    %c0_27 = arith.constant 0 : index
    %29 = vector.load %arg9[%c0_26, %c0_27] : memref<16x128xf32, #tpu.memory_space<vmem>>, vector<16x128xf32>
    %c0_28 = arith.constant 0 : index
    %c0_29 = arith.constant 0 : index
    %30 = vector.load %arg10[%c0_28, %c0_29] : memref<16x128xf32, #tpu.memory_space<vmem>>, vector<16x128xf32>
    %31 = arith.truncf %29 : vector<16x128xf32> to vector<16x128xbf16>
    %32 = arith.truncf %30 : vector<16x128xf32> to vector<16x128xbf16>
    %c0_i32_30 = arith.constant 0 : i32
    %c7_i32 = arith.constant 7 : i32
    %33 = arith.subi %c7_i32, %c0_i32_30 : i32
    %c16_i32 = arith.constant 16 : i32
    %34 = arith.muli %c0_i32_30, %c16_i32 : i32
    %35 = tpu.assume_multiple %34, 16 : i32
    %c16_i32_31 = arith.constant 16 : i32
    %36 = arith.muli %33, %c16_i32_31 : i32
    %37 = tpu.assume_multiple %36, 16 : i32
    %38 = arith.index_cast %35 : i32 to index
    %c0_32 = arith.constant 0 : index
    %39 = vector.load %arg11[%38, %c0_32] : memref<128x768xbf16, #tpu.memory_space<vmem>>, vector<16x384xbf16>
    %40 = arith.index_cast %37 : i32 to index
    %c384_33 = arith.constant 384 : index
    %41 = vector.load %arg11[%40, %c384_33] : memref<128x768xbf16, #tpu.memory_space<vmem>>, vector<16x384xbf16>
    %cst_34 = arith.constant dense<0.000000e+00> : vector<16x384xf32>
    %42 = tpu.matmul %31, %16, %cst_34 {dimension_numbers = #tpu.dot_dimension_numbers<[1], [0], [0], [1], [0, 0, 1, 1], [], []>} : vector<16x128xbf16>, vector<128x384xbf16>, vector<16x384xf32> -> vector<16x384xf32>
    %43 = arith.addf %42, %22 : vector<16x384xf32>
    %44 = vector.extract_strided_slice %39 {offsets = [0, 0], sizes = [16, 128], strides = [1, 1]} : vector<16x384xbf16> to vector<16x128xbf16>
    %45 = vector.extract_strided_slice %43 {offsets = [0, 0], sizes = [16, 128], strides = [1, 1]} : vector<16x384xf32> to vector<16x128xf32>
    %46 = arith.extf %44 : vector<16x128xbf16> to vector<16x128xf32>
    %47 = arith.addf %46, %45 : vector<16x128xf32>
    %48 = arith.negf %47 : vector<16x128xf32>
    %49 = math.exp %48 : vector<16x128xf32>
    %cst_35 = arith.constant 1.000000e+00 : f32
    %50 = vector.broadcast %cst_35 : f32 to vector<16x128xf32>
    %51 = arith.addf %50, %49 : vector<16x128xf32>
    %52 = arith.divf %50, %51 : vector<16x128xf32>
    %53 = vector.extract_strided_slice %39 {offsets = [0, 128], sizes = [16, 128], strides = [1, 1]} : vector<16x384xbf16> to vector<16x128xbf16>
    %54 = vector.extract_strided_slice %43 {offsets = [0, 128], sizes = [16, 128], strides = [1, 1]} : vector<16x384xf32> to vector<16x128xf32>
    %55 = arith.extf %53 : vector<16x128xbf16> to vector<16x128xf32>
    %56 = arith.addf %55, %54 : vector<16x128xf32>
    %57 = arith.negf %56 : vector<16x128xf32>
    %58 = math.exp %57 : vector<16x128xf32>
    %cst_36 = arith.constant 1.000000e+00 : f32
    %59 = vector.broadcast %cst_36 : f32 to vector<16x128xf32>
    %60 = arith.addf %59, %58 : vector<16x128xf32>
    %61 = arith.divf %59, %60 : vector<16x128xf32>
    %62 = vector.extract_strided_slice %39 {offsets = [0, 256], sizes = [16, 128], strides = [1, 1]} : vector<16x384xbf16> to vector<16x128xbf16>
    %63 = vector.extract_strided_slice %43 {offsets = [0, 256], sizes = [16, 128], strides = [1, 1]} : vector<16x384xf32> to vector<16x128xf32>
    %64 = arith.mulf %52, %63 : vector<16x128xf32>
    %65 = arith.extf %62 : vector<16x128xbf16> to vector<16x128xf32>
    %66 = arith.addf %65, %64 : vector<16x128xf32>
    %67 = math.tanh %66 : vector<16x128xf32>
    %cst_37 = arith.constant 1.000000e+00 : f32
    %68 = vector.broadcast %cst_37 : f32 to vector<16x128xf32>
    %69 = arith.subf %68, %61 : vector<16x128xf32>
    %70 = arith.mulf %69, %67 : vector<16x128xf32>
    %71 = arith.mulf %61, %29 : vector<16x128xf32>
    %72 = arith.addf %70, %71 : vector<16x128xf32>
    %cst_38 = arith.constant dense<0.000000e+00> : vector<16x384xf32>
    %73 = tpu.matmul %32, %18, %cst_38 {dimension_numbers = #tpu.dot_dimension_numbers<[1], [0], [0], [1], [0, 0, 1, 1], [], []>} : vector<16x128xbf16>, vector<128x384xbf16>, vector<16x384xf32> -> vector<16x384xf32>
    %74 = arith.addf %73, %26 : vector<16x384xf32>
    %75 = vector.extract_strided_slice %41 {offsets = [0, 0], sizes = [16, 128], strides = [1, 1]} : vector<16x384xbf16> to vector<16x128xbf16>
    %76 = vector.extract_strided_slice %74 {offsets = [0, 0], sizes = [16, 128], strides = [1, 1]} : vector<16x384xf32> to vector<16x128xf32>
    %77 = arith.extf %75 : vector<16x128xbf16> to vector<16x128xf32>
    %78 = arith.addf %77, %76 : vector<16x128xf32>
    %79 = arith.negf %78 : vector<16x128xf32>
    %80 = math.exp %79 : vector<16x128xf32>
    %cst_39 = arith.constant 1.000000e+00 : f32
    %81 = vector.broadcast %cst_39 : f32 to vector<16x128xf32>
    %82 = arith.addf %81, %80 : vector<16x128xf32>
    %83 = arith.divf %81, %82 : vector<16x128xf32>
    %84 = vector.extract_strided_slice %41 {offsets = [0, 128], sizes = [16, 128], strides = [1, 1]} : vector<16x384xbf16> to vector<16x128xbf16>
    %85 = vector.extract_strided_slice %74 {offsets = [0, 128], sizes = [16, 128], strides = [1, 1]} : vector<16x384xf32> to vector<16x128xf32>
    %86 = arith.extf %84 : vector<16x128xbf16> to vector<16x128xf32>
    %87 = arith.addf %86, %85 : vector<16x128xf32>
    %88 = arith.negf %87 : vector<16x128xf32>
    %89 = math.exp %88 : vector<16x128xf32>
    %cst_40 = arith.constant 1.000000e+00 : f32
    %90 = vector.broadcast %cst_40 : f32 to vector<16x128xf32>
    %91 = arith.addf %90, %89 : vector<16x128xf32>
    %92 = arith.divf %90, %91 : vector<16x128xf32>
    %93 = vector.extract_strided_slice %41 {offsets = [0, 256], sizes = [16, 128], strides = [1, 1]} : vector<16x384xbf16> to vector<16x128xbf16>
    %94 = vector.extract_strided_slice %74 {offsets = [0, 256], sizes = [16, 128], strides = [1, 1]} : vector<16x384xf32> to vector<16x128xf32>
    %95 = arith.mulf %83, %94 : vector<16x128xf32>
    %96 = arith.extf %93 : vector<16x128xbf16> to vector<16x128xf32>
    %97 = arith.addf %96, %95 : vector<16x128xf32>
    %98 = math.tanh %97 : vector<16x128xf32>
    %cst_41 = arith.constant 1.000000e+00 : f32
    %99 = vector.broadcast %cst_41 : f32 to vector<16x128xf32>
    %100 = arith.subf %99, %92 : vector<16x128xf32>
    %101 = arith.mulf %100, %98 : vector<16x128xf32>
    %102 = arith.mulf %92, %30 : vector<16x128xf32>
    %103 = arith.addf %101, %102 : vector<16x128xf32>
    %104 = arith.addi %28, %33 : i32
    %c8_i32_42 = arith.constant 8 : i32
    %105 = arith.cmpi slt, %104, %c8_i32_42 : i32
    %106 = arith.select %105, %103, %30 : vector<16x128xf32>
    %107 = arith.truncf %72 : vector<16x128xf32> to vector<16x128xbf16>
    %108 = arith.index_cast %c0_i32_30 : i32 to index
    %c0_43 = arith.constant 0 : index
    %c0_44 = arith.constant 0 : index
    %109 = vector.load %arg7[%108, %c0_43, %c0_44] : memref<8x16x128xbf16, #tpu.memory_space<vmem>>, vector<1x16x128xbf16>
    %110 = vector.shape_cast %109 : vector<1x16x128xbf16> to vector<16x128xbf16>
    %111 = vector.shape_cast %107 : vector<16x128xbf16> to vector<1x16x128xbf16>
    tpu.vector_store %arg7[%108, %c0_43, %c0_44], %111 {strides = array<i32>} : memref<8x16x128xbf16, #tpu.memory_space<vmem>>, vector<1x16x128xbf16>,
    %112 = arith.truncf %106 : vector<16x128xf32> to vector<16x128xbf16>
    %113 = arith.index_cast %33 : i32 to index
    %c0_45 = arith.constant 0 : index
    %c0_46 = arith.constant 0 : index
    %114 = vector.load %arg8[%113, %c0_45, %c0_46] : memref<8x16x128xbf16, #tpu.memory_space<vmem>>, vector<1x16x128xbf16>
    %115 = vector.shape_cast %114 : vector<1x16x128xbf16> to vector<16x128xbf16>
    %116 = vector.shape_cast %112 : vector<16x128xbf16> to vector<1x16x128xbf16>
    tpu.vector_store %arg8[%113, %c0_45, %c0_46], %116 {strides = array<i32>} : memref<8x16x128xbf16, #tpu.memory_space<vmem>>, vector<1x16x128xbf16>,
    %117 = arith.truncf %72 : vector<16x128xf32> to vector<16x128xbf16>
    %118 = arith.truncf %106 : vector<16x128xf32> to vector<16x128xbf16>
    %c1_i32 = arith.constant 1 : i32
    %c7_i32_47 = arith.constant 7 : i32
    %119 = arith.subi %c7_i32_47, %c1_i32 : i32
    %c16_i32_48 = arith.constant 16 : i32
    %120 = arith.muli %c1_i32, %c16_i32_48 : i32
    %121 = tpu.assume_multiple %120, 16 : i32
    %c16_i32_49 = arith.constant 16 : i32
    %122 = arith.muli %119, %c16_i32_49 : i32
    %123 = tpu.assume_multiple %122, 16 : i32
    %124 = arith.index_cast %121 : i32 to index
    %c0_50 = arith.constant 0 : index
    %125 = vector.load %arg11[%124, %c0_50] : memref<128x768xbf16, #tpu.memory_space<vmem>>, vector<16x384xbf16>
    %126 = arith.index_cast %123 : i32 to index
    %c384_51 = arith.constant 384 : index
    %127 = vector.load %arg11[%126, %c384_51] : memref<128x768xbf16, #tpu.memory_space<vmem>>, vector<16x384xbf16>
    %cst_52 = arith.constant dense<0.000000e+00> : vector<16x384xf32>
    %128 = tpu.matmul %117, %16, %cst_52 {dimension_numbers = #tpu.dot_dimension_numbers<[1], [0], [0], [1], [0, 0, 1, 1], [], []>} : vector<16x128xbf16>, vector<128x384xbf16>, vector<16x384xf32> -> vector<16x384xf32>
    %129 = arith.addf %128, %22 : vector<16x384xf32>
    %130 = vector.extract_strided_slice %125 {offsets = [0, 0], sizes = [16, 128], strides = [1, 1]} : vector<16x384xbf16> to vector<16x128xbf16>
    %131 = vector.extract_strided_slice %129 {offsets = [0, 0], sizes = [16, 128], strides = [1, 1]} : vector<16x384xf32> to vector<16x128xf32>
    %132 = arith.extf %130 : vector<16x128xbf16> to vector<16x128xf32>
    %133 = arith.addf %132, %131 : vector<16x128xf32>
    %134 = arith.negf %133 : vector<16x128xf32>
    %135 = math.exp %134 : vector<16x128xf32>
    %cst_53 = arith.constant 1.000000e+00 : f32
    %136 = vector.broadcast %cst_53 : f32 to vector<16x128xf32>
    %137 = arith.addf %136, %135 : vector<16x128xf32>
    %138 = arith.divf %136, %137 : vector<16x128xf32>
    %139 = vector.extract_strided_slice %125 {offsets = [0, 128], sizes = [16, 128], strides = [1, 1]} : vector<16x384xbf16> to vector<16x128xbf16>
    %140 = vector.extract_strided_slice %129 {offsets = [0, 128], sizes = [16, 128], strides = [1, 1]} : vector<16x384xf32> to vector<16x128xf32>
    %141 = arith.extf %139 : vector<16x128xbf16> to vector<16x128xf32>
    %142 = arith.addf %141, %140 : vector<16x128xf32>
    %143 = arith.negf %142 : vector<16x128xf32>
    %144 = math.exp %143 : vector<16x128xf32>
    %cst_54 = arith.constant 1.000000e+00 : f32
    %145 = vector.broadcast %cst_54 : f32 to vector<16x128xf32>
    %146 = arith.addf %145, %144 : vector<16x128xf32>
    %147 = arith.divf %145, %146 : vector<16x128xf32>
    %148 = vector.extract_strided_slice %125 {offsets = [0, 256], sizes = [16, 128], strides = [1, 1]} : vector<16x384xbf16> to vector<16x128xbf16>
    %149 = vector.extract_strided_slice %129 {offsets = [0, 256], sizes = [16, 128], strides = [1, 1]} : vector<16x384xf32> to vector<16x128xf32>
    %150 = arith.mulf %138, %149 : vector<16x128xf32>
    %151 = arith.extf %148 : vector<16x128xbf16> to vector<16x128xf32>
    %152 = arith.addf %151, %150 : vector<16x128xf32>
    %153 = math.tanh %152 : vector<16x128xf32>
    %cst_55 = arith.constant 1.000000e+00 : f32
    %154 = vector.broadcast %cst_55 : f32 to vector<16x128xf32>
    %155 = arith.subf %154, %147 : vector<16x128xf32>
    %156 = arith.mulf %155, %153 : vector<16x128xf32>
    %157 = arith.mulf %147, %72 : vector<16x128xf32>
    %158 = arith.addf %156, %157 : vector<16x128xf32>
    %cst_56 = arith.constant dense<0.000000e+00> : vector<16x384xf32>
    %159 = tpu.matmul %118, %18, %cst_56 {dimension_numbers = #tpu.dot_dimension_numbers<[1], [0], [0], [1], [0, 0, 1, 1], [], []>} : vector<16x128xbf16>, vector<128x384xbf16>, vector<16x384xf32> -> vector<16x384xf32>
    %160 = arith.addf %159, %26 : vector<16x384xf32>
    %161 = vector.extract_strided_slice %127 {offsets = [0, 0], sizes = [16, 128], strides = [1, 1]} : vector<16x384xbf16> to vector<16x128xbf16>
    %162 = vector.extract_strided_slice %160 {offsets = [0, 0], sizes = [16, 128], strides = [1, 1]} : vector<16x384xf32> to vector<16x128xf32>
    %163 = arith.extf %161 : vector<16x128xbf16> to vector<16x128xf32>
    %164 = arith.addf %163, %162 : vector<16x128xf32>
    %165 = arith.negf %164 : vector<16x128xf32>
    %166 = math.exp %165 : vector<16x128xf32>
    %cst_57 = arith.constant 1.000000e+00 : f32
    %167 = vector.broadcast %cst_57 : f32 to vector<16x128xf32>
    %168 = arith.addf %167, %166 : vector<16x128xf32>
    %169 = arith.divf %167, %168 : vector<16x128xf32>
    %170 = vector.extract_strided_slice %127 {offsets = [0, 128], sizes = [16, 128], strides = [1, 1]} : vector<16x384xbf16> to vector<16x128xbf16>
    %171 = vector.extract_strided_slice %160 {offsets = [0, 128], sizes = [16, 128], strides = [1, 1]} : vector<16x384xf32> to vector<16x128xf32>
    %172 = arith.extf %170 : vector<16x128xbf16> to vector<16x128xf32>
    %173 = arith.addf %172, %171 : vector<16x128xf32>
    %174 = arith.negf %173 : vector<16x128xf32>
    %175 = math.exp %174 : vector<16x128xf32>
    %cst_58 = arith.constant 1.000000e+00 : f32
    %176 = vector.broadcast %cst_58 : f32 to vector<16x128xf32>
    %177 = arith.addf %176, %175 : vector<16x128xf32>
    %178 = arith.divf %176, %177 : vector<16x128xf32>
    %179 = vector.extract_strided_slice %127 {offsets = [0, 256], sizes = [16, 128], strides = [1, 1]} : vector<16x384xbf16> to vector<16x128xbf16>
    %180 = vector.extract_strided_slice %160 {offsets = [0, 256], sizes = [16, 128], strides = [1, 1]} : vector<16x384xf32> to vector<16x128xf32>
    %181 = arith.mulf %169, %180 : vector<16x128xf32>
    %182 = arith.extf %179 : vector<16x128xbf16> to vector<16x128xf32>
    %183 = arith.addf %182, %181 : vector<16x128xf32>
    %184 = math.tanh %183 : vector<16x128xf32>
    %cst_59 = arith.constant 1.000000e+00 : f32
    %185 = vector.broadcast %cst_59 : f32 to vector<16x128xf32>
    %186 = arith.subf %185, %178 : vector<16x128xf32>
    %187 = arith.mulf %186, %184 : vector<16x128xf32>
    %188 = arith.mulf %178, %106 : vector<16x128xf32>
    %189 = arith.addf %187, %188 : vector<16x128xf32>
    %190 = arith.addi %28, %119 : i32
    %c8_i32_60 = arith.constant 8 : i32
    %191 = arith.cmpi slt, %190, %c8_i32_60 : i32
    %192 = arith.select %191, %189, %106 : vector<16x128xf32>
    %193 = arith.truncf %158 : vector<16x128xf32> to vector<16x128xbf16>
    %194 = arith.index_cast %c1_i32 : i32 to index
    %c0_61 = arith.constant 0 : index
    %c0_62 = arith.constant 0 : index
    %195 = vector.load %arg7[%194, %c0_61, %c0_62] : memref<8x16x128xbf16, #tpu.memory_space<vmem>>, vector<1x16x128xbf16>
    %196 = vector.shape_cast %195 : vector<1x16x128xbf16> to vector<16x128xbf16>
    %197 = vector.shape_cast %193 : vector<16x128xbf16> to vector<1x16x128xbf16>
    tpu.vector_store %arg7[%194, %c0_61, %c0_62], %197 {strides = array<i32>} : memref<8x16x128xbf16, #tpu.memory_space<vmem>>, vector<1x16x128xbf16>,
    %198 = arith.truncf %192 : vector<16x128xf32> to vector<16x128xbf16>
    %199 = arith.index_cast %119 : i32 to index
    %c0_63 = arith.constant 0 : index
    %c0_64 = arith.constant 0 : index
    %200 = vector.load %arg8[%199, %c0_63, %c0_64] : memref<8x16x128xbf16, #tpu.memory_space<vmem>>, vector<1x16x128xbf16>
    %201 = vector.shape_cast %200 : vector<1x16x128xbf16> to vector<16x128xbf16>
    %202 = vector.shape_cast %198 : vector<16x128xbf16> to vector<1x16x128xbf16>
    tpu.vector_store %arg8[%199, %c0_63, %c0_64], %202 {strides = array<i32>} : memref<8x16x128xbf16, #tpu.memory_space<vmem>>, vector<1x16x128xbf16>,
    %203 = arith.truncf %158 : vector<16x128xf32> to vector<16x128xbf16>
    %204 = arith.truncf %192 : vector<16x128xf32> to vector<16x128xbf16>
    %c2_i32 = arith.constant 2 : i32
    %c7_i32_65 = arith.constant 7 : i32
    %205 = arith.subi %c7_i32_65, %c2_i32 : i32
    %c16_i32_66 = arith.constant 16 : i32
    %206 = arith.muli %c2_i32, %c16_i32_66 : i32
    %207 = tpu.assume_multiple %206, 16 : i32
    %c16_i32_67 = arith.constant 16 : i32
    %208 = arith.muli %205, %c16_i32_67 : i32
    %209 = tpu.assume_multiple %208, 16 : i32
    %210 = arith.index_cast %207 : i32 to index
    %c0_68 = arith.constant 0 : index
    %211 = vector.load %arg11[%210, %c0_68] : memref<128x768xbf16, #tpu.memory_space<vmem>>, vector<16x384xbf16>
    %212 = arith.index_cast %209 : i32 to index
    %c384_69 = arith.constant 384 : index
    %213 = vector.load %arg11[%212, %c384_69] : memref<128x768xbf16, #tpu.memory_space<vmem>>, vector<16x384xbf16>
    %cst_70 = arith.constant dense<0.000000e+00> : vector<16x384xf32>
    %214 = tpu.matmul %203, %16, %cst_70 {dimension_numbers = #tpu.dot_dimension_numbers<[1], [0], [0], [1], [0, 0, 1, 1], [], []>} : vector<16x128xbf16>, vector<128x384xbf16>, vector<16x384xf32> -> vector<16x384xf32>
    %215 = arith.addf %214, %22 : vector<16x384xf32>
    %216 = vector.extract_strided_slice %211 {offsets = [0, 0], sizes = [16, 128], strides = [1, 1]} : vector<16x384xbf16> to vector<16x128xbf16>
    %217 = vector.extract_strided_slice %215 {offsets = [0, 0], sizes = [16, 128], strides = [1, 1]} : vector<16x384xf32> to vector<16x128xf32>
    %218 = arith.extf %216 : vector<16x128xbf16> to vector<16x128xf32>
    %219 = arith.addf %218, %217 : vector<16x128xf32>
    %220 = arith.negf %219 : vector<16x128xf32>
    %221 = math.exp %220 : vector<16x128xf32>
    %cst_71 = arith.constant 1.000000e+00 : f32
    %222 = vector.broadcast %cst_71 : f32 to vector<16x128xf32>
    %223 = arith.addf %222, %221 : vector<16x128xf32>
    %224 = arith.divf %222, %223 : vector<16x128xf32>
    %225 = vector.extract_strided_slice %211 {offsets = [0, 128], sizes = [16, 128], strides = [1, 1]} : vector<16x384xbf16> to vector<16x128xbf16>
    %226 = vector.extract_strided_slice %215 {offsets = [0, 128], sizes = [16, 128], strides = [1, 1]} : vector<16x384xf32> to vector<16x128xf32>
    %227 = arith.extf %225 : vector<16x128xbf16> to vector<16x128xf32>
    %228 = arith.addf %227, %226 : vector<16x128xf32>
    %229 = arith.negf %228 : vector<16x128xf32>
    %230 = math.exp %229 : vector<16x128xf32>
    %cst_72 = arith.constant 1.000000e+00 : f32
    %231 = vector.broadcast %cst_72 : f32 to vector<16x128xf32>
    %232 = arith.addf %231, %230 : vector<16x128xf32>
    %233 = arith.divf %231, %232 : vector<16x128xf32>
    %234 = vector.extract_strided_slice %211 {offsets = [0, 256], sizes = [16, 128], strides = [1, 1]} : vector<16x384xbf16> to vector<16x128xbf16>
    %235 = vector.extract_strided_slice %215 {offsets = [0, 256], sizes = [16, 128], strides = [1, 1]} : vector<16x384xf32> to vector<16x128xf32>
    %236 = arith.mulf %224, %235 : vector<16x128xf32>
    %237 = arith.extf %234 : vector<16x128xbf16> to vector<16x128xf32>
    %238 = arith.addf %237, %236 : vector<16x128xf32>
    %239 = math.tanh %238 : vector<16x128xf32>
    %cst_73 = arith.constant 1.000000e+00 : f32
    %240 = vector.broadcast %cst_73 : f32 to vector<16x128xf32>
    %241 = arith.subf %240, %233 : vector<16x128xf32>
    %242 = arith.mulf %241, %239 : vector<16x128xf32>
    %243 = arith.mulf %233, %158 : vector<16x128xf32>
    %244 = arith.addf %242, %243 : vector<16x128xf32>
    %cst_74 = arith.constant dense<0.000000e+00> : vector<16x384xf32>
    %245 = tpu.matmul %204, %18, %cst_74 {dimension_numbers = #tpu.dot_dimension_numbers<[1], [0], [0], [1], [0, 0, 1, 1], [], []>} : vector<16x128xbf16>, vector<128x384xbf16>, vector<16x384xf32> -> vector<16x384xf32>
    %246 = arith.addf %245, %26 : vector<16x384xf32>
    %247 = vector.extract_strided_slice %213 {offsets = [0, 0], sizes = [16, 128], strides = [1, 1]} : vector<16x384xbf16> to vector<16x128xbf16>
    %248 = vector.extract_strided_slice %246 {offsets = [0, 0], sizes = [16, 128], strides = [1, 1]} : vector<16x384xf32> to vector<16x128xf32>
    %249 = arith.extf %247 : vector<16x128xbf16> to vector<16x128xf32>
    %250 = arith.addf %249, %248 : vector<16x128xf32>
    %251 = arith.negf %250 : vector<16x128xf32>
    %252 = math.exp %251 : vector<16x128xf32>
    %cst_75 = arith.constant 1.000000e+00 : f32
    %253 = vector.broadcast %cst_75 : f32 to vector<16x128xf32>
    %254 = arith.addf %253, %252 : vector<16x128xf32>
    %255 = arith.divf %253, %254 : vector<16x128xf32>
    %256 = vector.extract_strided_slice %213 {offsets = [0, 128], sizes = [16, 128], strides = [1, 1]} : vector<16x384xbf16> to vector<16x128xbf16>
    %257 = vector.extract_strided_slice %246 {offsets = [0, 128], sizes = [16, 128], strides = [1, 1]} : vector<16x384xf32> to vector<16x128xf32>
    %258 = arith.extf %256 : vector<16x128xbf16> to vector<16x128xf32>
    %259 = arith.addf %258, %257 : vector<16x128xf32>
    %260 = arith.negf %259 : vector<16x128xf32>
    %261 = math.exp %260 : vector<16x128xf32>
    %cst_76 = arith.constant 1.000000e+00 : f32
    %262 = vector.broadcast %cst_76 : f32 to vector<16x128xf32>
    %263 = arith.addf %262, %261 : vector<16x128xf32>
    %264 = arith.divf %262, %263 : vector<16x128xf32>
    %265 = vector.extract_strided_slice %213 {offsets = [0, 256], sizes = [16, 128], strides = [1, 1]} : vector<16x384xbf16> to vector<16x128xbf16>
    %266 = vector.extract_strided_slice %246 {offsets = [0, 256], sizes = [16, 128], strides = [1, 1]} : vector<16x384xf32> to vector<16x128xf32>
    %267 = arith.mulf %255, %266 : vector<16x128xf32>
    %268 = arith.extf %265 : vector<16x128xbf16> to vector<16x128xf32>
    %269 = arith.addf %268, %267 : vector<16x128xf32>
    %270 = math.tanh %269 : vector<16x128xf32>
    %cst_77 = arith.constant 1.000000e+00 : f32
    %271 = vector.broadcast %cst_77 : f32 to vector<16x128xf32>
    %272 = arith.subf %271, %264 : vector<16x128xf32>
    %273 = arith.mulf %272, %270 : vector<16x128xf32>
    %274 = arith.mulf %264, %192 : vector<16x128xf32>
    %275 = arith.addf %273, %274 : vector<16x128xf32>
    %276 = arith.addi %28, %205 : i32
    %c8_i32_78 = arith.constant 8 : i32
    %277 = arith.cmpi slt, %276, %c8_i32_78 : i32
    %278 = arith.select %277, %275, %192 : vector<16x128xf32>
    %279 = arith.truncf %244 : vector<16x128xf32> to vector<16x128xbf16>
    %280 = arith.index_cast %c2_i32 : i32 to index
    %c0_79 = arith.constant 0 : index
    %c0_80 = arith.constant 0 : index
    %281 = vector.load %arg7[%280, %c0_79, %c0_80] : memref<8x16x128xbf16, #tpu.memory_space<vmem>>, vector<1x16x128xbf16>
    %282 = vector.shape_cast %281 : vector<1x16x128xbf16> to vector<16x128xbf16>
    %283 = vector.shape_cast %279 : vector<16x128xbf16> to vector<1x16x128xbf16>
    tpu.vector_store %arg7[%280, %c0_79, %c0_80], %283 {strides = array<i32>} : memref<8x16x128xbf16, #tpu.memory_space<vmem>>, vector<1x16x128xbf16>,
    %284 = arith.truncf %278 : vector<16x128xf32> to vector<16x128xbf16>
    %285 = arith.index_cast %205 : i32 to index
    %c0_81 = arith.constant 0 : index
    %c0_82 = arith.constant 0 : index
    %286 = vector.load %arg8[%285, %c0_81, %c0_82] : memref<8x16x128xbf16, #tpu.memory_space<vmem>>, vector<1x16x128xbf16>
    %287 = vector.shape_cast %286 : vector<1x16x128xbf16> to vector<16x128xbf16>
    %288 = vector.shape_cast %284 : vector<16x128xbf16> to vector<1x16x128xbf16>
    tpu.vector_store %arg8[%285, %c0_81, %c0_82], %288 {strides = array<i32>} : memref<8x16x128xbf16, #tpu.memory_space<vmem>>, vector<1x16x128xbf16>,
    %289 = arith.truncf %244 : vector<16x128xf32> to vector<16x128xbf16>
    %290 = arith.truncf %278 : vector<16x128xf32> to vector<16x128xbf16>
    %c3_i32 = arith.constant 3 : i32
    %c7_i32_83 = arith.constant 7 : i32
    %291 = arith.subi %c7_i32_83, %c3_i32 : i32
    %c16_i32_84 = arith.constant 16 : i32
    %292 = arith.muli %c3_i32, %c16_i32_84 : i32
    %293 = tpu.assume_multiple %292, 16 : i32
    %c16_i32_85 = arith.constant 16 : i32
    %294 = arith.muli %291, %c16_i32_85 : i32
    %295 = tpu.assume_multiple %294, 16 : i32
    %296 = arith.index_cast %293 : i32 to index
    %c0_86 = arith.constant 0 : index
    %297 = vector.load %arg11[%296, %c0_86] : memref<128x768xbf16, #tpu.memory_space<vmem>>, vector<16x384xbf16>
    %298 = arith.index_cast %295 : i32 to index
    %c384_87 = arith.constant 384 : index
    %299 = vector.load %arg11[%298, %c384_87] : memref<128x768xbf16, #tpu.memory_space<vmem>>, vector<16x384xbf16>
    %cst_88 = arith.constant dense<0.000000e+00> : vector<16x384xf32>
    %300 = tpu.matmul %289, %16, %cst_88 {dimension_numbers = #tpu.dot_dimension_numbers<[1], [0], [0], [1], [0, 0, 1, 1], [], []>} : vector<16x128xbf16>, vector<128x384xbf16>, vector<16x384xf32> -> vector<16x384xf32>
    %301 = arith.addf %300, %22 : vector<16x384xf32>
    %302 = vector.extract_strided_slice %297 {offsets = [0, 0], sizes = [16, 128], strides = [1, 1]} : vector<16x384xbf16> to vector<16x128xbf16>
    %303 = vector.extract_strided_slice %301 {offsets = [0, 0], sizes = [16, 128], strides = [1, 1]} : vector<16x384xf32> to vector<16x128xf32>
    %304 = arith.extf %302 : vector<16x128xbf16> to vector<16x128xf32>
    %305 = arith.addf %304, %303 : vector<16x128xf32>
    %306 = arith.negf %305 : vector<16x128xf32>
    %307 = math.exp %306 : vector<16x128xf32>
    %cst_89 = arith.constant 1.000000e+00 : f32
    %308 = vector.broadcast %cst_89 : f32 to vector<16x128xf32>
    %309 = arith.addf %308, %307 : vector<16x128xf32>
    %310 = arith.divf %308, %309 : vector<16x128xf32>
    %311 = vector.extract_strided_slice %297 {offsets = [0, 128], sizes = [16, 128], strides = [1, 1]} : vector<16x384xbf16> to vector<16x128xbf16>
    %312 = vector.extract_strided_slice %301 {offsets = [0, 128], sizes = [16, 128], strides = [1, 1]} : vector<16x384xf32> to vector<16x128xf32>
    %313 = arith.extf %311 : vector<16x128xbf16> to vector<16x128xf32>
    %314 = arith.addf %313, %312 : vector<16x128xf32>
    %315 = arith.negf %314 : vector<16x128xf32>
    %316 = math.exp %315 : vector<16x128xf32>
    %cst_90 = arith.constant 1.000000e+00 : f32
    %317 = vector.broadcast %cst_90 : f32 to vector<16x128xf32>
    %318 = arith.addf %317, %316 : vector<16x128xf32>
    %319 = arith.divf %317, %318 : vector<16x128xf32>
    %320 = vector.extract_strided_slice %297 {offsets = [0, 256], sizes = [16, 128], strides = [1, 1]} : vector<16x384xbf16> to vector<16x128xbf16>
    %321 = vector.extract_strided_slice %301 {offsets = [0, 256], sizes = [16, 128], strides = [1, 1]} : vector<16x384xf32> to vector<16x128xf32>
    %322 = arith.mulf %310, %321 : vector<16x128xf32>
    %323 = arith.extf %320 : vector<16x128xbf16> to vector<16x128xf32>
    %324 = arith.addf %323, %322 : vector<16x128xf32>
    %325 = math.tanh %324 : vector<16x128xf32>
    %cst_91 = arith.constant 1.000000e+00 : f32
    %326 = vector.broadcast %cst_91 : f32 to vector<16x128xf32>
    %327 = arith.subf %326, %319 : vector<16x128xf32>
    %328 = arith.mulf %327, %325 : vector<16x128xf32>
    %329 = arith.mulf %319, %244 : vector<16x128xf32>
    %330 = arith.addf %328, %329 : vector<16x128xf32>
    %cst_92 = arith.constant dense<0.000000e+00> : vector<16x384xf32>
    %331 = tpu.matmul %290, %18, %cst_92 {dimension_numbers = #tpu.dot_dimension_numbers<[1], [0], [0], [1], [0, 0, 1, 1], [], []>} : vector<16x128xbf16>, vector<128x384xbf16>, vector<16x384xf32> -> vector<16x384xf32>
    %332 = arith.addf %331, %26 : vector<16x384xf32>
    %333 = vector.extract_strided_slice %299 {offsets = [0, 0], sizes = [16, 128], strides = [1, 1]} : vector<16x384xbf16> to vector<16x128xbf16>
    %334 = vector.extract_strided_slice %332 {offsets = [0, 0], sizes = [16, 128], strides = [1, 1]} : vector<16x384xf32> to vector<16x128xf32>
    %335 = arith.extf %333 : vector<16x128xbf16> to vector<16x128xf32>
    %336 = arith.addf %335, %334 : vector<16x128xf32>
    %337 = arith.negf %336 : vector<16x128xf32>
    %338 = math.exp %337 : vector<16x128xf32>
    %cst_93 = arith.constant 1.000000e+00 : f32
    %339 = vector.broadcast %cst_93 : f32 to vector<16x128xf32>
    %340 = arith.addf %339, %338 : vector<16x128xf32>
    %341 = arith.divf %339, %340 : vector<16x128xf32>
    %342 = vector.extract_strided_slice %299 {offsets = [0, 128], sizes = [16, 128], strides = [1, 1]} : vector<16x384xbf16> to vector<16x128xbf16>
    %343 = vector.extract_strided_slice %332 {offsets = [0, 128], sizes = [16, 128], strides = [1, 1]} : vector<16x384xf32> to vector<16x128xf32>
    %344 = arith.extf %342 : vector<16x128xbf16> to vector<16x128xf32>
    %345 = arith.addf %344, %343 : vector<16x128xf32>
    %346 = arith.negf %345 : vector<16x128xf32>
    %347 = math.exp %346 : vector<16x128xf32>
    %cst_94 = arith.constant 1.000000e+00 : f32
    %348 = vector.broadcast %cst_94 : f32 to vector<16x128xf32>
    %349 = arith.addf %348, %347 : vector<16x128xf32>
    %350 = arith.divf %348, %349 : vector<16x128xf32>
    %351 = vector.extract_strided_slice %299 {offsets = [0, 256], sizes = [16, 128], strides = [1, 1]} : vector<16x384xbf16> to vector<16x128xbf16>
    %352 = vector.extract_strided_slice %332 {offsets = [0, 256], sizes = [16, 128], strides = [1, 1]} : vector<16x384xf32> to vector<16x128xf32>
    %353 = arith.mulf %341, %352 : vector<16x128xf32>
    %354 = arith.extf %351 : vector<16x128xbf16> to vector<16x128xf32>
    %355 = arith.addf %354, %353 : vector<16x128xf32>
    %356 = math.tanh %355 : vector<16x128xf32>
    %cst_95 = arith.constant 1.000000e+00 : f32
    %357 = vector.broadcast %cst_95 : f32 to vector<16x128xf32>
    %358 = arith.subf %357, %350 : vector<16x128xf32>
    %359 = arith.mulf %358, %356 : vector<16x128xf32>
    %360 = arith.mulf %350, %278 : vector<16x128xf32>
    %361 = arith.addf %359, %360 : vector<16x128xf32>
    %362 = arith.addi %28, %291 : i32
    %c8_i32_96 = arith.constant 8 : i32
    %363 = arith.cmpi slt, %362, %c8_i32_96 : i32
    %364 = arith.select %363, %361, %278 : vector<16x128xf32>
    %365 = arith.truncf %330 : vector<16x128xf32> to vector<16x128xbf16>
    %366 = arith.index_cast %c3_i32 : i32 to index
    %c0_97 = arith.constant 0 : index
    %c0_98 = arith.constant 0 : index
    %367 = vector.load %arg7[%366, %c0_97, %c0_98] : memref<8x16x128xbf16, #tpu.memory_space<vmem>>, vector<1x16x128xbf16>
    %368 = vector.shape_cast %367 : vector<1x16x128xbf16> to vector<16x128xbf16>
    %369 = vector.shape_cast %365 : vector<16x128xbf16> to vector<1x16x128xbf16>
    tpu.vector_store %arg7[%366, %c0_97, %c0_98], %369 {strides = array<i32>} : memref<8x16x128xbf16, #tpu.memory_space<vmem>>, vector<1x16x128xbf16>,
    %370 = arith.truncf %364 : vector<16x128xf32> to vector<16x128xbf16>
    %371 = arith.index_cast %291 : i32 to index
    %c0_99 = arith.constant 0 : index
    %c0_100 = arith.constant 0 : index
    %372 = vector.load %arg8[%371, %c0_99, %c0_100] : memref<8x16x128xbf16, #tpu.memory_space<vmem>>, vector<1x16x128xbf16>
    %373 = vector.shape_cast %372 : vector<1x16x128xbf16> to vector<16x128xbf16>
    %374 = vector.shape_cast %370 : vector<16x128xbf16> to vector<1x16x128xbf16>
    tpu.vector_store %arg8[%371, %c0_99, %c0_100], %374 {strides = array<i32>} : memref<8x16x128xbf16, #tpu.memory_space<vmem>>, vector<1x16x128xbf16>,
    %375 = arith.truncf %330 : vector<16x128xf32> to vector<16x128xbf16>
    %376 = arith.truncf %364 : vector<16x128xf32> to vector<16x128xbf16>
    %c4_i32 = arith.constant 4 : i32
    %c7_i32_101 = arith.constant 7 : i32
    %377 = arith.subi %c7_i32_101, %c4_i32 : i32
    %c16_i32_102 = arith.constant 16 : i32
    %378 = arith.muli %c4_i32, %c16_i32_102 : i32
    %379 = tpu.assume_multiple %378, 16 : i32
    %c16_i32_103 = arith.constant 16 : i32
    %380 = arith.muli %377, %c16_i32_103 : i32
    %381 = tpu.assume_multiple %380, 16 : i32
    %382 = arith.index_cast %379 : i32 to index
    %c0_104 = arith.constant 0 : index
    %383 = vector.load %arg11[%382, %c0_104] : memref<128x768xbf16, #tpu.memory_space<vmem>>, vector<16x384xbf16>
    %384 = arith.index_cast %381 : i32 to index
    %c384_105 = arith.constant 384 : index
    %385 = vector.load %arg11[%384, %c384_105] : memref<128x768xbf16, #tpu.memory_space<vmem>>, vector<16x384xbf16>
    %cst_106 = arith.constant dense<0.000000e+00> : vector<16x384xf32>
    %386 = tpu.matmul %375, %16, %cst_106 {dimension_numbers = #tpu.dot_dimension_numbers<[1], [0], [0], [1], [0, 0, 1, 1], [], []>} : vector<16x128xbf16>, vector<128x384xbf16>, vector<16x384xf32> -> vector<16x384xf32>
    %387 = arith.addf %386, %22 : vector<16x384xf32>
    %388 = vector.extract_strided_slice %383 {offsets = [0, 0], sizes = [16, 128], strides = [1, 1]} : vector<16x384xbf16> to vector<16x128xbf16>
    %389 = vector.extract_strided_slice %387 {offsets = [0, 0], sizes = [16, 128], strides = [1, 1]} : vector<16x384xf32> to vector<16x128xf32>
    %390 = arith.extf %388 : vector<16x128xbf16> to vector<16x128xf32>
    %391 = arith.addf %390, %389 : vector<16x128xf32>
    %392 = arith.negf %391 : vector<16x128xf32>
    %393 = math.exp %392 : vector<16x128xf32>
    %cst_107 = arith.constant 1.000000e+00 : f32
    %394 = vector.broadcast %cst_107 : f32 to vector<16x128xf32>
    %395 = arith.addf %394, %393 : vector<16x128xf32>
    %396 = arith.divf %394, %395 : vector<16x128xf32>
    %397 = vector.extract_strided_slice %383 {offsets = [0, 128], sizes = [16, 128], strides = [1, 1]} : vector<16x384xbf16> to vector<16x128xbf16>
    %398 = vector.extract_strided_slice %387 {offsets = [0, 128], sizes = [16, 128], strides = [1, 1]} : vector<16x384xf32> to vector<16x128xf32>
    %399 = arith.extf %397 : vector<16x128xbf16> to vector<16x128xf32>
    %400 = arith.addf %399, %398 : vector<16x128xf32>
    %401 = arith.negf %400 : vector<16x128xf32>
    %402 = math.exp %401 : vector<16x128xf32>
    %cst_108 = arith.constant 1.000000e+00 : f32
    %403 = vector.broadcast %cst_108 : f32 to vector<16x128xf32>
    %404 = arith.addf %403, %402 : vector<16x128xf32>
    %405 = arith.divf %403, %404 : vector<16x128xf32>
    %406 = vector.extract_strided_slice %383 {offsets = [0, 256], sizes = [16, 128], strides = [1, 1]} : vector<16x384xbf16> to vector<16x128xbf16>
    %407 = vector.extract_strided_slice %387 {offsets = [0, 256], sizes = [16, 128], strides = [1, 1]} : vector<16x384xf32> to vector<16x128xf32>
    %408 = arith.mulf %396, %407 : vector<16x128xf32>
    %409 = arith.extf %406 : vector<16x128xbf16> to vector<16x128xf32>
    %410 = arith.addf %409, %408 : vector<16x128xf32>
    %411 = math.tanh %410 : vector<16x128xf32>
    %cst_109 = arith.constant 1.000000e+00 : f32
    %412 = vector.broadcast %cst_109 : f32 to vector<16x128xf32>
    %413 = arith.subf %412, %405 : vector<16x128xf32>
    %414 = arith.mulf %413, %411 : vector<16x128xf32>
    %415 = arith.mulf %405, %330 : vector<16x128xf32>
    %416 = arith.addf %414, %415 : vector<16x128xf32>
    %cst_110 = arith.constant dense<0.000000e+00> : vector<16x384xf32>
    %417 = tpu.matmul %376, %18, %cst_110 {dimension_numbers = #tpu.dot_dimension_numbers<[1], [0], [0], [1], [0, 0, 1, 1], [], []>} : vector<16x128xbf16>, vector<128x384xbf16>, vector<16x384xf32> -> vector<16x384xf32>
    %418 = arith.addf %417, %26 : vector<16x384xf32>
    %419 = vector.extract_strided_slice %385 {offsets = [0, 0], sizes = [16, 128], strides = [1, 1]} : vector<16x384xbf16> to vector<16x128xbf16>
    %420 = vector.extract_strided_slice %418 {offsets = [0, 0], sizes = [16, 128], strides = [1, 1]} : vector<16x384xf32> to vector<16x128xf32>
    %421 = arith.extf %419 : vector<16x128xbf16> to vector<16x128xf32>
    %422 = arith.addf %421, %420 : vector<16x128xf32>
    %423 = arith.negf %422 : vector<16x128xf32>
    %424 = math.exp %423 : vector<16x128xf32>
    %cst_111 = arith.constant 1.000000e+00 : f32
    %425 = vector.broadcast %cst_111 : f32 to vector<16x128xf32>
    %426 = arith.addf %425, %424 : vector<16x128xf32>
    %427 = arith.divf %425, %426 : vector<16x128xf32>
    %428 = vector.extract_strided_slice %385 {offsets = [0, 128], sizes = [16, 128], strides = [1, 1]} : vector<16x384xbf16> to vector<16x128xbf16>
    %429 = vector.extract_strided_slice %418 {offsets = [0, 128], sizes = [16, 128], strides = [1, 1]} : vector<16x384xf32> to vector<16x128xf32>
    %430 = arith.extf %428 : vector<16x128xbf16> to vector<16x128xf32>
    %431 = arith.addf %430, %429 : vector<16x128xf32>
    %432 = arith.negf %431 : vector<16x128xf32>
    %433 = math.exp %432 : vector<16x128xf32>
    %cst_112 = arith.constant 1.000000e+00 : f32
    %434 = vector.broadcast %cst_112 : f32 to vector<16x128xf32>
    %435 = arith.addf %434, %433 : vector<16x128xf32>
    %436 = arith.divf %434, %435 : vector<16x128xf32>
    %437 = vector.extract_strided_slice %385 {offsets = [0, 256], sizes = [16, 128], strides = [1, 1]} : vector<16x384xbf16> to vector<16x128xbf16>
    %438 = vector.extract_strided_slice %418 {offsets = [0, 256], sizes = [16, 128], strides = [1, 1]} : vector<16x384xf32> to vector<16x128xf32>
    %439 = arith.mulf %427, %438 : vector<16x128xf32>
    %440 = arith.extf %437 : vector<16x128xbf16> to vector<16x128xf32>
    %441 = arith.addf %440, %439 : vector<16x128xf32>
    %442 = math.tanh %441 : vector<16x128xf32>
    %cst_113 = arith.constant 1.000000e+00 : f32
    %443 = vector.broadcast %cst_113 : f32 to vector<16x128xf32>
    %444 = arith.subf %443, %436 : vector<16x128xf32>
    %445 = arith.mulf %444, %442 : vector<16x128xf32>
    %446 = arith.mulf %436, %364 : vector<16x128xf32>
    %447 = arith.addf %445, %446 : vector<16x128xf32>
    %448 = arith.addi %28, %377 : i32
    %c8_i32_114 = arith.constant 8 : i32
    %449 = arith.cmpi slt, %448, %c8_i32_114 : i32
    %450 = arith.select %449, %447, %364 : vector<16x128xf32>
    %451 = arith.truncf %416 : vector<16x128xf32> to vector<16x128xbf16>
    %452 = arith.index_cast %c4_i32 : i32 to index
    %c0_115 = arith.constant 0 : index
    %c0_116 = arith.constant 0 : index
    %453 = vector.load %arg7[%452, %c0_115, %c0_116] : memref<8x16x128xbf16, #tpu.memory_space<vmem>>, vector<1x16x128xbf16>
    %454 = vector.shape_cast %453 : vector<1x16x128xbf16> to vector<16x128xbf16>
    %455 = vector.shape_cast %451 : vector<16x128xbf16> to vector<1x16x128xbf16>
    tpu.vector_store %arg7[%452, %c0_115, %c0_116], %455 {strides = array<i32>} : memref<8x16x128xbf16, #tpu.memory_space<vmem>>, vector<1x16x128xbf16>,
    %456 = arith.truncf %450 : vector<16x128xf32> to vector<16x128xbf16>
    %457 = arith.index_cast %377 : i32 to index
    %c0_117 = arith.constant 0 : index
    %c0_118 = arith.constant 0 : index
    %458 = vector.load %arg8[%457, %c0_117, %c0_118] : memref<8x16x128xbf16, #tpu.memory_space<vmem>>, vector<1x16x128xbf16>
    %459 = vector.shape_cast %458 : vector<1x16x128xbf16> to vector<16x128xbf16>
    %460 = vector.shape_cast %456 : vector<16x128xbf16> to vector<1x16x128xbf16>
    tpu.vector_store %arg8[%457, %c0_117, %c0_118], %460 {strides = array<i32>} : memref<8x16x128xbf16, #tpu.memory_space<vmem>>, vector<1x16x128xbf16>,
    %461 = arith.truncf %416 : vector<16x128xf32> to vector<16x128xbf16>
    %462 = arith.truncf %450 : vector<16x128xf32> to vector<16x128xbf16>
    %c5_i32 = arith.constant 5 : i32
    %c7_i32_119 = arith.constant 7 : i32
    %463 = arith.subi %c7_i32_119, %c5_i32 : i32
    %c16_i32_120 = arith.constant 16 : i32
    %464 = arith.muli %c5_i32, %c16_i32_120 : i32
    %465 = tpu.assume_multiple %464, 16 : i32
    %c16_i32_121 = arith.constant 16 : i32
    %466 = arith.muli %463, %c16_i32_121 : i32
    %467 = tpu.assume_multiple %466, 16 : i32
    %468 = arith.index_cast %465 : i32 to index
    %c0_122 = arith.constant 0 : index
    %469 = vector.load %arg11[%468, %c0_122] : memref<128x768xbf16, #tpu.memory_space<vmem>>, vector<16x384xbf16>
    %470 = arith.index_cast %467 : i32 to index
    %c384_123 = arith.constant 384 : index
    %471 = vector.load %arg11[%470, %c384_123] : memref<128x768xbf16, #tpu.memory_space<vmem>>, vector<16x384xbf16>
    %cst_124 = arith.constant dense<0.000000e+00> : vector<16x384xf32>
    %472 = tpu.matmul %461, %16, %cst_124 {dimension_numbers = #tpu.dot_dimension_numbers<[1], [0], [0], [1], [0, 0, 1, 1], [], []>} : vector<16x128xbf16>, vector<128x384xbf16>, vector<16x384xf32> -> vector<16x384xf32>
    %473 = arith.addf %472, %22 : vector<16x384xf32>
    %474 = vector.extract_strided_slice %469 {offsets = [0, 0], sizes = [16, 128], strides = [1, 1]} : vector<16x384xbf16> to vector<16x128xbf16>
    %475 = vector.extract_strided_slice %473 {offsets = [0, 0], sizes = [16, 128], strides = [1, 1]} : vector<16x384xf32> to vector<16x128xf32>
    %476 = arith.extf %474 : vector<16x128xbf16> to vector<16x128xf32>
    %477 = arith.addf %476, %475 : vector<16x128xf32>
    %478 = arith.negf %477 : vector<16x128xf32>
    %479 = math.exp %478 : vector<16x128xf32>
    %cst_125 = arith.constant 1.000000e+00 : f32
    %480 = vector.broadcast %cst_125 : f32 to vector<16x128xf32>
    %481 = arith.addf %480, %479 : vector<16x128xf32>
    %482 = arith.divf %480, %481 : vector<16x128xf32>
    %483 = vector.extract_strided_slice %469 {offsets = [0, 128], sizes = [16, 128], strides = [1, 1]} : vector<16x384xbf16> to vector<16x128xbf16>
    %484 = vector.extract_strided_slice %473 {offsets = [0, 128], sizes = [16, 128], strides = [1, 1]} : vector<16x384xf32> to vector<16x128xf32>
    %485 = arith.extf %483 : vector<16x128xbf16> to vector<16x128xf32>
    %486 = arith.addf %485, %484 : vector<16x128xf32>
    %487 = arith.negf %486 : vector<16x128xf32>
    %488 = math.exp %487 : vector<16x128xf32>
    %cst_126 = arith.constant 1.000000e+00 : f32
    %489 = vector.broadcast %cst_126 : f32 to vector<16x128xf32>
    %490 = arith.addf %489, %488 : vector<16x128xf32>
    %491 = arith.divf %489, %490 : vector<16x128xf32>
    %492 = vector.extract_strided_slice %469 {offsets = [0, 256], sizes = [16, 128], strides = [1, 1]} : vector<16x384xbf16> to vector<16x128xbf16>
    %493 = vector.extract_strided_slice %473 {offsets = [0, 256], sizes = [16, 128], strides = [1, 1]} : vector<16x384xf32> to vector<16x128xf32>
    %494 = arith.mulf %482, %493 : vector<16x128xf32>
    %495 = arith.extf %492 : vector<16x128xbf16> to vector<16x128xf32>
    %496 = arith.addf %495, %494 : vector<16x128xf32>
    %497 = math.tanh %496 : vector<16x128xf32>
    %cst_127 = arith.constant 1.000000e+00 : f32
    %498 = vector.broadcast %cst_127 : f32 to vector<16x128xf32>
    %499 = arith.subf %498, %491 : vector<16x128xf32>
    %500 = arith.mulf %499, %497 : vector<16x128xf32>
    %501 = arith.mulf %491, %416 : vector<16x128xf32>
    %502 = arith.addf %500, %501 : vector<16x128xf32>
    %cst_128 = arith.constant dense<0.000000e+00> : vector<16x384xf32>
    %503 = tpu.matmul %462, %18, %cst_128 {dimension_numbers = #tpu.dot_dimension_numbers<[1], [0], [0], [1], [0, 0, 1, 1], [], []>} : vector<16x128xbf16>, vector<128x384xbf16>, vector<16x384xf32> -> vector<16x384xf32>
    %504 = arith.addf %503, %26 : vector<16x384xf32>
    %505 = vector.extract_strided_slice %471 {offsets = [0, 0], sizes = [16, 128], strides = [1, 1]} : vector<16x384xbf16> to vector<16x128xbf16>
    %506 = vector.extract_strided_slice %504 {offsets = [0, 0], sizes = [16, 128], strides = [1, 1]} : vector<16x384xf32> to vector<16x128xf32>
    %507 = arith.extf %505 : vector<16x128xbf16> to vector<16x128xf32>
    %508 = arith.addf %507, %506 : vector<16x128xf32>
    %509 = arith.negf %508 : vector<16x128xf32>
    %510 = math.exp %509 : vector<16x128xf32>
    %cst_129 = arith.constant 1.000000e+00 : f32
    %511 = vector.broadcast %cst_129 : f32 to vector<16x128xf32>
    %512 = arith.addf %511, %510 : vector<16x128xf32>
    %513 = arith.divf %511, %512 : vector<16x128xf32>
    %514 = vector.extract_strided_slice %471 {offsets = [0, 128], sizes = [16, 128], strides = [1, 1]} : vector<16x384xbf16> to vector<16x128xbf16>
    %515 = vector.extract_strided_slice %504 {offsets = [0, 128], sizes = [16, 128], strides = [1, 1]} : vector<16x384xf32> to vector<16x128xf32>
    %516 = arith.extf %514 : vector<16x128xbf16> to vector<16x128xf32>
    %517 = arith.addf %516, %515 : vector<16x128xf32>
    %518 = arith.negf %517 : vector<16x128xf32>
    %519 = math.exp %518 : vector<16x128xf32>
    %cst_130 = arith.constant 1.000000e+00 : f32
    %520 = vector.broadcast %cst_130 : f32 to vector<16x128xf32>
    %521 = arith.addf %520, %519 : vector<16x128xf32>
    %522 = arith.divf %520, %521 : vector<16x128xf32>
    %523 = vector.extract_strided_slice %471 {offsets = [0, 256], sizes = [16, 128], strides = [1, 1]} : vector<16x384xbf16> to vector<16x128xbf16>
    %524 = vector.extract_strided_slice %504 {offsets = [0, 256], sizes = [16, 128], strides = [1, 1]} : vector<16x384xf32> to vector<16x128xf32>
    %525 = arith.mulf %513, %524 : vector<16x128xf32>
    %526 = arith.extf %523 : vector<16x128xbf16> to vector<16x128xf32>
    %527 = arith.addf %526, %525 : vector<16x128xf32>
    %528 = math.tanh %527 : vector<16x128xf32>
    %cst_131 = arith.constant 1.000000e+00 : f32
    %529 = vector.broadcast %cst_131 : f32 to vector<16x128xf32>
    %530 = arith.subf %529, %522 : vector<16x128xf32>
    %531 = arith.mulf %530, %528 : vector<16x128xf32>
    %532 = arith.mulf %522, %450 : vector<16x128xf32>
    %533 = arith.addf %531, %532 : vector<16x128xf32>
    %534 = arith.addi %28, %463 : i32
    %c8_i32_132 = arith.constant 8 : i32
    %535 = arith.cmpi slt, %534, %c8_i32_132 : i32
    %536 = arith.select %535, %533, %450 : vector<16x128xf32>
    %537 = arith.truncf %502 : vector<16x128xf32> to vector<16x128xbf16>
    %538 = arith.index_cast %c5_i32 : i32 to index
    %c0_133 = arith.constant 0 : index
    %c0_134 = arith.constant 0 : index
    %539 = vector.load %arg7[%538, %c0_133, %c0_134] : memref<8x16x128xbf16, #tpu.memory_space<vmem>>, vector<1x16x128xbf16>
    %540 = vector.shape_cast %539 : vector<1x16x128xbf16> to vector<16x128xbf16>
    %541 = vector.shape_cast %537 : vector<16x128xbf16> to vector<1x16x128xbf16>
    tpu.vector_store %arg7[%538, %c0_133, %c0_134], %541 {strides = array<i32>} : memref<8x16x128xbf16, #tpu.memory_space<vmem>>, vector<1x16x128xbf16>,
    %542 = arith.truncf %536 : vector<16x128xf32> to vector<16x128xbf16>
    %543 = arith.index_cast %463 : i32 to index
    %c0_135 = arith.constant 0 : index
    %c0_136 = arith.constant 0 : index
    %544 = vector.load %arg8[%543, %c0_135, %c0_136] : memref<8x16x128xbf16, #tpu.memory_space<vmem>>, vector<1x16x128xbf16>
    %545 = vector.shape_cast %544 : vector<1x16x128xbf16> to vector<16x128xbf16>
    %546 = vector.shape_cast %542 : vector<16x128xbf16> to vector<1x16x128xbf16>
    tpu.vector_store %arg8[%543, %c0_135, %c0_136], %546 {strides = array<i32>} : memref<8x16x128xbf16, #tpu.memory_space<vmem>>, vector<1x16x128xbf16>,
    %547 = arith.truncf %502 : vector<16x128xf32> to vector<16x128xbf16>
    %548 = arith.truncf %536 : vector<16x128xf32> to vector<16x128xbf16>
    %c6_i32 = arith.constant 6 : i32
    %c7_i32_137 = arith.constant 7 : i32
    %549 = arith.subi %c7_i32_137, %c6_i32 : i32
    %c16_i32_138 = arith.constant 16 : i32
    %550 = arith.muli %c6_i32, %c16_i32_138 : i32
    %551 = tpu.assume_multiple %550, 16 : i32
    %c16_i32_139 = arith.constant 16 : i32
    %552 = arith.muli %549, %c16_i32_139 : i32
    %553 = tpu.assume_multiple %552, 16 : i32
    %554 = arith.index_cast %551 : i32 to index
    %c0_140 = arith.constant 0 : index
    %555 = vector.load %arg11[%554, %c0_140] : memref<128x768xbf16, #tpu.memory_space<vmem>>, vector<16x384xbf16>
    %556 = arith.index_cast %553 : i32 to index
    %c384_141 = arith.constant 384 : index
    %557 = vector.load %arg11[%556, %c384_141] : memref<128x768xbf16, #tpu.memory_space<vmem>>, vector<16x384xbf16>
    %cst_142 = arith.constant dense<0.000000e+00> : vector<16x384xf32>
    %558 = tpu.matmul %547, %16, %cst_142 {dimension_numbers = #tpu.dot_dimension_numbers<[1], [0], [0], [1], [0, 0, 1, 1], [], []>} : vector<16x128xbf16>, vector<128x384xbf16>, vector<16x384xf32> -> vector<16x384xf32>
    %559 = arith.addf %558, %22 : vector<16x384xf32>
    %560 = vector.extract_strided_slice %555 {offsets = [0, 0], sizes = [16, 128], strides = [1, 1]} : vector<16x384xbf16> to vector<16x128xbf16>
    %561 = vector.extract_strided_slice %559 {offsets = [0, 0], sizes = [16, 128], strides = [1, 1]} : vector<16x384xf32> to vector<16x128xf32>
    %562 = arith.extf %560 : vector<16x128xbf16> to vector<16x128xf32>
    %563 = arith.addf %562, %561 : vector<16x128xf32>
    %564 = arith.negf %563 : vector<16x128xf32>
    %565 = math.exp %564 : vector<16x128xf32>
    %cst_143 = arith.constant 1.000000e+00 : f32
    %566 = vector.broadcast %cst_143 : f32 to vector<16x128xf32>
    %567 = arith.addf %566, %565 : vector<16x128xf32>
    %568 = arith.divf %566, %567 : vector<16x128xf32>
    %569 = vector.extract_strided_slice %555 {offsets = [0, 128], sizes = [16, 128], strides = [1, 1]} : vector<16x384xbf16> to vector<16x128xbf16>
    %570 = vector.extract_strided_slice %559 {offsets = [0, 128], sizes = [16, 128], strides = [1, 1]} : vector<16x384xf32> to vector<16x128xf32>
    %571 = arith.extf %569 : vector<16x128xbf16> to vector<16x128xf32>
    %572 = arith.addf %571, %570 : vector<16x128xf32>
    %573 = arith.negf %572 : vector<16x128xf32>
    %574 = math.exp %573 : vector<16x128xf32>
    %cst_144 = arith.constant 1.000000e+00 : f32
    %575 = vector.broadcast %cst_144 : f32 to vector<16x128xf32>
    %576 = arith.addf %575, %574 : vector<16x128xf32>
    %577 = arith.divf %575, %576 : vector<16x128xf32>
    %578 = vector.extract_strided_slice %555 {offsets = [0, 256], sizes = [16, 128], strides = [1, 1]} : vector<16x384xbf16> to vector<16x128xbf16>
    %579 = vector.extract_strided_slice %559 {offsets = [0, 256], sizes = [16, 128], strides = [1, 1]} : vector<16x384xf32> to vector<16x128xf32>
    %580 = arith.mulf %568, %579 : vector<16x128xf32>
    %581 = arith.extf %578 : vector<16x128xbf16> to vector<16x128xf32>
    %582 = arith.addf %581, %580 : vector<16x128xf32>
    %583 = math.tanh %582 : vector<16x128xf32>
    %cst_145 = arith.constant 1.000000e+00 : f32
    %584 = vector.broadcast %cst_145 : f32 to vector<16x128xf32>
    %585 = arith.subf %584, %577 : vector<16x128xf32>
    %586 = arith.mulf %585, %583 : vector<16x128xf32>
    %587 = arith.mulf %577, %502 : vector<16x128xf32>
    %588 = arith.addf %586, %587 : vector<16x128xf32>
    %cst_146 = arith.constant dense<0.000000e+00> : vector<16x384xf32>
    %589 = tpu.matmul %548, %18, %cst_146 {dimension_numbers = #tpu.dot_dimension_numbers<[1], [0], [0], [1], [0, 0, 1, 1], [], []>} : vector<16x128xbf16>, vector<128x384xbf16>, vector<16x384xf32> -> vector<16x384xf32>
    %590 = arith.addf %589, %26 : vector<16x384xf32>
    %591 = vector.extract_strided_slice %557 {offsets = [0, 0], sizes = [16, 128], strides = [1, 1]} : vector<16x384xbf16> to vector<16x128xbf16>
    %592 = vector.extract_strided_slice %590 {offsets = [0, 0], sizes = [16, 128], strides = [1, 1]} : vector<16x384xf32> to vector<16x128xf32>
    %593 = arith.extf %591 : vector<16x128xbf16> to vector<16x128xf32>
    %594 = arith.addf %593, %592 : vector<16x128xf32>
    %595 = arith.negf %594 : vector<16x128xf32>
    %596 = math.exp %595 : vector<16x128xf32>
    %cst_147 = arith.constant 1.000000e+00 : f32
    %597 = vector.broadcast %cst_147 : f32 to vector<16x128xf32>
    %598 = arith.addf %597, %596 : vector<16x128xf32>
    %599 = arith.divf %597, %598 : vector<16x128xf32>
    %600 = vector.extract_strided_slice %557 {offsets = [0, 128], sizes = [16, 128], strides = [1, 1]} : vector<16x384xbf16> to vector<16x128xbf16>
    %601 = vector.extract_strided_slice %590 {offsets = [0, 128], sizes = [16, 128], strides = [1, 1]} : vector<16x384xf32> to vector<16x128xf32>
    %602 = arith.extf %600 : vector<16x128xbf16> to vector<16x128xf32>
    %603 = arith.addf %602, %601 : vector<16x128xf32>
    %604 = arith.negf %603 : vector<16x128xf32>
    %605 = math.exp %604 : vector<16x128xf32>
    %cst_148 = arith.constant 1.000000e+00 : f32
    %606 = vector.broadcast %cst_148 : f32 to vector<16x128xf32>
    %607 = arith.addf %606, %605 : vector<16x128xf32>
    %608 = arith.divf %606, %607 : vector<16x128xf32>
    %609 = vector.extract_strided_slice %557 {offsets = [0, 256], sizes = [16, 128], strides = [1, 1]} : vector<16x384xbf16> to vector<16x128xbf16>
    %610 = vector.extract_strided_slice %590 {offsets = [0, 256], sizes = [16, 128], strides = [1, 1]} : vector<16x384xf32> to vector<16x128xf32>
    %611 = arith.mulf %599, %610 : vector<16x128xf32>
    %612 = arith.extf %609 : vector<16x128xbf16> to vector<16x128xf32>
    %613 = arith.addf %612, %611 : vector<16x128xf32>
    %614 = math.tanh %613 : vector<16x128xf32>
    %cst_149 = arith.constant 1.000000e+00 : f32
    %615 = vector.broadcast %cst_149 : f32 to vector<16x128xf32>
    %616 = arith.subf %615, %608 : vector<16x128xf32>
    %617 = arith.mulf %616, %614 : vector<16x128xf32>
    %618 = arith.mulf %608, %536 : vector<16x128xf32>
    %619 = arith.addf %617, %618 : vector<16x128xf32>
    %620 = arith.addi %28, %549 : i32
    %c8_i32_150 = arith.constant 8 : i32
    %621 = arith.cmpi slt, %620, %c8_i32_150 : i32
    %622 = arith.select %621, %619, %536 : vector<16x128xf32>
    %623 = arith.truncf %588 : vector<16x128xf32> to vector<16x128xbf16>
    %624 = arith.index_cast %c6_i32 : i32 to index
    %c0_151 = arith.constant 0 : index
    %c0_152 = arith.constant 0 : index
    %625 = vector.load %arg7[%624, %c0_151, %c0_152] : memref<8x16x128xbf16, #tpu.memory_space<vmem>>, vector<1x16x128xbf16>
    %626 = vector.shape_cast %625 : vector<1x16x128xbf16> to vector<16x128xbf16>
    %627 = vector.shape_cast %623 : vector<16x128xbf16> to vector<1x16x128xbf16>
    tpu.vector_store %arg7[%624, %c0_151, %c0_152], %627 {strides = array<i32>} : memref<8x16x128xbf16, #tpu.memory_space<vmem>>, vector<1x16x128xbf16>,
    %628 = arith.truncf %622 : vector<16x128xf32> to vector<16x128xbf16>
    %629 = arith.index_cast %549 : i32 to index
    %c0_153 = arith.constant 0 : index
    %c0_154 = arith.constant 0 : index
    %630 = vector.load %arg8[%629, %c0_153, %c0_154] : memref<8x16x128xbf16, #tpu.memory_space<vmem>>, vector<1x16x128xbf16>
    %631 = vector.shape_cast %630 : vector<1x16x128xbf16> to vector<16x128xbf16>
    %632 = vector.shape_cast %628 : vector<16x128xbf16> to vector<1x16x128xbf16>
    tpu.vector_store %arg8[%629, %c0_153, %c0_154], %632 {strides = array<i32>} : memref<8x16x128xbf16, #tpu.memory_space<vmem>>, vector<1x16x128xbf16>,
    %633 = arith.truncf %588 : vector<16x128xf32> to vector<16x128xbf16>
    %634 = arith.truncf %622 : vector<16x128xf32> to vector<16x128xbf16>
    %c7_i32_155 = arith.constant 7 : i32
    %c7_i32_156 = arith.constant 7 : i32
    %635 = arith.subi %c7_i32_156, %c7_i32_155 : i32
    %c16_i32_157 = arith.constant 16 : i32
    %636 = arith.muli %c7_i32_155, %c16_i32_157 : i32
    %637 = tpu.assume_multiple %636, 16 : i32
    %c16_i32_158 = arith.constant 16 : i32
    %638 = arith.muli %635, %c16_i32_158 : i32
    %639 = tpu.assume_multiple %638, 16 : i32
    %640 = arith.index_cast %637 : i32 to index
    %c0_159 = arith.constant 0 : index
    %641 = vector.load %arg11[%640, %c0_159] : memref<128x768xbf16, #tpu.memory_space<vmem>>, vector<16x384xbf16>
    %642 = arith.index_cast %639 : i32 to index
    %c384_160 = arith.constant 384 : index
    %643 = vector.load %arg11[%642, %c384_160] : memref<128x768xbf16, #tpu.memory_space<vmem>>, vector<16x384xbf16>
    %cst_161 = arith.constant dense<0.000000e+00> : vector<16x384xf32>
    %644 = tpu.matmul %633, %16, %cst_161 {dimension_numbers = #tpu.dot_dimension_numbers<[1], [0], [0], [1], [0, 0, 1, 1], [], []>} : vector<16x128xbf16>, vector<128x384xbf16>, vector<16x384xf32> -> vector<16x384xf32>
    %645 = arith.addf %644, %22 : vector<16x384xf32>
    %646 = vector.extract_strided_slice %641 {offsets = [0, 0], sizes = [16, 128], strides = [1, 1]} : vector<16x384xbf16> to vector<16x128xbf16>
    %647 = vector.extract_strided_slice %645 {offsets = [0, 0], sizes = [16, 128], strides = [1, 1]} : vector<16x384xf32> to vector<16x128xf32>
    %648 = arith.extf %646 : vector<16x128xbf16> to vector<16x128xf32>
    %649 = arith.addf %648, %647 : vector<16x128xf32>
    %650 = arith.negf %649 : vector<16x128xf32>
    %651 = math.exp %650 : vector<16x128xf32>
    %cst_162 = arith.constant 1.000000e+00 : f32
    %652 = vector.broadcast %cst_162 : f32 to vector<16x128xf32>
    %653 = arith.addf %652, %651 : vector<16x128xf32>
    %654 = arith.divf %652, %653 : vector<16x128xf32>
    %655 = vector.extract_strided_slice %641 {offsets = [0, 128], sizes = [16, 128], strides = [1, 1]} : vector<16x384xbf16> to vector<16x128xbf16>
    %656 = vector.extract_strided_slice %645 {offsets = [0, 128], sizes = [16, 128], strides = [1, 1]} : vector<16x384xf32> to vector<16x128xf32>
    %657 = arith.extf %655 : vector<16x128xbf16> to vector<16x128xf32>
    %658 = arith.addf %657, %656 : vector<16x128xf32>
    %659 = arith.negf %658 : vector<16x128xf32>
    %660 = math.exp %659 : vector<16x128xf32>
    %cst_163 = arith.constant 1.000000e+00 : f32
    %661 = vector.broadcast %cst_163 : f32 to vector<16x128xf32>
    %662 = arith.addf %661, %660 : vector<16x128xf32>
    %663 = arith.divf %661, %662 : vector<16x128xf32>
    %664 = vector.extract_strided_slice %641 {offsets = [0, 256], sizes = [16, 128], strides = [1, 1]} : vector<16x384xbf16> to vector<16x128xbf16>
    %665 = vector.extract_strided_slice %645 {offsets = [0, 256], sizes = [16, 128], strides = [1, 1]} : vector<16x384xf32> to vector<16x128xf32>
    %666 = arith.mulf %654, %665 : vector<16x128xf32>
    %667 = arith.extf %664 : vector<16x128xbf16> to vector<16x128xf32>
    %668 = arith.addf %667, %666 : vector<16x128xf32>
    %669 = math.tanh %668 : vector<16x128xf32>
    %cst_164 = arith.constant 1.000000e+00 : f32
    %670 = vector.broadcast %cst_164 : f32 to vector<16x128xf32>
    %671 = arith.subf %670, %663 : vector<16x128xf32>
    %672 = arith.mulf %671, %669 : vector<16x128xf32>
    %673 = arith.mulf %663, %588 : vector<16x128xf32>
    %674 = arith.addf %672, %673 : vector<16x128xf32>
    %cst_165 = arith.constant dense<0.000000e+00> : vector<16x384xf32>
    %675 = tpu.matmul %634, %18, %cst_165 {dimension_numbers = #tpu.dot_dimension_numbers<[1], [0], [0], [1], [0, 0, 1, 1], [], []>} : vector<16x128xbf16>, vector<128x384xbf16>, vector<16x384xf32> -> vector<16x384xf32>
    %676 = arith.addf %675, %26 : vector<16x384xf32>
    %677 = vector.extract_strided_slice %643 {offsets = [0, 0], sizes = [16, 128], strides = [1, 1]} : vector<16x384xbf16> to vector<16x128xbf16>
    %678 = vector.extract_strided_slice %676 {offsets = [0, 0], sizes = [16, 128], strides = [1, 1]} : vector<16x384xf32> to vector<16x128xf32>
    %679 = arith.extf %677 : vector<16x128xbf16> to vector<16x128xf32>
    %680 = arith.addf %679, %678 : vector<16x128xf32>
    %681 = arith.negf %680 : vector<16x128xf32>
    %682 = math.exp %681 : vector<16x128xf32>
    %cst_166 = arith.constant 1.000000e+00 : f32
    %683 = vector.broadcast %cst_166 : f32 to vector<16x128xf32>
    %684 = arith.addf %683, %682 : vector<16x128xf32>
    %685 = arith.divf %683, %684 : vector<16x128xf32>
    %686 = vector.extract_strided_slice %643 {offsets = [0, 128], sizes = [16, 128], strides = [1, 1]} : vector<16x384xbf16> to vector<16x128xbf16>
    %687 = vector.extract_strided_slice %676 {offsets = [0, 128], sizes = [16, 128], strides = [1, 1]} : vector<16x384xf32> to vector<16x128xf32>
    %688 = arith.extf %686 : vector<16x128xbf16> to vector<16x128xf32>
    %689 = arith.addf %688, %687 : vector<16x128xf32>
    %690 = arith.negf %689 : vector<16x128xf32>
    %691 = math.exp %690 : vector<16x128xf32>
    %cst_167 = arith.constant 1.000000e+00 : f32
    %692 = vector.broadcast %cst_167 : f32 to vector<16x128xf32>
    %693 = arith.addf %692, %691 : vector<16x128xf32>
    %694 = arith.divf %692, %693 : vector<16x128xf32>
    %695 = vector.extract_strided_slice %643 {offsets = [0, 256], sizes = [16, 128], strides = [1, 1]} : vector<16x384xbf16> to vector<16x128xbf16>
    %696 = vector.extract_strided_slice %676 {offsets = [0, 256], sizes = [16, 128], strides = [1, 1]} : vector<16x384xf32> to vector<16x128xf32>
    %697 = arith.mulf %685, %696 : vector<16x128xf32>
    %698 = arith.extf %695 : vector<16x128xbf16> to vector<16x128xf32>
    %699 = arith.addf %698, %697 : vector<16x128xf32>
    %700 = math.tanh %699 : vector<16x128xf32>
    %cst_168 = arith.constant 1.000000e+00 : f32
    %701 = vector.broadcast %cst_168 : f32 to vector<16x128xf32>
    %702 = arith.subf %701, %694 : vector<16x128xf32>
    %703 = arith.mulf %702, %700 : vector<16x128xf32>
    %704 = arith.mulf %694, %622 : vector<16x128xf32>
    %705 = arith.addf %703, %704 : vector<16x128xf32>
    %706 = arith.addi %28, %635 : i32
    %c8_i32_169 = arith.constant 8 : i32
    %707 = arith.cmpi slt, %706, %c8_i32_169 : i32
    %708 = arith.select %707, %705, %622 : vector<16x128xf32>
    %709 = arith.truncf %674 : vector<16x128xf32> to vector<16x128xbf16>
    %710 = arith.index_cast %c7_i32_155 : i32 to index
    %c0_170 = arith.constant 0 : index
    %c0_171 = arith.constant 0 : index
    %711 = vector.load %arg7[%710, %c0_170, %c0_171] : memref<8x16x128xbf16, #tpu.memory_space<vmem>>, vector<1x16x128xbf16>
    %712 = vector.shape_cast %711 : vector<1x16x128xbf16> to vector<16x128xbf16>
    %713 = vector.shape_cast %709 : vector<16x128xbf16> to vector<1x16x128xbf16>
    tpu.vector_store %arg7[%710, %c0_170, %c0_171], %713 {strides = array<i32>} : memref<8x16x128xbf16, #tpu.memory_space<vmem>>, vector<1x16x128xbf16>,
    %714 = arith.truncf %708 : vector<16x128xf32> to vector<16x128xbf16>
    %715 = arith.index_cast %635 : i32 to index
    %c0_172 = arith.constant 0 : index
    %c0_173 = arith.constant 0 : index
    %716 = vector.load %arg8[%715, %c0_172, %c0_173] : memref<8x16x128xbf16, #tpu.memory_space<vmem>>, vector<1x16x128xbf16>
    %717 = vector.shape_cast %716 : vector<1x16x128xbf16> to vector<16x128xbf16>
    %718 = vector.shape_cast %714 : vector<16x128xbf16> to vector<1x16x128xbf16>
    tpu.vector_store %arg8[%715, %c0_172, %c0_173], %718 {strides = array<i32>} : memref<8x16x128xbf16, #tpu.memory_space<vmem>>, vector<1x16x128xbf16>,
    %719 = arith.truncf %674 : vector<16x128xf32> to vector<16x128xbf16>
    %720 = arith.truncf %708 : vector<16x128xf32> to vector<16x128xbf16>
    %c8_i32_174 = arith.constant 8 : i32
    %c0_175 = arith.constant 0 : index
    %c0_176 = arith.constant 0 : index
    %721 = vector.load %arg9[%c0_175, %c0_176] : memref<16x128xf32, #tpu.memory_space<vmem>>, vector<16x128xf32>
    tpu.vector_store %arg9[%c0_175, %c0_176], %674 {strides = array<i32>} : memref<16x128xf32, #tpu.memory_space<vmem>>, vector<16x128xf32>,
    %c0_177 = arith.constant 0 : index
    %c0_178 = arith.constant 0 : index
    %722 = vector.load %arg10[%c0_177, %c0_178] : memref<16x128xf32, #tpu.memory_space<vmem>>, vector<16x128xf32>
    tpu.vector_store %arg10[%c0_177, %c0_178], %708 {strides = array<i32>} : memref<16x128xf32, #tpu.memory_space<vmem>>, vector<16x128xf32>,
    return
  }
  func.func @transform_0(%arg0: i32) -> (i32, i32) {
    %c0_i32 = arith.constant 0 : i32
    %c0_i32_0 = arith.constant 0 : i32
    return %arg0, %c0_i32 : i32, i32
  }
  func.func @transform_1(%arg0: i32) -> (i32, i32) {
    %c0_i32 = arith.constant 0 : i32
    %0 = arith.subi %c0_i32, %arg0 : i32
    %c0_i32_0 = arith.constant 0 : i32
    %c0_i32_1 = arith.constant 0 : i32
    return %0, %c0_i32_0 : i32, i32
  }
  func.func @transform_2(%arg0: i32) -> (i32, i32, i32) {
    %c0_i32 = arith.constant 0 : i32
    %c0_i32_0 = arith.constant 0 : i32
    %c0_i32_1 = arith.constant 0 : i32
    %c0_i32_2 = arith.constant 0 : i32
    return %c0_i32, %c0_i32_0, %c0_i32_1 : i32, i32, i32
  }
  func.func @transform_3(%arg0: i32) -> (i32, i32, i32) {
    %c0_i32 = arith.constant 0 : i32
    %c0_i32_0 = arith.constant 0 : i32
    %c0_i32_1 = arith.constant 0 : i32
    %c0_i32_2 = arith.constant 0 : i32
    return %c0_i32, %c0_i32_0, %c0_i32_1 : i32, i32, i32
  }
  func.func @transform_4(%arg0: i32) -> (i32, i32, i32) {
    %c0_i32 = arith.constant 0 : i32
    %c0_i32_0 = arith.constant 0 : i32
    %c0_i32_1 = arith.constant 0 : i32
    %c0_i32_2 = arith.constant 0 : i32
    return %c0_i32, %c0_i32_0, %c0_i32_1 : i32, i32, i32
  }
  func.func @transform_5(%arg0: i32) -> (i32, i32, i32) {
    %c0_i32 = arith.constant 0 : i32
    %c0_i32_0 = arith.constant 0 : i32
    %c0_i32_1 = arith.constant 0 : i32
    %c0_i32_2 = arith.constant 0 : i32
    return %c0_i32, %c0_i32_0, %c0_i32_1 : i32, i32, i32
  }
  func.func @transform_6(%arg0: i32) -> (i32, i32, i32) {
    %c0_i32 = arith.constant 0 : i32
    %c0_i32_0 = arith.constant 0 : i32
    %c0_i32_1 = arith.constant 0 : i32
    return %arg0, %c0_i32, %c0_i32_0 : i32, i32, i32
  }
  func.func @transform_7(%arg0: i32) -> (i32, i32, i32) {
    %c0_i32 = arith.constant 0 : i32
    %0 = arith.subi %c0_i32, %arg0 : i32
    %c0_i32_0 = arith.constant 0 : i32
    %c0_i32_1 = arith.constant 0 : i32
    %c0_i32_2 = arith.constant 0 : i32
    return %0, %c0_i32_0, %c0_i32_1 : i32, i32, i32
  }
}

</mosaic_0001>

<bundles_post_ra>
// kernel: tpu_custom_call.1
= control target key start
LH: loop header
LB: loop body
LE: loop exit
PB: predicated region body
PF: predicated region fallthrough
CT: control target
= control target key end

     0   :  { %13 = vsyncpa [#allocation6], 0  ;;  %s7045_s0 = inlined_call_operand.hbm [shape: bf16[128,128], index: 0, kind: input, shape index: {}]   ;;  %s7046_s1 = inlined_call_operand.hbm [shape: bf16[128,128], index: 1, kind: input, shape index: {}]   ;;  %s7047_s2 = inlined_call_operand.hbm [shape: f32[2,16,128], index: 2, kind: input, shape index: {}]   ;;  %s7048_s3 = inlined_call_operand.hbm [shape: bf16[2,128,384], index: 3, kind: input, shape index: {}]   ;;  %s7049_s4 = inlined_call_operand.hbm [shape: bf16[2,128,384], index: 4, kind: input, shape index: {}]   ;;  %s7050_s5 = inlined_call_operand.vmem [shape: f32[2,1,384], index: 5, kind: input, shape index: {}]   ;;  %s7051_s6 = inlined_call_operand.hbm [shape: bf16[8,16,128], index: 6, kind: output, shape index: {0}]   ;;  %s7052_s7 = inlined_call_operand.hbm [shape: bf16[8,16,128], index: 7, kind: output, shape index: {1}]  }
   0x1   :  { %14 = vsyncpa [#allocation9], 0 }
   0x2   :  { %15 = vsyncpa [#allocation12], 0 }
   0x3   :  { %16 = vsyncpa [#allocation7], 0 }
   0x4   :  { %17 = vsyncpa [#allocation16], 0  ;;  %s5535_s24 = smov [#allocation8]   ;;  %s5536_s26 = smov [#allocation11]  }
   0x5   :  { %s39_s25 = sshll.u32 %s5535_s24, 4  ;;  %s63_s27 = sshll.u32 %s5536_s26, 4  ;;  %s40_s25 = int_to_ptr.vmem [resolvable:$true] %s39_s25  ;;  %s5591_s27 = int_to_ptr.vmem [resolvable:$true] %s63_s27 }
   0x6   :  { %s5371_s30 = scalar_lea.hbm %s7046_s1, 1024 }
   0x7   :  { %p5372_p0 = scmp.ne.s32.totalorder %s7046_s1, %s5371_s30  ;;  %p5375_p1 = scmp.lt.u32.totalorder %s5371_s30, %s7046_s1 }
   0x9   :  { %p5377_p2 = pnand %p5375_p1, %p5372_p0 }
   0xb   :  { %5380 = shalt.err (!%p5377_p2)
}
   0xc   :  { %s5381_s12 = scalar_lea.vmem %s40_s25, 1024  ;;  %p5386_p4 = scmp.lt.s32.totalorder %s40_s25, %s40_s25 }
   0xd   :  { %p5382_p3 = scmp.ne.s32.totalorder %s40_s25, %s5381_s12  ;;  %p5387_p5 = scmp.lt.s32.totalorder %s5381_s12, %s5381_s12 }
   0xf   :  { %p5388_p6 = por %p5387_p5, %p5386_p4 }
  0x11   :  { %p5389_p7 = pnand %p5388_p6, %p5382_p3 }
  0x13   :  { %5392 = shalt.err (!%p5389_p7)
}
  0x14   :  { %s5537_s13 = smov 64   ;;  %s5538_s14 = smov 4  }
  0x15   :  { %45 = dma.hbm_to_vmem [thread:$0]  %s7046_s1, 1024, %s40_s25, [#allocation9], %s5537_s13, %s5537_s13, %s5538_s14  }
  0x16   :  { %s5393_s19 = scalar_lea.hbm %s7048_s3, 6144 }
  0x17   :  { %p5394_p8 = scmp.ne.s32.totalorder %s7048_s3, %s5393_s19  ;;  %p5397_p9 = scmp.lt.u32.totalorder %s5393_s19, %s7048_s3 }
  0x19   :  { %p5399_p10 = pnand %p5397_p9, %p5394_p8 }
  0x1b   :  { %5402 = shalt.err (!%p5399_p10)
}
  0x1c   :  { %s5403_s24 = scalar_lea.vmem %s5591_s27, 6144  ;;  %p5408_p12 = scmp.lt.s32.totalorder %s5591_s27, %s5591_s27 }
  0x1d   :  { %p5404_p11 = scmp.ne.s32.totalorder %s5591_s27, %s5403_s24  ;;  %p5409_p13 = scmp.lt.s32.totalorder %s5403_s24, %s5403_s24 }
  0x1f   :  { %p5410_p0 = por %p5409_p13, %p5408_p12 }
  0x21   :  { %p5411_p1 = pnand %p5410_p0, %p5404_p11 }
  0x23   :  { %5414 = shalt.err (!%p5411_p1)
}
  0x24   :  { %s5539_s1 = smov 192   ;;  %s5540_s25 = smov 12  }
  0x25   :  { %69 = dma.hbm_to_vmem [thread:$0]  %s7048_s3, 6144, %s5591_s27, [#allocation12], %s5539_s1, %s5539_s1, %s5540_s25  }
  0x26   :  { %s5541_s29 = smov [#allocation5]   ;;  %s5542_s8 = smov [#allocation10]  }
  0x27   :  { %s23_s30 = sshll.u32 %s5541_s29, 4  ;;  %s51_s9 = sshll.u32 %s5542_s8, 4  ;;  %s24_s30 = int_to_ptr.vmem [resolvable:$true] %s23_s30  ;;  %s5628_s9 = int_to_ptr.vmem [resolvable:$true] %s51_s9 }
  0x28   :  { %s5415_s12 = scalar_lea.hbm %s7045_s0, 1024 }
  0x29   :  { %p5416_p2 = scmp.ne.s32.totalorder %s7045_s0, %s5415_s12  ;;  %p5419_p3 = scmp.lt.u32.totalorder %s5415_s12, %s7045_s0 }
  0x2b   :  { %p5421_p4 = pnand %p5419_p3, %p5416_p2 }
  0x2d   :  { %5424 = shalt.err (!%p5421_p4)
}
  0x2e   :  { %s5425_s3 = scalar_lea.vmem %s24_s30, 1024  ;;  %p5430_p6 = scmp.lt.s32.totalorder %s24_s30, %s24_s30 }
  0x2f   :  { %p5426_p5 = scmp.ne.s32.totalorder %s24_s30, %s5425_s3  ;;  %p5431_p7 = scmp.lt.s32.totalorder %s5425_s3, %s5425_s3 }
  0x31   :  { %p5432_p8 = por %p5431_p7, %p5430_p6 }
  0x33   :  { %p5433_p9 = pnand %p5432_p8, %p5426_p5 }
  0x35   :  { %5436 = shalt.err (!%p5433_p9)
}
  0x36   :  { %29 = dma.hbm_to_vmem [thread:$0]  %s7045_s0, 1024, %s24_s30, [#allocation6], %s5537_s13, %s5537_s13, %s5538_s14  }
  0x37   :  { %s5437_s22 = scalar_lea.hbm %s7047_s2, 512 }
  0x38   :  { %p5438_p10 = scmp.ne.s32.totalorder %s7047_s2, %s5437_s22  ;;  %p5441_p11 = scmp.lt.u32.totalorder %s5437_s22, %s7047_s2 }
  0x3a   :  { %p5443_p12 = pnand %p5441_p11, %p5438_p10 }
  0x3c   :  { %5446 = shalt.err (!%p5443_p12)
}
  0x3d   :  { %s5447_s29 = scalar_lea.vmem %s5628_s9, 512  ;;  %p5452_p0 = scmp.lt.s32.totalorder %s5628_s9, %s5628_s9 }
  0x3e   :  { %p5448_p13 = scmp.ne.s32.totalorder %s5628_s9, %s5447_s29  ;;  %p5453_p1 = scmp.lt.s32.totalorder %s5447_s29, %s5447_s29 }
  0x40   :  { %p5454_p2 = por %p5453_p1, %p5452_p0 }
  0x42   :  { %p5455_p3 = pnand %p5454_p2, %p5448_p13 }
  0x44   :  { %5458 = shalt.err (!%p5455_p3)
}
  0x45   :  { %s5543_s0 = smov 128   ;;  %s5544_s30 = smov 8  }
  0x46   :  { %57 = dma.hbm_to_vmem [thread:$0]  %s7047_s2, 512, %s5628_s9, [#allocation9], %s5543_s0, %s5543_s0, %s5544_s30  }
  0x47   :  { %s5545_s11 = smov [#allocation13]   ;;  %s5459_s17 = scalar_lea.hbm %s7049_s4, 6144 }
  0x48   :  { %s75_s12 = sshll.u32 %s5545_s11, 4  ;;  %p5460_p4 = scmp.ne.s32.totalorder %s7049_s4, %s5459_s17  ;;  %s76_s12 = int_to_ptr.vmem [resolvable:$true] %s75_s12 }
  0x49   :  { %p5463_p5 = scmp.lt.u32.totalorder %s5459_s17, %s7049_s4 }
  0x4b   :  { %p5465_p6 = pnand %p5463_p5, %p5460_p4 }
  0x4d   :  { %5468 = shalt.err (!%p5465_p6)
}
  0x4e   :  { %s5469_s20 = scalar_lea.vmem %s76_s12, 6144  ;;  %p5474_p8 = scmp.lt.s32.totalorder %s76_s12, %s76_s12 }
  0x4f   :  { %p5470_p7 = scmp.ne.s32.totalorder %s76_s12, %s5469_s20  ;;  %p5475_p9 = scmp.lt.s32.totalorder %s5469_s20, %s5469_s20 }
  0x51   :  { %p5476_p10 = por %p5475_p9, %p5474_p8 }
  0x53   :  { %p5477_p11 = pnand %p5476_p10, %p5470_p7 }
  0x55   :  { %5480 = shalt.err (!%p5477_p11)
}
  0x56   :  { %81 = dma.hbm_to_vmem [thread:$0]  %s7049_s4, 6144, %s76_s12, [#allocation12], %s5539_s1, %s5539_s1, %s5540_s25  }
  0x57   :  { %5525 = dma.done.wait [#allocation6], 1024  }
  0x58   :  { %5526 = vsyncadd [#allocation6], 4294966272 }
  0x59   :  { %5527 = dma.done.wait [#allocation9], 1536  }
  0x5a   :  { %5528 = vsyncadd [#allocation9], 4294965760 }
  0x5b   :  { %5529 = dma.done.wait [#allocation12], 12288  }
  0x5c   :  { %5530 = vsyncadd [#allocation12], 4294955008  ;;  %v7053_v0 = vmov 0   ;;  %v4811_v1 = vld [vmem:[#allocation11 + $0x4] ss:$12 sps:$4 sm:$0xff]   ;;  %v4841_v29 = vld [vmem:[#allocation5 + $0x8] sm:$0xff]  }
  0x5d   :  { %373 = vmatprep.mubr.bf16.mxu0 %v7053_v0  ;;  %v4813_v2 = vld [vmem:[#allocation11] ss:$12 sps:$4 sm:$0xff]   ;;  %341 = vmatprep.subr.bf16.mxu0 %v4811_v1  ;;  %v4814_v3 = vld [vmem:[#allocation11 + $0x1c] ss:$12 sps:$4 sm:$0xff]   ;;  %v4816_v4 = vld [vmem:[#allocation11 + $0x18] ss:$12 sps:$4 sm:$0xff]  }
  0x5e   :  { %342 = vmatpush1.bf16.msra.mxu0 %v4813_v2  ;;  %v4817_v5 = vld [vmem:[#allocation11 + $0x34] ss:$12 sps:$4 sm:$0xff]   ;;  %v4819_v6 = vld [vmem:[#allocation11 + $0x30] ss:$12 sps:$4 sm:$0xff]   ;;  %v4820_v7 = vld [vmem:[#allocation11 + $0x4c] ss:$12 sps:$4 sm:$0xff]  }
  0x5f   :  { %343 = vmatprep.subr.bf16.mxu0 %v4814_v3  ;;  %v4832_v8 = vld [vmem:[#allocation11 + $0x8] ss:$12 sps:$4 sm:$0xff]   ;;  %v4823_v10 = vld [vmem:[#allocation11 + $0x64] ss:$12 sps:$4 sm:$0xff]   ;;  %v4836_v11 = vld [vmem:[#allocation11 + $0x20] ss:$12 sps:$4 sm:$0xff]  }
  0x60   :  { %v4822_v9 = vld [vmem:[#allocation11 + $0x48] ss:$12 sps:$4 sm:$0xff]   ;;  %4411 = vmatprep.subr.bf16.mxu1 %v4832_v8  ;;  %v4837_v12 = vld [vmem:[#allocation5] sm:$0xff]   ;;  %v4840_v16 = vld [vmem:[#allocation11 + $0x50] ss:$12 sps:$4 sm:$0xff]   ;;  %v7055_v60 = vmov 0.0  }
  0x61   :  { %4412 = vmatpush3.bf16.msra.mxu1 %v4832_v8  ;;  %v4825_v13 = vld [vmem:[#allocation11 + $0x60] ss:$12 sps:$4 sm:$0xff]   ;;  %v4839_v14 = vld [vmem:[#allocation11 + $0x38] ss:$12 sps:$4 sm:$0xff]   ;;  %4427 = vmatprep.mubr.bf16.mxu1 %v4837_v12  ;;  %v4826_v15 = vld [vmem:[#allocation11 + $0x7c] ss:$12 sps:$4 sm:$0xff]  }
  0x62   :  { %344 = vmatpush1.bf16.msra.mxu0 %v4816_v4  ;;  %4413 = vmatprep.subr.bf16.mxu1 %v4836_v11  ;;  %v4828_v17 = vld [vmem:[#allocation11 + $0x78] ss:$12 sps:$4 sm:$0xff]   ;;  %v4829_v18 = vld [vmem:[#allocation11 + $0x94] ss:$12 sps:$4 sm:$0xff]   ;;  %v4831_v20 = vld [vmem:[#allocation11 + $0x90] ss:$12 sps:$4 sm:$0xff]  }
  0x63   :  { %345 = vmatprep.subr.bf16.mxu0 %v4817_v5  ;;  %v4843_v19 = vld [vmem:[#allocation11 + $0x68] ss:$12 sps:$4 sm:$0xff]   ;;  %v4833_v21 = vld [vmem:[#allocation11 + $0xac] ss:$12 sps:$4 sm:$0xff]   ;;  %v4848_v27 = vld [vmem:[#allocation11 + $0xb0] ss:$12 sps:$4 sm:$0xff]  }
  0x64   :  { %v4844_v22 = vld [vmem:[#allocation11 + $0x80] ss:$12 sps:$4 sm:$0xff]   ;;  %v4835_v23 = vld [vmem:[#allocation11 + $0xa8] ss:$12 sps:$4 sm:$0xff]   ;;  %v4847_v25 = vld [vmem:[#allocation11 + $0x98] ss:$12 sps:$4 sm:$0xff]  }
  0x65   :  { %4414 = vmatpush3.bf16.msra.mxu1 %v4836_v11  ;;  %v4838_v24 = vld [vmem:[#allocation11 + $0xc8] ss:$12 sps:$4 sm:$0xff]   ;;  %v4842_v26 = vld [vmem:[#allocation11 + $0xe0] ss:$12 sps:$4 sm:$0xff]   ;;  %v4846_v28 = vld [vmem:[#allocation11 + $0xf8] ss:$12 sps:$4 sm:$0xff]  }
  0x66   :  { %346 = vmatpush1.bf16.msra.mxu0 %v4819_v6  ;;  %4415 = vmatprep.subr.bf16.mxu1 %v4839_v14  ;;  %v4853_v30 = vld [vmem:[#allocation11 + $0xc4] ss:$12 sps:$4 sm:$0xff]   ;;  %v4851_v32 = vld [vmem:[#allocation11 + $0xc0] ss:$12 sps:$4 sm:$0xff]   ;;  %v4856_v33 = vld [vmem:[#allocation11 + $0xdc] ss:$12 sps:$4 sm:$0xff]  }
  0x67   :  { %347 = vmatprep.subr.bf16.mxu0 %v4820_v7  ;;  %v4850_v31 = vld [vmem:[#allocation11 + $0x110] ss:$12 sps:$4 sm:$0xff]   ;;  %v4858_v35 = vld [vmem:[#allocation11 + $0x128] ss:$12 sps:$4 sm:$0xff]   ;;  %v4854_v36 = vld [vmem:[#allocation11 + $0xd8] ss:$12 sps:$4 sm:$0xff]  }
  0x68   :  { %v4845_v34 = vld [vmem:[#allocation5 + $0x10] sm:$0xff]   ;;  %v4866_v38 = vld [vmem:[#allocation11 + $0x140] ss:$12 sps:$4 sm:$0xff]   ;;  %v4849_v40 = vld [vmem:[#allocation5 + $0x18] sm:$0xff]   ;;  %vm5548_vm0 = vmmov 0  }
  0x69   :  { %4416 = vmatpush3.bf16.msra.mxu1 %v4839_v14  ;;  %v4861_v37 = vld [vmem:[#allocation11 + $0xf4] ss:$12 sps:$4 sm:$0xff]   ;;  %v4859_v39 = vld [vmem:[#allocation11 + $0xf0] ss:$12 sps:$4 sm:$0xff]   ;;  %v4864_v41 = vld [vmem:[#allocation11 + $0x10c] ss:$12 sps:$4 sm:$0xff]  }
  0x6a   :  { %348 = vmatpush1.bf16.msra.mxu0 %v4822_v9  ;;  %4417 = vmatprep.subr.bf16.mxu1 %v4840_v16  ;;  %v4857_v42 = vld [vmem:[#allocation5 + $0x20] sm:$0xff]   ;;  %v4862_v44 = vld [vmem:[#allocation11 + $0x108] ss:$12 sps:$4 sm:$0xff]   ;;  %v4882_v48 = vld [vmem:[#allocation11 + $0x170] ss:$12 sps:$4 sm:$0xff]  }
  0x6b   :  { %349 = vmatprep.subr.bf16.mxu0 %v4823_v10  ;;  %v4874_v43 = vld [vmem:[#allocation11 + $0x158] ss:$12 sps:$4 sm:$0xff]   ;;  %v4865_v46 = vld [vmem:[#allocation5 + $0x28] sm:$0xff]   ;;  %v4873_v49 = vld [vmem:[#allocation5 + $0x30] sm:$0xff]  }
  0x6c   :  { %v4869_v45 = vld [vmem:[#allocation11 + $0x124] ss:$12 sps:$4 sm:$0xff]   ;;  %v4867_v47 = vld [vmem:[#allocation11 + $0x120] ss:$12 sps:$4 sm:$0xff]   ;;  %v4872_v50 = vld [vmem:[#allocation11 + $0x13c] ss:$12 sps:$4 sm:$0xff]  }
  0x6d   :  { %4418 = vmatpush3.bf16.msra.mxu1 %v4840_v16  ;;  %v5682_v51 = vld [vmem:[#allocation13 + $0x4] ss:$12 sps:$4 sm:$0xff]   ;;  %v4878_v53 = vld [vmem:[#allocation11 + $0x154] ss:$12 sps:$4 sm:$0xff]   ;;  %v4875_v54 = vld [vmem:[#allocation5 + $0x38] sm:$0xff]  }
  0x6e   :  { %350 = vmatpush1.bf16.msra.mxu0 %v4825_v13  ;;  %4419 = vmatprep.subr.bf16.mxu1 %v4843_v19  ;;  %v4870_v52 = vld [vmem:[#allocation11 + $0x138] ss:$12 sps:$4 sm:$0xff]   ;;  %v4876_v55 = vld [vmem:[#allocation11 + $0x150] ss:$12 sps:$4 sm:$0xff]   ;;  %v4879_v57 = vld [vmem:[#allocation11 + $0x168] ss:$12 sps:$4 sm:$0xff]  }
  0x6f   :  { %351 = vmatprep.subr.bf16.mxu0 %v4826_v15  ;;  %v4881_v56 = vld [vmem:[#allocation11 + $0x16c] ss:$12 sps:$4 sm:$0xff]   ;;  %v4883_v58 = vld [vmem:[#allocation8] sm:$0xff]   ;;  %v5687_v59 = vld [vmem:[#allocation13 + $0x8] ss:$12 sps:$4 sm:$0xff]  }
  0x70   :  { %v5693_v61 = vld [vmem:[#allocation13 + $0x20] ss:$12 sps:$4 sm:$0xff]   ;;  %v5697_v63 = vld [vmem:[#allocation13 + $0x38] ss:$12 sps:$4 sm:$0xff]   ;;  %v5703_v1 = vld [vmem:[#allocation13 + $0x50] ss:$12 sps:$4 sm:$0xff]  }
  0x71   :  { %4420 = vmatpush3.bf16.msra.mxu1 %v4843_v19  ;;  %v4887_v62 = vld [vmem:[#allocation8 + $0x8] sm:$0xff]   ;;  %v4893_v3 = vld [vmem:[#allocation8 + $0x10] sm:$0xff]   ;;  %v5720_v7 = vld [vmem:[#allocation13 + $0x98] ss:$12 sps:$4 sm:$0xff]  }
  0x72   :  { %352 = vmatpush1.bf16.msra.mxu0 %v4828_v17  ;;  %4421 = vmatprep.subr.bf16.mxu1 %v4844_v22  ;;  %v5707_v2 = vld [vmem:[#allocation13 + $0x68] ss:$12 sps:$4 sm:$0xff]   ;;  %v5712_v4 = vld [vmem:[#allocation13 + $0x80] ss:$12 sps:$4 sm:$0xff]   ;;  %v4896_v8 = vld [vmem:[#allocation8 + $0x18] sm:$0xff]  }
  0x73   :  { %353 = vmatprep.subr.bf16.mxu0 %v4829_v18  ;;  %v5715_v5 = vld [vmem:[#allocation13] ss:$12 sps:$4 sm:$0xff]   ;;  %v5717_v6 = vld [vmem:[#allocation13 + $0x1c] ss:$12 sps:$4 sm:$0xff]   ;;  %v5724_v9 = vld [vmem:[#allocation13 + $0x18] ss:$12 sps:$4 sm:$0xff]  }
  0x74   :  { %v5727_v10 = vld [vmem:[#allocation13 + $0x34] ss:$12 sps:$4 sm:$0xff]   ;;  %v5731_v11 = vld [vmem:[#allocation13 + $0xb0] ss:$12 sps:$4 sm:$0xff]   ;;  %v5738_v14 = vld [vmem:[#allocation13 + $0x4c] ss:$12 sps:$4 sm:$0xff]  }
  0x75   :  { %4422 = vmatpush3.bf16.msra.mxu1 %v4844_v22  ;;  %7175 = vst [vmem:[#allocation22_spill] sm:$0xff] %v5731_v11  ;;  %v4902_v13 = vld [vmem:[#allocation8 + $0x20] sm:$0xff]   ;;  %7176 = vst [vmem:[#allocation23_spill] sm:$0xff] %v5738_v14  ;;  %v5743_v15 = vld [vmem:[#allocation13 + $0x48] ss:$12 sps:$4 sm:$0xff]  }
  0x76   :  { %354 = vmatpush1.bf16.msra.mxu0 %v4831_v20  ;;  %4423 = vmatprep.subr.bf16.mxu1 %v4847_v25  ;;  %7177 = vst [vmem:[#allocation24_spill] sm:$0xff] %v5743_v15  ;;  %v5746_v16 = vld [vmem:[#allocation13 + $0x64] ss:$12 sps:$4 sm:$0xff]   ;;  %v4905_v17 = vld [vmem:[#allocation8 + $0x28] sm:$0xff]   ;;  %v5759_v22 = vld [vmem:[#allocation13 + $0x94] ss:$12 sps:$4 sm:$0xff]  }
  0x77   :  { %355 = vmatprep.subr.bf16.mxu0 %v4833_v21  ;;  %7178 = vst [vmem:[#allocation25_spill] sm:$0xff] %v5746_v16  ;;  %v5750_v18 = vld [vmem:[#allocation13 + $0x60] ss:$12 sps:$4 sm:$0xff]   ;;  %v4911_v19 = vld [vmem:[#allocation8 + $0x30] sm:$0xff]   ;;  %v5753_v20 = vld [vmem:[#allocation13 + $0x7c] ss:$12 sps:$4 sm:$0xff]  }
  0x78   :  { %7179 = vst [vmem:[#allocation26_spill] sm:$0xff] %v5750_v18  ;;  %7180 = vst [vmem:[#allocation27_spill] sm:$0xff] %v5753_v20  ;;  %v5756_v21 = vld [vmem:[#allocation13 + $0x78] ss:$12 sps:$4 sm:$0xff]  }
  0x79   :  { %4424 = vmatpush3.bf16.msra.mxu1 %v4847_v25  ;;  %7181 = vst [vmem:[#allocation28_spill] sm:$0xff] %v5756_v21  ;;  %7182 = vst [vmem:[#allocation29_spill] sm:$0xff] %v5759_v22  ;;  %v5766_v25 = vld [vmem:[#allocation13 + $0xac] ss:$12 sps:$4 sm:$0xff]  }
  0x7a   :  { %356 = vmatpush1.bf16.msra.mxu0 %v4835_v23  ;;  %4425 = vmatprep.subr.bf16.mxu1 %v4848_v27  ;;  %v4914_v23 = vld [vmem:[#allocation8 + $0x38] sm:$0xff]   ;;  %7184 = vst [vmem:[#allocation31_spill] sm:$0xff] %v5766_v25 }
  0x7b   :  { %4443 = vmatprep.subr.bf16.mxu0 %v4838_v24 }
  0x7d   :  { %374 = vmatmul.mubr.bf16.vlgmr.msra.gmra.mrb[0].mxu0 %v4837_v12  ;;  %4426 = vmatpush3.bf16.msra.mxu1 %v4848_v27  ;;  %v5735_v12 = vld [vmem:[#allocation13 + $0x30] ss:$12 sps:$4 sm:$0xff]   ;;  %v5772_v27 = vld [vmem:[#allocation10] sm:$0xff] }
  0x7e   :  { %4444 = vmatpush3.bf16.msra.mxu0 %v4838_v24  ;;  %383 = vmatprep.mubr.bf16.mxu0 %v7053_v0  ;;  %v5763_v24 = vld [vmem:[#allocation13 + $0x90] ss:$12 sps:$4 sm:$0xff]  }
  0x7f   :  { %4445 = vmatprep.subr.bf16.mxu0 %v4842_v26  ;;  %824 = vmatprep.subr.bf16.mxu1 %v4853_v30  ;;  %7183 = vst [vmem:[#allocation30_spill] sm:$0xff] %v5763_v24 }
  0x80   :  { %4428 = vmatmul.mubr.bf16.vlgmr.msra.gmra.mrb[0].mxu1 %v4841_v29 }
  0x81   :  { %825 = vmatpush1.bf16.msra.mxu1 %v4851_v32  ;;  %4431 = vmatprep.mubr.bf16.mxu1 %v4845_v34  ;;  %v5786_v32 = vld [vmem:[#allocation13 + $0xdc] ss:$12 sps:$4 sm:$0xff]  }
  0x82   :  { %4446 = vmatpush3.bf16.msra.mxu0 %v4842_v26  ;;  %826 = vmatprep.subr.bf16.mxu1 %v4856_v33  ;;  %v5769_v26 = vld [vmem:[#allocation13 + $0xa8] ss:$12 sps:$4 sm:$0xff]   ;;  %v5789_v33 = vld [vmem:[#allocation13 + $0xd8] ss:$12 sps:$4 sm:$0xff]  }
  0x83   :  { %4447 = vmatprep.subr.bf16.mxu0 %v4846_v28  ;;  %7185 = vst [vmem:[#allocation32_spill] sm:$0xff] %v5769_v26 }
  0x85   :  { %384 = vmatmul.mubr.bf16.gmra.mrb[4].mxu0 %v4841_v29  ;;  %827 = vmatpush1.bf16.msra.mxu1 %v4854_v36  ;;  %v5777_v29 = vld [vmem:[#allocation13 + $0xc4] ss:$12 sps:$4 sm:$0xff]   ;;  %v5801_v36 = vld [vmem:[#allocation13 + $0x10c] ss:$12 sps:$4 sm:$0xff]  }
  0x86   :  { %393 = vmatprep.mubr.bf16.mxu0 %v7053_v0  ;;  %4448 = vmatpush3.bf16.msra.mxu0 %v4846_v28  ;;  %v5774_v28 = vld [vmem:[#allocation10 + $0x8] sm:$0xff]  ;;  %7186 = vst [vmem:[#allocation33_spill] sm:$0xff] %v5777_v29 }
  0x87   :  { %4449 = vmatprep.subr.bf16.mxu0 %v4850_v31  ;;  %828 = vmatprep.subr.bf16.mxu1 %v4861_v37  ;;  %v1188_v30 = vpack.c.bf16 %v5774_v28, %v5772_v27  ;;  %v5803_v37 = vld [vmem:[#allocation13 + $0xc8] ss:$12 sps:$4 sm:$0xff]  }
  0x88   :  { %4432 = vmatmul.mubr.bf16.gmra.mrb[4].mxu1 %v4849_v40 }
  0x89   :  { %829 = vmatpush1.bf16.msra.mxu1 %v4859_v39  ;;  %4435 = vmatprep.mubr.bf16.mxu1 %v4857_v42  ;;  %v5809_v39 = vld [vmem:[#allocation13 + $0x124] ss:$12 sps:$4 sm:$0xff]  }
  0x8a   :  { %4450 = vmatpush3.bf16.msra.mxu0 %v4850_v31  ;;  %830 = vmatprep.subr.bf16.mxu1 %v4864_v41  ;;  %v5783_v31 = vld [vmem:[#allocation13 + $0xc0] ss:$12 sps:$4 sm:$0xff]  }
  0x8b   :  { %4451 = vmatprep.subr.bf16.mxu0 %v4858_v35  ;;  %v5818_v41 = vld [vmem:[#allocation13 + $0x120] ss:$12 sps:$4 sm:$0xff]  }
  0x8d   :  { %394 = vmatmul.mubr.bf16.gmra.mrb[8].mxu0 %v4845_v34  ;;  %831 = vmatpush1.bf16.msra.mxu1 %v4862_v44  ;;  %v5793_v34 = vld [vmem:[#allocation13 + $0xf4] ss:$12 sps:$4 sm:$0xff]   ;;  %v5828_v44 = vld [vmem:[#allocation13 + $0x138] ss:$12 sps:$4 sm:$0xff]  }
  0x8e   :  { %403 = vmatprep.mubr.bf16.mxu0 %v7053_v0  ;;  %4452 = vmatpush3.bf16.msra.mxu0 %v4858_v35  ;;  %v5798_v35 = vld [vmem:[#allocation13 + $0xf0] ss:$12 sps:$4 sm:$0xff]  }
  0x8f   :  { %4453 = vmatprep.subr.bf16.mxu0 %v4866_v38  ;;  %832 = vmatprep.subr.bf16.mxu1 %v4869_v45  ;;  %v5831_v45 = vld [vmem:[#allocation13 + $0x154] ss:$12 sps:$4 sm:$0xff]  }
  0x90   :  { %4436 = vmatmul.mubr.bf16.gmra.mrb[8].mxu1 %v4865_v46 }
  0x91   :  { %833 = vmatpush1.bf16.msra.mxu1 %v4867_v47  ;;  %4439 = vmatprep.mubr.bf16.mxu1 %v4873_v49  ;;  %v5838_v47 = vld [vmem:[#allocation13 + $0x150] ss:$12 sps:$4 sm:$0xff]  }
  0x92   :  { %4454 = vmatpush3.bf16.msra.mxu0 %v4866_v38  ;;  %834 = vmatprep.subr.bf16.mxu1 %v4872_v50  ;;  %v5806_v38 = vld [vmem:[#allocation13 + $0x108] ss:$12 sps:$4 sm:$0xff]  }
  0x93   :  { %4455 = vmatprep.subr.bf16.mxu0 %v4874_v43  ;;  %v5848_v50 = vld [vmem:[#allocation13 + $0x168] ss:$12 sps:$4 sm:$0xff]  }
  0x95   :  { %404 = vmatmul.mubr.bf16.gmra.mrb[12].mxu0 %v4849_v40  ;;  %835 = vmatpush1.bf16.msra.mxu1 %v4870_v52  ;;  %v5812_v40 = vld [vmem:[#allocation13 + $0xe0] ss:$12 sps:$4 sm:$0xff]   ;;  %v5850_v52 = vld [vmem:[#allocation10 + $0x10] sm:$0xff] }
  0x96   :  { %413 = vmatprep.mubr.bf16.mxu0 %v7053_v0  ;;  %4456 = vmatpush3.bf16.msra.mxu0 %v4874_v43  ;;  %v5824_v43 = vld [vmem:[#allocation13 + $0xf8] ss:$12 sps:$4 sm:$0xff]  }
  0x97   :  { %4457 = vmatprep.subr.bf16.mxu0 %v4882_v48  ;;  %836 = vmatprep.subr.bf16.mxu1 %v4878_v53  ;;  %v5852_v53 = vld [vmem:[#allocation10 + $0x18] sm:$0xff] }
  0x98   :  { %4440 = vmatmul.mubr.bf16.gmra.mrb[12].mxu1 %v4875_v54 }
  0x99   :  { %837 = vmatpush1.bf16.msra.mxu1 %v4876_v55  ;;  %856 = vmatprep.mubr.bf16.mxu1 %v7053_v0  ;;  %v1189_v55 = vpack.c.bf16 %v5852_v53, %v5850_v52 }
  0x9a   :  { %4458 = vmatpush3.bf16.msra.mxu0 %v4882_v48  ;;  %838 = vmatprep.subr.bf16.mxu1 %v4881_v56  ;;  %v5841_v48 = vld [vmem:[#allocation13 + $0x16c] ss:$12 sps:$4 sm:$0xff]  }
  0x9b   :  { %1330 = vmatprep.subr.bf16.mxu0 %v5682_v51  ;;  %v5864_v56 = vld [vmem:[#allocation13 + $0x158] ss:$12 sps:$4 sm:$0xff]  }
  0x9d   :  { %414 = vmatmul.mubr.bf16.gmra.mrb[16].mxu0 %v4857_v42  ;;  %839 = vmatpush1.bf16.msra.mxu1 %v4879_v57  ;;  %v5821_v42 = vld [vmem:[#allocation13 + $0x13c] ss:$12 sps:$4 sm:$0xff]  }
  0x9e   :  { %423 = vmatprep.mubr.bf16.mxu0 %v7053_v0  ;;  %4475 = vmatprep.subr.bf16.mxu1 %v7055_v60  ;;  %v5871_v57 = vld [vmem:[#allocation13 + $0x170] ss:$12 sps:$4 sm:$0xff]  }
  0xa0   :  { %857 = vmatmul.mubr.bf16.vlgmr.msra.gmra.mrb[16].mxu1 %v4883_v58 }
  0xa1   :  { %4476 = vmatpush3.bf16.msra.mxu1 %v5687_v59  ;;  %866 = vmatprep.mubr.bf16.mxu1 %v7053_v0 }
  0xa2   :  { %4477 = vmatprep.subr.bf16.mxu1 %v7055_v60 }
  0xa5   :  { %424 = vmatmul.mubr.bf16.gmra.mrb[20].mxu0 %v4865_v46  ;;  %4478 = vmatpush3.bf16.msra.mxu1 %v5693_v61  ;;  %v5834_v46 = vld [vmem:[#allocation13 + $0x110] ss:$12 sps:$4 sm:$0xff]  }
  0xa6   :  { %433 = vmatprep.mubr.bf16.mxu0 %v7053_v0  ;;  %4479 = vmatprep.subr.bf16.mxu1 %v7055_v60 }
  0xa8   :  { %867 = vmatmul.mubr.bf16.gmra.mrb[20].mxu1 %v4887_v62 }
  0xa9   :  { %876 = vmatprep.mubr.bf16.mxu1 %v7053_v0  ;;  %4480 = vmatpush3.bf16.msra.mxu1 %v5697_v63 }
  0xaa   :  { %4481 = vmatprep.subr.bf16.mxu1 %v7055_v60 }
  0xad   :  { %434 = vmatmul.mubr.bf16.gmra.mrb[24].mxu0 %v4873_v49  ;;  %4482 = vmatpush3.bf16.msra.mxu1 %v5703_v1  ;;  %v5844_v49 = vld [vmem:[#allocation13 + $0x128] ss:$12 sps:$4 sm:$0xff]  }
  0xae   :  { %443 = vmatprep.mubr.bf16.mxu0 %v7053_v0  ;;  %4483 = vmatprep.subr.bf16.mxu1 %v7055_v60 }
  0xb0   :  { %877 = vmatmul.mubr.bf16.gmra.mrb[24].mxu1 %v4893_v3 }
  0xb1   :  { %886 = vmatprep.mubr.bf16.mxu1 %v7053_v0  ;;  %4484 = vmatpush3.bf16.msra.mxu1 %v5707_v2 }
  0xb2   :  { %4485 = vmatprep.subr.bf16.mxu1 %v7055_v60 }
  0xb5   :  { %444 = vmatmul.mubr.bf16.gmra.mrb[28].mxu0 %v4875_v54  ;;  %4486 = vmatpush3.bf16.msra.mxu1 %v5712_v4  ;;  %v5856_v54 = vld [vmem:[#allocation13 + $0x140] ss:$12 sps:$4 sm:$0xff]  }
  0xb6   :  { %4459 = vmatprep.mubr.bf16.mxu0 %v4883_v58  ;;  %4487 = vmatprep.subr.bf16.mxu1 %v7055_v60 }
  0xb8   :  { %887 = vmatmul.mubr.bf16.gmra.mrb[28].mxu1 %v4896_v8 }
  0xb9   :  { %896 = vmatprep.mubr.bf16.mxu1 %v7053_v0  ;;  %4488 = vmatpush3.bf16.msra.mxu1 %v5720_v7 }
  0xba   :  { %4489 = vmatprep.subr.bf16.mxu1 %v7055_v60 }
  0xbd   :  { %4460 = vmatmul.mubr.bf16.vlgmr.msra.gmra.mrb[32].mxu0 %v4887_v62  ;;  %4490 = vmatpush3.bf16.msra.mxu1 %v5731_v11 }
  0xbe   :  { %1331 = vmatpush1.bf16.msra.mxu0 %v5715_v5  ;;  %4463 = vmatprep.mubr.bf16.mxu0 %v4893_v3 }
  0xbf   :  { %1332 = vmatprep.subr.bf16.mxu0 %v5717_v6  ;;  %4495 = vmatprep.subr.bf16.mxu1 %v7055_v60 }
  0xc0   :  { %897 = vmatmul.mubr.bf16.gmra.mrb[32].mxu1 %v4902_v13 }
  0xc1   :  { %906 = vmatprep.mubr.bf16.mxu1 %v7053_v0 }
  0xc2   :  { %1333 = vmatpush1.bf16.msra.mxu0 %v5724_v9 }
  0xc3   :  { %1334 = vmatprep.subr.bf16.mxu0 %v5727_v10 }
  0xc5   :  { %4464 = vmatmul.mubr.bf16.gmra.mrb[36].mxu0 %v4896_v8 }
  0xc6   :  { %1335 = vmatpush1.bf16.msra.mxu0 %v5735_v12  ;;  %4467 = vmatprep.mubr.bf16.mxu0 %v4902_v13 }
  0xc7   :  { %1336 = vmatprep.subr.bf16.mxu0 %v5738_v14 }
  0xc8   :  { %907 = vmatmul.mubr.bf16.gmra.mrb[36].mxu1 %v4905_v17 }
  0xc9   :  { %916 = vmatprep.mubr.bf16.mxu1 %v7053_v0 }
  0xca   :  { %1337 = vmatpush1.bf16.msra.mxu0 %v5743_v15 }
  0xcb   :  { %1338 = vmatprep.subr.bf16.mxu0 %v5746_v16 }
  0xcd   :  { %4468 = vmatmul.mubr.bf16.gmra.mrb[40].mxu0 %v4905_v17 }
  0xce   :  { %1339 = vmatpush1.bf16.msra.mxu0 %v5750_v18  ;;  %4471 = vmatprep.mubr.bf16.mxu0 %v4911_v19 }
  0xcf   :  { %1340 = vmatprep.subr.bf16.mxu0 %v5753_v20 }
  0xd0   :  { %917 = vmatmul.mubr.bf16.gmra.mrb[40].mxu1 %v4911_v19 }
  0xd1   :  { %926 = vmatprep.mubr.bf16.mxu1 %v7053_v0 }
  0xd2   :  { %1341 = vmatpush1.bf16.msra.mxu0 %v5756_v21 }
  0xd3   :  { %1342 = vmatprep.subr.bf16.mxu0 %v5759_v22 }
  0xd5   :  { %4472 = vmatmul.mubr.bf16.gmra.mrb[44].mxu0 %v4914_v23 }
  0xd6   :  { %1343 = vmatpush1.bf16.msra.mxu0 %v5763_v24  ;;  %1362 = vmatprep.mubr.bf16.mxu0 %v7053_v0 }
  0xd7   :  { %1344 = vmatprep.subr.bf16.mxu0 %v5766_v25 }
  0xd8   :  { %927 = vmatmul.mubr.bf16.gmra.mrb[44].mxu1 %v4914_v23 }
  0xd9   :  { %4491 = vmatprep.mubr.msk.bf16.mxu1 %vm5548_vm0, %v7055_v60 }
  0xda   :  { %1345 = vmatpush1.bf16.msra.mxu0 %v5769_v26 }
  0xdb   :  { %1590 = vmatprep.subr.bf16.mxu0 %v5777_v29 }
  0xdd   :  { %1363 = vmatmul.mubr.bf16.vlgmr.msra.gmra.mrb[48].mxu0 %v1188_v30 }
  0xde   :  { %1591 = vmatpush1.bf16.msra.mxu0 %v5783_v31  ;;  %1622 = vmatprep.mubr.bf16.mxu0 %v7053_v0 }
  0xdf   :  { %1592 = vmatprep.subr.bf16.mxu0 %v5786_v32 }
  0xe0   :  { %4492 = vmatmul.mubr.bf16.vlgmr.msra.gmra.mrb[48].mxu1 %v1188_v30 }
  0xe1   :  { %4496 = vmatpush3.bf16.msra.mxu1 %v5803_v37  ;;  %4511 = vmatprep.mubr.msk.bf16.mxu1 %vm5548_vm0, %v7055_v60 }
  0xe2   :  { %1593 = vmatpush1.bf16.msra.mxu0 %v5789_v33  ;;  %4497 = vmatprep.subr.bf16.mxu1 %v7055_v60 }
  0xe3   :  { %1594 = vmatprep.subr.bf16.mxu0 %v5793_v34 }
  0xe5   :  { %4498 = vmatpush3.bf16.msra.mxu1 %v5812_v40 }
  0xe6   :  { %1595 = vmatpush1.bf16.msra.mxu0 %v5798_v35  ;;  %4499 = vmatprep.subr.bf16.mxu1 %v7055_v60 }
  0xe7   :  { %1596 = vmatprep.subr.bf16.mxu0 %v5801_v36 }
  0xe9   :  { %4500 = vmatpush3.bf16.msra.mxu1 %v5824_v43 }
  0xea   :  { %1597 = vmatpush1.bf16.msra.mxu0 %v5806_v38  ;;  %4501 = vmatprep.subr.bf16.mxu1 %v7055_v60 }
  0xeb   :  { %1598 = vmatprep.subr.bf16.mxu0 %v5809_v39 }
  0xed   :  { %4502 = vmatpush3.bf16.msra.mxu1 %v5834_v46 }
  0xee   :  { %1599 = vmatpush1.bf16.msra.mxu0 %v5818_v41  ;;  %4503 = vmatprep.subr.bf16.mxu1 %v7055_v60 }
  0xef   :  { %1600 = vmatprep.subr.bf16.mxu0 %v5821_v42 }
  0xf1   :  { %4504 = vmatpush3.bf16.msra.mxu1 %v5844_v49 }
  0xf2   :  { %1601 = vmatpush1.bf16.msra.mxu0 %v5828_v44  ;;  %4505 = vmatprep.subr.bf16.mxu1 %v7055_v60 }
  0xf3   :  { %1602 = vmatprep.subr.bf16.mxu0 %v5831_v45 }
  0xf5   :  { %4506 = vmatpush3.bf16.msra.mxu1 %v5856_v54 }
  0xf6   :  { %1603 = vmatpush1.bf16.msra.mxu0 %v5838_v47  ;;  %4507 = vmatprep.subr.bf16.mxu1 %v7055_v60 }
  0xf7   :  { %1604 = vmatprep.subr.bf16.mxu0 %v5841_v48 }
  0xf9   :  { %4508 = vmatpush3.bf16.msra.mxu1 %v5864_v56 }
  0xfa   :  { %1605 = vmatpush1.bf16.msra.mxu0 %v5848_v50  ;;  %4509 = vmatprep.subr.bf16.mxu1 %v7055_v60 }
  0xfb   :  { %1762 = vmatprep.subr.bf16.mxu0 %v5682_v51 }
  0xfd   :  { %1623 = vmatmul.mubr.bf16.vlgmr.msra.gmra.mrb[52].mxu0 %v1189_v55  ;;  %4510 = vmatpush3.bf16.msra.mxu1 %v5871_v57 }
  0xfe   :  { %1763 = vmatpush1.bf16.msra.mxu0 %v5715_v5  ;;  %1794 = vmatprep.mubr.bf16.mxu0 %v7053_v0 }
  0xff   :  { %1764 = vmatprep.subr.bf16.mxu0 %v5717_v6  ;;  %4515 = vmatprep.subr.bf16.mxu1 %v7055_v60 }
 0x100   :  { %4512 = vmatmul.mubr.bf16.vlgmr.msra.gmra.mrb[52].mxu1 %v1189_v55 }
 0x101   :  { %4516 = vmatpush3.bf16.msra.mxu1 %v5687_v59  ;;  %4531 = vmatprep.mubr.msk.bf16.mxu1 %vm5548_vm0, %v7055_v60 }
 0x102   :  { %1765 = vmatpush1.bf16.msra.mxu0 %v5724_v9  ;;  %4517 = vmatprep.subr.bf16.mxu1 %v7055_v60 }
 0x103   :  { %1766 = vmatprep.subr.bf16.mxu0 %v5727_v10 }
 0x105   :  { %4518 = vmatpush3.bf16.msra.mxu1 %v5693_v61 }
 0x106   :  { %1767 = vmatpush1.bf16.msra.mxu0 %v5735_v12  ;;  %4519 = vmatprep.subr.bf16.mxu1 %v7055_v60 }
 0x107   :  { %1768 = vmatprep.subr.bf16.mxu0 %v5738_v14 }
 0x109   :  { %4520 = vmatpush3.bf16.msra.mxu1 %v5697_v63 }
 0x10a   :  { %1769 = vmatpush1.bf16.msra.mxu0 %v5743_v15  ;;  %4521 = vmatprep.subr.bf16.mxu1 %v7055_v60 }
 0x10b   :  { %1770 = vmatprep.subr.bf16.mxu0 %v5746_v16 }
 0x10d   :  { %4522 = vmatpush3.bf16.msra.mxu1 %v5703_v1 }
 0x10e   :  { %1771 = vmatpush1.bf16.msra.mxu0 %v5750_v18  ;;  %4523 = vmatprep.subr.bf16.mxu1 %v7055_v60 }
 0x10f   :  { %1772 = vmatprep.subr.bf16.mxu0 %v5753_v20 }
 0x111   :  { %4524 = vmatpush3.bf16.msra.mxu1 %v5707_v2 }
 0x112   :  { %1773 = vmatpush1.bf16.msra.mxu0 %v5756_v21  ;;  %4525 = vmatprep.subr.bf16.mxu1 %v7055_v60 }
 0x113   :  { %1774 = vmatprep.subr.bf16.mxu0 %v5759_v22 }
 0x115   :  { %4526 = vmatpush3.bf16.msra.mxu1 %v5712_v4 }
 0x116   :  { %1775 = vmatpush1.bf16.msra.mxu0 %v5763_v24  ;;  %4527 = vmatprep.subr.bf16.mxu1 %v7055_v60 }
 0x117   :  { %1776 = vmatprep.subr.bf16.mxu0 %v5766_v25 }
 0x119   :  { %4528 = vmatpush3.bf16.msra.mxu1 %v5720_v7 }
 0x11a   :  { %1777 = vmatpush1.bf16.msra.mxu0 %v5769_v26  ;;  %4529 = vmatprep.subr.bf16.mxu1 %v7055_v60 }
 0x11b   :  { %1894 = vmatprep.subr.bf16.mxu0 %v5777_v29 }
 0x11d   :  { %4530 = vmatpush3.bf16.msra.mxu1 %v5731_v11 }
 0x11e   :  { %4535 = vmatprep.subr.bf16.mxu1 %v7055_v60 }
 0x150   :  { %v375_v51 = vpop.f32.mrb[0].mxu0 }
 0x151   :  { %v377_v58 = vpop.f32.mrb[1].mxu0 }
 0x152   :  { %v379_v59 = vpop.f32.mrb[2].mxu0 }
 0x153   :  { %v5908_v61 = vpack.c.bf16 %v379_v59, %v375_v51  ;;  %v381_v62 = vpop.f32.mrb[3].mxu0  ;;  %v4429_v4 = vpop.f32.mrb[0].mxu1 }
 0x154   :  { %v5910_v63 = vpack.c.bf16 %v381_v62, %v377_v58  ;;  %v488_v13 = vpop.f32.mrb[1].mxu1 }
 0x155   :  { %v4430_v19 = vpop.f32.mrb[2].mxu1 }
 0x156   :  { %v5916_v23 = vpack.c.bf16 %v4430_v19, %v4429_v4  ;;  %v491_v30 = vpop.f32.mrb[3].mxu1 }
 0x157   :  { %v5918_v55 = vpack.c.bf16 %v491_v30, %v488_v13 }
 0x158   :  { %v385_v1 = vpop.f32.mrb[4].mxu0  ;;  %7189 = vst [vmem:[#allocation36_spill] sm:$0xff] %v5916_v23 }
 0x159   :  { %v387_v2 = vpop.f32.mrb[5].mxu0 }
 0x15a   :  { %v389_v3 = vpop.f32.mrb[6].mxu0 }
 0x15b   :  { %v5912_v8 = vpack.c.bf16 %v389_v3, %v385_v1  ;;  %v391_v7 = vpop.f32.mrb[7].mxu0  ;;  %v4433_v62 = vpop.f32.mrb[4].mxu1 }
 0x15c   :  { %v5914_v17 = vpack.c.bf16 %v391_v7, %v387_v2  ;;  %v504_v29 = vpop.f32.mrb[5].mxu1 }
 0x15d   :  { %7187 = vst [vmem:[#allocation34_spill] sm:$0xff] %v5912_v8  ;;  %v4434_v3 = vpop.f32.mrb[6].mxu1 }
 0x15e   :  { %7188 = vst [vmem:[#allocation35_spill] sm:$0xff] %v5914_v17  ;;  %v5924_v8 = vpack.c.bf16 %v4434_v3, %v4433_v62  ;;  %v507_v2 = vpop.f32.mrb[7].mxu1 }
 0x15f   :  { %v5926_v7 = vpack.c.bf16 %v507_v2, %v504_v29 }
 0x160   :  { %v395_v51 = vpop.f32.mrb[8].mxu0  ;;  %7192 = vst [vmem:[#allocation39_spill] sm:$0xff] %v5924_v8 }
 0x161   :  { %v397_v59 = vpop.f32.mrb[9].mxu0  ;;  %7193 = vst [vmem:[#allocation40_spill] sm:$0xff] %v5926_v7 }
 0x162   :  { %v399_v58 = vpop.f32.mrb[10].mxu0 }
 0x163   :  { %v5920_v0 = vpack.c.bf16 %v399_v58, %v395_v51  ;;  %v401_v60 = vpop.f32.mrb[11].mxu0  ;;  %v4437_v30 = vpop.f32.mrb[8].mxu1 }
 0x164   :  { %v5922_v1 = vpack.c.bf16 %v401_v60, %v397_v59  ;;  %v520_v11 = vpop.f32.mrb[9].mxu1 }
 0x165   :  { %7190 = vst [vmem:[#allocation37_spill] sm:$0xff] %v5920_v0  ;;  %v4438_v58 = vpop.f32.mrb[10].mxu1 }
 0x166   :  { %7191 = vst [vmem:[#allocation38_spill] sm:$0xff] %v5922_v1  ;;  %v5932_v0 = vpack.c.bf16 %v4438_v58, %v4437_v30  ;;  %v523_v60 = vpop.f32.mrb[11].mxu1 }
 0x167   :  { %v5934_v59 = vpack.c.bf16 %v523_v60, %v520_v11 }
 0x168   :  { %v405_v4 = vpop.f32.mrb[12].mxu0  ;;  %7196 = vst [vmem:[#allocation43_spill] sm:$0xff] %v5932_v0 }
 0x169   :  { %v407_v19 = vpop.f32.mrb[13].mxu0  ;;  %7197 = vst [vmem:[#allocation44_spill] sm:$0xff] %v5934_v59 }
 0x16a   :  { %v409_v13 = vpop.f32.mrb[14].mxu0 }
 0x16b   :  { %v5928_v23 = vpack.c.bf16 %v409_v13, %v405_v4  ;;  %v411_v17 = vpop.f32.mrb[15].mxu0  ;;  %v4441_v2 = vpop.f32.mrb[12].mxu1 }
 0x16c   :  { %v5930_v51 = vpack.c.bf16 %v411_v17, %v407_v19  ;;  %v536_v1 = vpop.f32.mrb[13].mxu1 }
 0x16d   :  { %7194 = vst [vmem:[#allocation41_spill] sm:$0xff] %v5928_v23  ;;  %v4442_v13 = vpop.f32.mrb[14].mxu1 }
 0x16e   :  { %7195 = vst [vmem:[#allocation42_spill] sm:$0xff] %v5930_v51  ;;  %v5940_v23 = vpack.c.bf16 %v4442_v13, %v4441_v2  ;;  %v539_v17 = vpop.f32.mrb[15].mxu1 }
 0x16f   :  { %v5942_v19 = vpack.c.bf16 %v539_v17, %v536_v1 }
 0x170   :  { %v415_v62 = vpop.f32.mrb[16].mxu0  ;;  %7200 = vst [vmem:[#allocation47_spill] sm:$0xff] %v5940_v23 }
 0x171   :  { %v417_v3 = vpop.f32.mrb[17].mxu0  ;;  %7201 = vst [vmem:[#allocation48_spill] sm:$0xff] %v5942_v19 }
 0x172   :  { %v419_v29 = vpop.f32.mrb[18].mxu0 }
 0x173   :  { %v5936_v8 = vpack.c.bf16 %v419_v29, %v415_v62  ;;  %v421_v7 = vpop.f32.mrb[19].mxu0  ;;  %v858_v60 = vpop.f32.mrb[16].mxu1 }
 0x174   :  { %v5938_v4 = vpack.c.bf16 %v421_v7, %v417_v3  ;;  %v860_v51 = vpop.f32.mrb[17].mxu1 }
 0x175   :  { %7198 = vst [vmem:[#allocation45_spill] sm:$0xff] %v5936_v8  ;;  %v862_v29 = vpop.f32.mrb[18].mxu1 }
 0x176   :  { %7199 = vst [vmem:[#allocation46_spill] sm:$0xff] %v5938_v4  ;;  %v5948_v8 = vpack.c.bf16 %v862_v29, %v858_v60  ;;  %v864_v7 = vpop.f32.mrb[19].mxu1 }
 0x177   :  { %v5950_v3 = vpack.c.bf16 %v864_v7, %v860_v51 }
 0x178   :  { %v425_v30 = vpop.f32.mrb[20].mxu0  ;;  %7204 = vst [vmem:[#allocation51_spill] sm:$0xff] %v5948_v8 }
 0x179   :  { %v427_v58 = vpop.f32.mrb[21].mxu0  ;;  %7205 = vst [vmem:[#allocation52_spill] sm:$0xff] %v5950_v3 }
 0x17a   :  { %v429_v11 = vpop.f32.mrb[22].mxu0 }
 0x17b   :  { %v5944_v0 = vpack.c.bf16 %v429_v11, %v425_v30  ;;  %v431_v59 = vpop.f32.mrb[23].mxu0  ;;  %v868_v17 = vpop.f32.mrb[20].mxu1 }
 0x17c   :  { %v5946_v62 = vpack.c.bf16 %v431_v59, %v427_v58  ;;  %v870_v4 = vpop.f32.mrb[21].mxu1 }
 0x17d   :  { %7202 = vst [vmem:[#allocation49_spill] sm:$0xff] %v5944_v0  ;;  %v872_v11 = vpop.f32.mrb[22].mxu1 }
 0x17e   :  { %7203 = vst [vmem:[#allocation50_spill] sm:$0xff] %v5946_v62  ;;  %v5956_v0 = vpack.c.bf16 %v872_v11, %v868_v17  ;;  %v874_v59 = vpop.f32.mrb[23].mxu1 }
 0x17f   :  { %v5958_v58 = vpack.c.bf16 %v874_v59, %v870_v4 }
 0x180   :  { %v435_v2 = vpop.f32.mrb[24].mxu0  ;;  %7208 = vst [vmem:[#allocation55_spill] sm:$0xff] %v5956_v0 }
 0x181   :  { %v437_v13 = vpop.f32.mrb[25].mxu0  ;;  %7209 = vst [vmem:[#allocation56_spill] sm:$0xff] %v5958_v58 }
 0x182   :  { %v439_v1 = vpop.f32.mrb[26].mxu0 }
 0x183   :  { %v5952_v23 = vpack.c.bf16 %v439_v1, %v435_v2  ;;  %v441_v19 = vpop.f32.mrb[27].mxu0  ;;  %v878_v7 = vpop.f32.mrb[24].mxu1 }
 0x184   :  { %v5954_v30 = vpack.c.bf16 %v441_v19, %v437_v13  ;;  %v880_v62 = vpop.f32.mrb[25].mxu1 }
 0x185   :  { %7206 = vst [vmem:[#allocation53_spill] sm:$0xff] %v5952_v23  ;;  %v882_v1 = vpop.f32.mrb[26].mxu1 }
 0x186   :  { %7207 = vst [vmem:[#allocation54_spill] sm:$0xff] %v5954_v30  ;;  %v5964_v23 = vpack.c.bf16 %v882_v1, %v878_v7  ;;  %v884_v19 = vpop.f32.mrb[27].mxu1 }
 0x187   :  { %v5966_v13 = vpack.c.bf16 %v884_v19, %v880_v62 }
 0x188   :  { %v445_v60 = vpop.f32.mrb[28].mxu0  ;;  %7212 = vst [vmem:[#allocation59_spill] sm:$0xff] %v5964_v23 }
 0x189   :  { %v447_v29 = vpop.f32.mrb[29].mxu0  ;;  %7213 = vst [vmem:[#allocation60_spill] sm:$0xff] %v5966_v13 }
 0x18a   :  { %v449_v51 = vpop.f32.mrb[30].mxu0 }
 0x18b   :  { %v5960_v3 = vpack.c.bf16 %v449_v51, %v445_v60  ;;  %v451_v8 = vpop.f32.mrb[31].mxu0  ;;  %v888_v59 = vpop.f32.mrb[28].mxu1 }
 0x18c   :  { %v5962_v2 = vpack.c.bf16 %v451_v8, %v447_v29  ;;  %v890_v30 = vpop.f32.mrb[29].mxu1 }
 0x18d   :  { %7210 = vst [vmem:[#allocation57_spill] sm:$0xff] %v5960_v3  ;;  %v892_v51 = vpop.f32.mrb[30].mxu1 }
 0x18e   :  { %7211 = vst [vmem:[#allocation58_spill] sm:$0xff] %v5962_v2  ;;  %v5972_v3 = vpack.c.bf16 %v892_v51, %v888_v59  ;;  %v894_v8 = vpop.f32.mrb[31].mxu1 }
 0x18f   :  { %v5974_v29 = vpack.c.bf16 %v894_v8, %v890_v30  ;;  %v1149_v30 = vlaneseq }
 0x190   :  { %v4461_v17 = vpop.f32.mrb[32].mxu0  ;;  %7216 = vst [vmem:[#allocation63_spill] sm:$0xff] %v5972_v3 }
 0x191   :  { %v971_v11 = vpop.f32.mrb[33].mxu0  ;;  %7217 = vst [vmem:[#allocation64_spill] sm:$0xff] %v5974_v29 }
 0x192   :  { %v4462_v4 = vpop.f32.mrb[34].mxu0 }
 0x193   :  { %v5968_v58 = vpack.c.bf16 %v4462_v4, %v4461_v17  ;;  %v974_v0 = vpop.f32.mrb[35].mxu0  ;;  %v898_v19 = vpop.f32.mrb[32].mxu1 }
 0x194   :  { %v5970_v60 = vpack.c.bf16 %v974_v0, %v971_v11  ;;  %v900_v23 = vpop.f32.mrb[33].mxu1 }
 0x195   :  { %7214 = vst [vmem:[#allocation61_spill] sm:$0xff] %v5968_v58  ;;  %v902_v4 = vpop.f32.mrb[34].mxu1 }
 0x196   :  { %7215 = vst [vmem:[#allocation62_spill] sm:$0xff] %v5970_v60  ;;  %v5980_v58 = vpack.c.bf16 %v902_v4, %v898_v19  ;;  %v904_v0 = vpop.f32.mrb[35].mxu1 }
 0x197   :  { %v5982_v11 = vpack.c.bf16 %v904_v0, %v900_v23 }
 0x198   :  { %v4465_v7 = vpop.f32.mrb[36].mxu0  ;;  %7220 = vst [vmem:[#allocation67_spill] sm:$0xff] %v5980_v58 }
 0x199   :  { %v987_v1 = vpop.f32.mrb[37].mxu0  ;;  %7221 = vst [vmem:[#allocation68_spill] sm:$0xff] %v5982_v11 }
 0x19a   :  { %v4466_v62 = vpop.f32.mrb[38].mxu0 }
 0x19b   :  { %v5976_v2 = vpack.c.bf16 %v4466_v62, %v4465_v7  ;;  %v990_v13 = vpop.f32.mrb[39].mxu0  ;;  %v908_v60 = vpop.f32.mrb[36].mxu1 }
 0x19c   :  { %v5978_v17 = vpack.c.bf16 %v990_v13, %v987_v1  ;;  %v910_v7 = vpop.f32.mrb[37].mxu1  ;;  %v5988_v13 = vshrl.u32 %v1149_v30, 7 }
 0x19d   :  { %7218 = vst [vmem:[#allocation65_spill] sm:$0xff] %v5976_v2  ;;  %v912_v2 = vpop.f32.mrb[38].mxu1 }
 0x19e   :  { %7219 = vst [vmem:[#allocation66_spill] sm:$0xff] %v5978_v17  ;;  %v5990_v1 = vpack.c.bf16 %v912_v2, %v908_v60  ;;  %v914_v19 = vpop.f32.mrb[39].mxu1  ;;  %v7100_v17 = vsub.s32 0, %v5988_v13 }
 0x19f   :  { %v5992_v4 = vpack.c.bf16 %v914_v19, %v910_v7 }
 0x1a0   :  { %v4469_v59 = vpop.f32.mrb[40].mxu0  ;;  %7224 = vst [vmem:[#allocation71_spill] sm:$0xff] %v5990_v1 }
 0x1a1   :  { %v1003_v51 = vpop.f32.mrb[41].mxu0  ;;  %7225 = vst [vmem:[#allocation72_spill] sm:$0xff] %v5992_v4 }
 0x1a2   :  { %v4470_v8 = vpop.f32.mrb[42].mxu0 }
 0x1a3   :  { %v5984_v29 = vpack.c.bf16 %v4470_v8, %v4469_v59  ;;  %v1006_v3 = vpop.f32.mrb[43].mxu0  ;;  %v1147_v59 = vld [vmem:[%s7050_s5] sm:$0x7] }
 0x1a4   :  { %v5986_v62 = vpack.c.bf16 %v1006_v3, %v1003_v51  ;;  %v1155_v3 = vsub.s32 1, %v5988_v13  ;;  %v918_v51 = vpop.f32.mrb[40].mxu1  ;;  %v6005_v19 = vrot.slane %v1147_v59, %v7100_v17 }
 0x1a5   :  { %7222 = vst [vmem:[#allocation69_spill] sm:$0xff] %v5984_v29  ;;  %v920_v2 = vpop.f32.mrb[41].mxu1 }
 0x1a6   :  { %7223 = vst [vmem:[#allocation70_spill] sm:$0xff] %v5986_v62  ;;  %v922_v7 = vpop.f32.mrb[42].mxu1  ;;  %7227 = vst [vmem:[#allocation74_spill] sm:$0xff] %v6005_v19  ;;  %v6009_v29 = vrot.slane %v1147_v59, %v1155_v3 }
 0x1a7   :  { %v6007_v62 = vpack.c.bf16 %v922_v7, %v918_v51  ;;  %v924_v58 = vpop.f32.mrb[43].mxu1  ;;  %v1415_v51 = vunpack.c.h.bf16 %v5908_v61 }
 0x1a8   :  { %v4473_v23 = vpop.f32.mrb[44].mxu0  ;;  %7229 = vst [vmem:[#allocation76_spill] sm:$0xff] %v6009_v29  ;;  %v6011_v4 = vpack.c.bf16 %v924_v58, %v920_v2  ;;  %v1431_v2 = vunpack.c.h.bf16 %v5910_v63 }
 0x1a9   :  { %v1019_v0 = vpop.f32.mrb[45].mxu0  ;;  %7228 = vst [vmem:[#allocation75_spill] sm:$0xff] %v6007_v62 }
 0x1aa   :  { %v4474_v11 = vpop.f32.mrb[46].mxu0  ;;  %7230 = vst [vmem:[#allocation77_spill] sm:$0xff] %v6011_v4 }
 0x1ab   :  { %v5999_v8 = vpack.c.bf16 %v4474_v11, %v4473_v23  ;;  %v1022_v30 = vpop.f32.mrb[47].mxu0  ;;  %v1414_v11 = vunpack.c.l.bf16 %v5908_v61  ;;  %v928_v17 = vpop.f32.mrb[44].mxu1 }
 0x1ac   :  { %v6001_v60 = vpack.c.bf16 %v1022_v30, %v1019_v0  ;;  %v1430_v0 = vunpack.c.l.bf16 %v5910_v63  ;;  %v930_v58 = vpop.f32.mrb[45].mxu1 }
 0x1ae   :  { %7226 = vst [vmem:[#allocation73_spill] sm:$0xff] %v6001_v60 }
 0x1b0   :  { %v1364_v1 = vpop.f32.mrb[48].mxu0 }
 0x1b1   :  { %v1365_v23 = vadd.f32 %v1364_v1, %v6005_v19  ;;  %v1366_v26 = vpop.f32.mrb[49].mxu0  ;;  %v932_v1 = vpop.f32.mrb[46].mxu1 }
 0x1b2   :  { %v1367_v30 = vadd.f32 %v1366_v26, %v6009_v29  ;;  %v1368_v60 = vpop.f32.mrb[50].mxu0  ;;  %v1055_v20 = vpack.c.bf16 %v932_v1, %v928_v17  ;;  %v934_v18 = vpop.f32.mrb[47].mxu1 }
 0x1b3   :  { %v1416_v7 = vadd.f32 %v1414_v11, %v1365_v23  ;;  %v1369_v62 = vadd.f32 %v1368_v60, %v6005_v19  ;;  %v1370_v25 = vpop.f32.mrb[51].mxu0  ;;  %v1056_v16 = vpack.c.bf16 %v934_v18, %v930_v58  ;;  %v1407_v11 = vpop.f32.mrb[48].mxu1  ;;  %v1448_v58 = vunpack.c.l.bf16 %v5918_v55 }
 0x1b4   :  { %v1432_v4 = vadd.f32 %v1430_v0, %v1367_v30  ;;  %v1371_v24 = vadd.f32 %v1370_v25, %v6009_v29  ;;  %v4493_v60 = vpop.f32.mrb[49].mxu1  ;;  %v7232_v30 = vsub.s32 0, %v5988_v13 }
 0x1b5   :  { %v4003_v22 = vmul.f32 -1.442695, %v1416_v7  ;;  %v1417_v21 = vadd.f32 %v1415_v51, %v1369_v62  ;;  %v1410_v19 = vpop.f32.mrb[50].mxu1  ;;  %v1159_v62 = vsub.s32 2, %v5988_v13  ;;  %v1708_v13 = vunpack.c.l.bf16 %v5999_v8 }
 0x1b6   :  { %v1433_v26 = vadd.f32 %v1431_v2, %v1371_v24  ;;  %v4005_v61 = vmul.f32 -1.442695, %v1432_v4  ;;  %v4494_v14 = vpop.f32.mrb[51].mxu1 }
 0x1b7   :  { %4955 = vpow2.f32 %v4003_v22  ;;  %v4004_v15 = vmul.f32 -1.442695, %v1417_v21  ;;  %v6024_v18 = vrot.slane %v1147_v59, %v1159_v62  ;;  %v6029_v14 = vld [vmem:[%s7050_s5 + $0x3] sm:$0x7]  ;;  %s5549_s5 = smov [#allocation14]  }
 0x1b8   :  { %v4006_v23 = vmul.f32 -1.442695, %v1433_v26  ;;  %v6035_v51 = vrot.slane %v6029_v14, %v7232_v30  ;;  %v6038_v59 = vrot.slane %v6029_v14, %v1155_v3  ;;  %v1690_v3 = vunpack.c.l.bf16 %v1056_v16  ;;  %s3868_s22 = sshll.u32 %s5549_s5, 4  ;;  %s3869_s22 = int_to_ptr.vmem [resolvable:$true] %s3868_s22 }
 0x1b9   :  { %4957 = vpow2.f32 %v4004_v15  ;;  %7231 = vst [vmem:[#allocation78_spill] sm:$0xff] %v6024_v18  ;;  %v1408_v24 = vadd.f32 %v1407_v11, %v6024_v18  ;;  %v1411_v1 = vadd.f32 %v1410_v19, %v6024_v18  ;;  %v1674_v11 = vunpack.c.l.bf16 %v1055_v20  ;;  %s5481_s23 = scalar_lea.vmem %s3869_s22, 1024  ;;  %p5486_p13 = scmp.lt.s32.totalorder %s3869_s22, %s3869_s22 }
 0x1ba   :  { %4959 = vpow2.f32 %v4005_v61  ;;  %v1449_v61 = vunpack.c.h.bf16 %v5918_v55  ;;  %v1691_v55 = vunpack.c.h.bf16 %v1056_v16  ;;  %p5482_p12 = scmp.ne.s32.totalorder %s3869_s22, %s5481_s23  ;;  %p5487_p0 = scmp.lt.s32.totalorder %s5481_s23, %s5481_s23 }
 0x1bb   :  { %4961 = vpow2.f32 %v4006_v23 }
 0x1bc   :  { %p5488_p1 = por %p5487_p0, %p5486_p13 }
 0x1be   :  { %p5489_p2 = pnand %p5488_p1, %p5482_p12 }
 0x1c1   :  { %v4956_v63 = vpop.eup %4955 }
 0x1c2   :  { %v1424_v25 = vadd.f32 1.0, %v4956_v63 }
 0x1c3   :  { %v4958_v0 = vpop.eup %4957 }
 0x1c4   :  { %4963 = vrcp.f32 %v1424_v25  ;;  %v1425_v17 = vadd.f32 1.0, %v4958_v0  ;;  %v4960_v15 = vpop.eup %4959 }
 0x1c5   :  { %v4962_v21 = vpop.eup %4961  ;;  %v1440_v22 = vadd.f32 1.0, %v4960_v15 }
 0x1c6   :  { %4965 = vrcp.f32 %v1425_v17  ;;  %v1441_v4 = vadd.f32 1.0, %v4962_v21  ;;  %v1675_v17 = vunpack.c.h.bf16 %v1055_v20 }
 0x1c7   :  { %4967 = vrcp.f32 %v1440_v22 }
 0x1c8   :  { %4969 = vrcp.f32 %v1441_v4 }
 0x1ce   :  { %v4964_v7 = vpop.eup %4963 }
 0x1cf   :  { %v1446_v2 = vmul.f32 %v4964_v7, %v1408_v24 }
 0x1d0   :  { %v4966_v26 = vpop.eup %4965  ;;  %v1624_v60 = vpop.f32.mrb[52].mxu0 }
 0x1d1   :  { %v1450_v23 = vadd.f32 %v1448_v58, %v1446_v2  ;;  %v1447_v63 = vmul.f32 %v4966_v26, %v1411_v1  ;;  %v1625_v25 = vadd.f32 %v1624_v60, %v6035_v51  ;;  %v1626_v0 = vpop.f32.mrb[53].mxu0  ;;  %v4968_v26 = vpop.eup %4967 }
 0x1d2   :  { %v1627_v15 = vadd.f32 %v1626_v0, %v6038_v59  ;;  %v1628_v21 = vpop.f32.mrb[54].mxu0 }
 0x1d3   :  { %4971 = vtanh.f32 %v1450_v23  ;;  %v1451_v22 = vadd.f32 %v1449_v61, %v1447_v63  ;;  %v1676_v24 = vadd.f32 %v1674_v11, %v1625_v25  ;;  %v1629_v19 = vadd.f32 %v1628_v21, %v6035_v51  ;;  %v1630_v30 = vpop.f32.mrb[55].mxu0  ;;  %v1667_v0 = vpop.f32.mrb[52].mxu1 }
 0x1d4   :  { %v1692_v7 = vadd.f32 %v1690_v3, %v1627_v15  ;;  %v1631_v4 = vadd.f32 %v1630_v30, %v6038_v59  ;;  %v4970_v23 = vpop.eup %4969  ;;  %v4513_v61 = vpop.f32.mrb[53].mxu1  ;;  %v1454_v63 = vsub.f32 1.0, %v4968_v26 }
 0x1d5   :  { %4973 = vtanh.f32 %v1451_v22  ;;  %v4031_v58 = vmul.f32 -1.442695, %v1676_v24  ;;  %v1677_v2 = vadd.f32 %v1675_v17, %v1629_v19  ;;  %v1670_v25 = vpop.f32.mrb[54].mxu1  ;;  %v1455_v3 = vsub.f32 1.0, %v4970_v23 }
 0x1d6   :  { %v1693_v1 = vadd.f32 %v1691_v55, %v1631_v4  ;;  %v4033_v60 = vmul.f32 -1.442695, %v1692_v7  ;;  %v4514_v16 = vpop.f32.mrb[55].mxu1  ;;  %v1458_v22 = vmul.f32 %v4968_v26, %v5772_v27  ;;  %v1459_v19 = vmul.f32 %v4970_v23, %v5774_v28 }
 0x1d7   :  { %4975 = vpow2.f32 %v4031_v58  ;;  %v4032_v20 = vmul.f32 -1.442695, %v1677_v2  ;;  %v6060_v27 = vrot.slane %v6029_v14, %v1159_v62  ;;  %v7234_v26 = vmov 0   ;;  %v7248_v16 = vld [vmem:[#allocation31_spill] sm:$0xff] }
 0x1d8   :  { %v4034_v11 = vmul.f32 -1.442695, %v1693_v1 }
 0x1d9   :  { %4977 = vpow2.f32 %v4032_v20  ;;  %v7233_v20 = vmov 0.0   ;;  %v1671_v14 = vadd.f32 %v1670_v25, %v6060_v27  ;;  %v7246_v25 = vld [vmem:[#allocation30_spill] sm:$0xff] }
 0x1da   :  { %4979 = vpow2.f32 %v4033_v60 }
 0x1db   :  { %4981 = vpow2.f32 %v4034_v11  ;;  %v6143_v11 = vld [vmem:[#allocation13 + $0x80] ss:$12 sps:$4 sm:$0xff]  }
 0x1dd   :  { %v4972_v21 = vpop.eup %4971 }
 0x1de   :  { %v1456_v15 = vmul.f32 %v4972_v21, %v1454_v63  ;;  %v7245_v63 = vld [vmem:[#allocation29_spill] sm:$0xff] }
 0x1df   :  { %v4974_v17 = vpop.eup %4973  ;;  %v6149_v21 = vld [vmem:[#allocation13 + $0x98] ss:$12 sps:$4 sm:$0xff]  }
 0x1e0   :  { %v1457_v24 = vmul.f32 %v4974_v17, %v1455_v3  ;;  %v6049_v30 = vadd.f32 %v1458_v22, %v1456_v15  ;;  %v7249_v3 = vld [vmem:[#allocation32_spill] sm:$0xff]  ;;  %v7250_v15 = vld [vmem:[#allocation22_spill] sm:$0xff]  ;;  %v7251_v22 = vld [vmem:[#allocation33_spill] sm:$0xff] }
 0x1e1   :  { %v4976_v55 = vpop.eup %4975 }
 0x1e2   :  { %v1684_v7 = vadd.f32 1.0, %v4976_v55  ;;  %v6051_v4 = vadd.f32 %v1459_v19, %v1457_v24  ;;  %v7252_v19 = vld [vmem:[#allocation34_spill] sm:$0xff] }
 0x1e3   :  { %v4978_v58 = vpop.eup %4977  ;;  %v1846_v55 = vunpack.c.l.bf16 %v7252_v19 }
 0x1e4   :  { %4983 = vrcp.f32 %v1684_v7  ;;  %v1685_v2 = vadd.f32 1.0, %v4978_v58  ;;  %v1729_v1 = vpack.c.bf16 %v6051_v4, %v6049_v30  ;;  %v4980_v28 = vpop.eup %4979  ;;  %v7253_v7 = vld [vmem:[#allocation74_spill] sm:$0xff] }
 0x1e5   :  { %v4982_v60 = vpop.eup %4981  ;;  %v1700_v23 = vadd.f32 1.0, %v4980_v28  ;;  %v7254_v28 = vld [vmem:[#allocation35_spill] sm:$0xff] }
 0x1e6   :  { %4985 = vrcp.f32 %v1685_v2  ;;  %4159 = vst [vmem:[#allocation14] sm:$0xff] %v1729_v1   ;;  %1795 = vmatmul.mubr.bf16.vlgmr.msra.gmra.mrb[56].mxu0 %v1729_v1  ;;  %4532 = vmatmul.mubr.bf16.vlgmr.msra.gmra.mrb[56].mxu1 %v1729_v1 }
 0x1e7   :  { %1895 = vmatpush1.bf16.msra.mxu0 %v5783_v31  ;;  %4536 = vmatpush3.bf16.msra.mxu1 %v5803_v37  ;;  %v1668_v31 = vadd.f32 %v1667_v0, %v6060_v27  ;;  %4987 = vrcp.f32 %v1700_v23 }
 0x1e8   :  { %1896 = vmatprep.subr.bf16.mxu0 %v5786_v32  ;;  %4537 = vmatprep.subr.bf16.mxu1 %v7233_v20  ;;  %v1701_v32 = vadd.f32 1.0, %v4982_v60  ;;  %v1862_v60 = vunpack.c.l.bf16 %v7254_v28 }
 0x1e9   :  { %1926 = vmatprep.mubr.bf16.mxu0 %v7234_v26  ;;  %4551 = vmatprep.mubr.msk.bf16.mxu1 %vm5548_vm0, %v7233_v20 }
 0x1ea   :  { %4989 = vrcp.f32 %v1701_v32 }
 0x1eb   :  { %1897 = vmatpush1.bf16.msra.mxu0 %v5789_v33  ;;  %4538 = vmatpush3.bf16.msra.mxu1 %v5812_v40  ;;  %v1709_v33 = vunpack.c.h.bf16 %v5999_v8  ;;  %v7243_v8 = vld [vmem:[#allocation28_spill] sm:$0xff] }
 0x1ec   :  { %1898 = vmatprep.subr.bf16.mxu0 %v5793_v34  ;;  %4539 = vmatprep.subr.bf16.mxu1 %v7233_v20 }
 0x1ee   :  { %v4984_v37 = vpop.eup %4983 }
 0x1ef   :  { %v1706_v62 = vmul.f32 %v4984_v37, %v1668_v31  ;;  %1899 = vmatpush1.bf16.msra.mxu0 %v5798_v35  ;;  %4540 = vmatpush3.bf16.msra.mxu1 %v5824_v43  ;;  %v1847_v37 = vunpack.c.h.bf16 %v7252_v19 }
 0x1f0   :  { %v4986_v0 = vpop.eup %4985  ;;  %1900 = vmatprep.subr.bf16.mxu0 %v5801_v36  ;;  %4541 = vmatprep.subr.bf16.mxu1 %v7233_v20 }
 0x1f1   :  { %v1710_v34 = vadd.f32 %v1708_v13, %v1706_v62  ;;  %v1707_v40 = vmul.f32 %v4986_v0, %v1671_v14  ;;  %v4988_v35 = vpop.eup %4987 }
 0x1f3   :  { %4991 = vtanh.f32 %v1710_v34  ;;  %v1711_v61 = vadd.f32 %v1709_v33, %v1707_v40  ;;  %1901 = vmatpush1.bf16.msra.mxu0 %v5806_v38  ;;  %4542 = vmatpush3.bf16.msra.mxu1 %v5834_v46  ;;  %v1714_v38 = vsub.f32 1.0, %v4988_v35  ;;  %v1718_v46 = vmul.f32 %v4988_v35, %v5850_v52  ;;  %v6105_v52 = vld [vmem:[#allocation13 + $0x4] ss:$12 sps:$4 sm:$0xff]  }
 0x1f4   :  { %1902 = vmatprep.subr.bf16.mxu0 %v5809_v39  ;;  %4543 = vmatprep.subr.bf16.mxu1 %v7233_v20  ;;  %v4990_v36 = vpop.eup %4989  ;;  %v1863_v33 = vunpack.c.h.bf16 %v7254_v28 }
 0x1f5   :  { %4993 = vtanh.f32 %v1711_v61  ;;  %v1715_v43 = vsub.f32 1.0, %v4990_v36 }
 0x1f7   :  { %1903 = vmatpush1.bf16.msra.mxu0 %v5818_v41  ;;  %4544 = vmatpush3.bf16.msra.mxu1 %v5844_v49 }
 0x1f8   :  { %1904 = vmatprep.subr.bf16.mxu0 %v5821_v42  ;;  %4545 = vmatprep.subr.bf16.mxu1 %v7233_v20 }
 0x1fb   :  { %1905 = vmatpush1.bf16.msra.mxu0 %v5828_v44  ;;  %4546 = vmatpush3.bf16.msra.mxu1 %v5856_v54  ;;  %v1719_v44 = vmul.f32 %v4990_v36, %v5852_v53  ;;  %v7237_v53 = vld [vmem:[#allocation24_spill] sm:$0xff] }
 0x1fc   :  { %1906 = vmatprep.subr.bf16.mxu0 %v5831_v45  ;;  %4547 = vmatprep.subr.bf16.mxu1 %v7233_v20 }
 0x1fd   :  { %v4992_v39 = vpop.eup %4991 }
 0x1fe   :  { %v1716_v41 = vmul.f32 %v4992_v39, %v1714_v38 }
 0x1ff   :  { %v4994_v49 = vpop.eup %4993  ;;  %1907 = vmatpush1.bf16.msra.mxu0 %v5838_v47  ;;  %4548 = vmatpush3.bf16.msra.mxu1 %v5864_v56  ;;  %v7239_v56 = vld [vmem:[#allocation25_spill] sm:$0xff] }
 0x200   :  { %1908 = vmatprep.subr.bf16.mxu0 %v5841_v48  ;;  %4549 = vmatprep.subr.bf16.mxu1 %v7233_v20  ;;  %v1717_v42 = vmul.f32 %v4994_v49, %v1715_v43  ;;  %v6097_v45 = vadd.f32 %v1718_v46, %v1716_v41  ;;  %v6110_v48 = vld [vmem:[#allocation13 + $0x8] ss:$12 sps:$4 sm:$0xff]   ;;  %7244 = vst [vmem:[#allocation25_spill] sm:$0xff] %v6143_v11 }
 0x202   :  { %v6099_v54 = vadd.f32 %v1719_v44, %v1717_v42 }
 0x203   :  { %1909 = vmatpush1.bf16.msra.mxu0 %v5848_v50  ;;  %4550 = vmatpush3.bf16.msra.mxu1 %v5871_v57  ;;  %v6119_v50 = vld [vmem:[#allocation13 + $0x20] ss:$12 sps:$4 sm:$0xff]  }
 0x204   :  { %v1739_v47 = vpack.c.bf16 %v6099_v54, %v6097_v45  ;;  %2067 = vmatprep.subr.bf16.mxu0 %v6105_v52  ;;  %4555 = vmatprep.subr.bf16.mxu1 %v7233_v20  ;;  %v7242_v57 = vld [vmem:[#allocation27_spill] sm:$0xff] }
 0x206   :  { %4164 = vst [vmem:[#allocation15 + $0x38] sm:$0xff] %v1739_v47   ;;  %1927 = vmatmul.mubr.bf16.vlgmr.msra.gmra.mrb[60].mxu0 %v1739_v47  ;;  %4552 = vmatmul.mubr.bf16.vlgmr.msra.gmra.mrb[60].mxu1 %v1739_v47 }
 0x207   :  { %2068 = vmatpush1.bf16.msra.mxu0 %v5715_v5  ;;  %4556 = vmatpush3.bf16.msra.mxu1 %v6110_v48  ;;  %v6125_v5 = vld [vmem:[#allocation13 + $0x38] ss:$12 sps:$4 sm:$0xff]  }
 0x208   :  { %2069 = vmatprep.subr.bf16.mxu0 %v5717_v6  ;;  %4557 = vmatprep.subr.bf16.mxu1 %v7233_v20  ;;  %7235 = vst [vmem:[#allocation79_spill] sm:$0xff] %v6125_v5  ;;  %v7236_v6 = vld [vmem:[#allocation23_spill] sm:$0xff] }
 0x209   :  { %2099 = vmatprep.mubr.bf16.mxu0 %v7234_v26  ;;  %4571 = vmatprep.mubr.msk.bf16.mxu1 %vm5548_vm0, %v7233_v20 }
 0x20b   :  { %2070 = vmatpush1.bf16.msra.mxu0 %v5724_v9  ;;  %4558 = vmatpush3.bf16.msra.mxu1 %v6119_v50  ;;  %v6131_v9 = vld [vmem:[#allocation13 + $0x50] ss:$12 sps:$4 sm:$0xff]  }
 0x20c   :  { %2071 = vmatprep.subr.bf16.mxu0 %v5727_v10  ;;  %4559 = vmatprep.subr.bf16.mxu1 %v7233_v20  ;;  %7238 = vst [vmem:[#allocation23_spill] sm:$0xff] %v6131_v9  ;;  %v7240_v10 = vld [vmem:[#allocation26_spill] sm:$0xff] }
 0x20d   :  { %7247 = vst [vmem:[#allocation26_spill] sm:$0xff] %v6149_v21 }
 0x20f   :  { %2072 = vmatpush1.bf16.msra.mxu0 %v5735_v12  ;;  %4560 = vmatpush3.bf16.msra.mxu1 %v6125_v5  ;;  %v6137_v12 = vld [vmem:[#allocation13 + $0x68] ss:$12 sps:$4 sm:$0xff]  }
 0x210   :  { %2073 = vmatprep.subr.bf16.mxu0 %v7236_v6  ;;  %4561 = vmatprep.subr.bf16.mxu1 %v7233_v20  ;;  %7241 = vst [vmem:[#allocation24_spill] sm:$0xff] %v6137_v12 }
 0x213   :  { %2074 = vmatpush1.bf16.msra.mxu0 %v7237_v53  ;;  %4562 = vmatpush3.bf16.msra.mxu1 %v6131_v9 }
 0x214   :  { %2075 = vmatprep.subr.bf16.mxu0 %v7239_v56  ;;  %4563 = vmatprep.subr.bf16.mxu1 %v7233_v20 }
 0x217   :  { %2076 = vmatpush1.bf16.msra.mxu0 %v7240_v10  ;;  %4564 = vmatpush3.bf16.msra.mxu1 %v6137_v12 }
 0x218   :  { %2077 = vmatprep.subr.bf16.mxu0 %v7242_v57  ;;  %4565 = vmatprep.subr.bf16.mxu1 %v7233_v20  ;;  %v7255_v57 = vld [vmem:[#allocation36_spill] sm:$0xff] }
 0x21b   :  { %2078 = vmatpush1.bf16.msra.mxu0 %v7243_v8  ;;  %4566 = vmatpush3.bf16.msra.mxu1 %v6143_v11  ;;  %v1880_v8 = vunpack.c.l.bf16 %v7255_v57 }
 0x21c   :  { %2079 = vmatprep.subr.bf16.mxu0 %v7245_v63  ;;  %4567 = vmatprep.subr.bf16.mxu1 %v7233_v20 }
 0x21f   :  { %2080 = vmatpush1.bf16.msra.mxu0 %v7246_v25  ;;  %4568 = vmatpush3.bf16.msra.mxu1 %v6149_v21 }
 0x220   :  { %2081 = vmatprep.subr.bf16.mxu0 %v7248_v16  ;;  %4569 = vmatprep.subr.bf16.mxu1 %v7233_v20 }
 0x223   :  { %2082 = vmatpush1.bf16.msra.mxu0 %v7249_v3  ;;  %4570 = vmatpush3.bf16.msra.mxu1 %v7250_v15  ;;  %v1881_v3 = vunpack.c.h.bf16 %v7255_v57  ;;  %v7256_v15 = vld [vmem:[#allocation75_spill] sm:$0xff] }
 0x224   :  { %2199 = vmatprep.subr.bf16.mxu0 %v7251_v22  ;;  %4575 = vmatprep.subr.bf16.mxu1 %v7233_v20  ;;  %v1978_v22 = vunpack.c.l.bf16 %v7256_v15  ;;  %v1979_v28 = vunpack.c.h.bf16 %v7256_v15 }
 0x2b9   :  { %v1796_v17 = vpop.f32.mrb[56].mxu0  ;;  %v1839_v24 = vpop.f32.mrb[56].mxu1 }
 0x2ba   :  { %v1797_v58 = vadd.f32 %v1796_v17, %v7253_v7  ;;  %v1798_v2 = vpop.f32.mrb[57].mxu0  ;;  %v4533_v1 = vpop.f32.mrb[57].mxu1  ;;  %v1840_v53 = vadd.f32 %v1839_v24, %v6024_v18 }
 0x2bb   :  { %v1799_v23 = vadd.f32 %v1798_v2, %v6009_v29  ;;  %v1800_v31 = vpop.f32.mrb[58].mxu0  ;;  %v1842_v32 = vpop.f32.mrb[58].mxu1 }
 0x2bc   :  { %v1848_v13 = vadd.f32 %v1846_v55, %v1797_v58  ;;  %v1801_v62 = vadd.f32 %v1800_v31, %v7253_v7  ;;  %v1802_v14 = vpop.f32.mrb[59].mxu0  ;;  %v4534_v0 = vpop.f32.mrb[59].mxu1  ;;  %v1843_v25 = vadd.f32 %v1842_v32, %v6024_v18 }
 0x2bd   :  { %v1864_v34 = vadd.f32 %v1862_v60, %v1799_v23  ;;  %v1803_v40 = vadd.f32 %v1802_v14, %v6009_v29  ;;  %v7257_v60 = vld [vmem:[#allocation77_spill] sm:$0xff] }
 0x2be   :  { %v4039_v61 = vmul.f32 -1.442695, %v1848_v13  ;;  %v1849_v35 = vadd.f32 %v1847_v37, %v1801_v62  ;;  %v1994_v23 = vunpack.c.l.bf16 %v7257_v60 }
 0x2bf   :  { %v1865_v36 = vadd.f32 %v1863_v33, %v1803_v40  ;;  %v4041_v39 = vmul.f32 -1.442695, %v1864_v34  ;;  %v1995_v34 = vunpack.c.h.bf16 %v7257_v60 }
 0x2c0   :  { %4995 = vpow2.f32 %v4039_v61  ;;  %v4040_v38 = vmul.f32 -1.442695, %v1849_v35 }
 0x2c1   :  { %v4042_v43 = vmul.f32 -1.442695, %v1865_v36 }
 0x2c2   :  { %4997 = vpow2.f32 %v4040_v38 }
 0x2c3   :  { %4999 = vpow2.f32 %v4041_v39 }
 0x2c4   :  { %5001 = vpow2.f32 %v4042_v43 }
 0x2ca   :  { %v4996_v41 = vpop.eup %4995 }
 0x2cb   :  { %v1856_v46 = vadd.f32 1.0, %v4996_v41 }
 0x2cc   :  { %v4998_v49 = vpop.eup %4997 }
 0x2cd   :  { %5003 = vrcp.f32 %v1856_v46  ;;  %v1857_v42 = vadd.f32 1.0, %v4998_v49  ;;  %v5000_v44 = vpop.eup %4999 }
 0x2ce   :  { %v5002_v47 = vpop.eup %5001  ;;  %v1872_v6 = vadd.f32 1.0, %v5000_v44 }
 0x2cf   :  { %5005 = vrcp.f32 %v1857_v42  ;;  %v1873_v56 = vadd.f32 1.0, %v5002_v47 }
 0x2d0   :  { %5007 = vrcp.f32 %v1872_v6 }
 0x2d1   :  { %5009 = vrcp.f32 %v1873_v56 }
 0x2d7   :  { %v5004_v10 = vpop.eup %5003 }
 0x2d8   :  { %v1878_v63 = vmul.f32 %v5004_v10, %v1840_v53 }
 0x2d9   :  { %v5006_v16 = vpop.eup %5005  ;;  %v1928_v17 = vpop.f32.mrb[60].mxu0 }
 0x2da   :  { %v6171_v19 = vpop.f32.mrb[60].mxu1  ;;  %v1882_v55 = vadd.f32 %v1880_v8, %v1878_v63  ;;  %v1879_v58 = vmul.f32 %v5006_v16, %v1843_v25  ;;  %v1929_v24 = vadd.f32 %v1928_v17, %v6035_v51  ;;  %v1930_v2 = vpop.f32.mrb[61].mxu0 }
 0x2db   :  { %v4553_v1 = vpop.f32.mrb[61].mxu1  ;;  %v1931_v31 = vadd.f32 %v1930_v2, %v6038_v59  ;;  %v1932_v32 = vpop.f32.mrb[62].mxu0  ;;  %v6203_v2 = vld [vmem:[#allocation13 + $0xd8] ss:$12 sps:$4 sm:$0xff]   ;;  %v1972_v60 = vadd.f32 %v6171_v19, %v6060_v27 }
 0x2dc   :  { %v6177_v37 = vpop.f32.mrb[62].mxu1  ;;  %5011 = vtanh.f32 %v1882_v55  ;;  %v1883_v13 = vadd.f32 %v1881_v3, %v1879_v58  ;;  %v1980_v62 = vadd.f32 %v1978_v22, %v1929_v24  ;;  %v1933_v14 = vadd.f32 %v1932_v32, %v6035_v51  ;;  %v1934_v0 = vpop.f32.mrb[63].mxu0  ;;  %v6196_v55 = vld [vmem:[#allocation13 + $0xdc] ss:$12 sps:$4 sm:$0xff]   ;;  %v6206_v1 = vld [vmem:[#allocation13 + $0xe0] ss:$12 sps:$4 sm:$0xff]  }
 0x2dd   :  { %v4554_v33 = vpop.f32.mrb[63].mxu1  ;;  %v1996_v40 = vadd.f32 %v1994_v23, %v1931_v31  ;;  %v1935_v61 = vadd.f32 %v1934_v0, %v6038_v59  ;;  %v5008_v43 = vpop.eup %5007  ;;  %v7258_v32 = vld [vmem:[#allocation73_spill] sm:$0xff] }
 0x2de   :  { %5013 = vtanh.f32 %v1883_v13  ;;  %v4043_v35 = vmul.f32 -1.442695, %v1980_v62  ;;  %v1981_v36 = vadd.f32 %v1979_v28, %v1933_v14  ;;  %v5010_v46 = vpop.eup %5009  ;;  %v1886_v42 = vsub.f32 1.0, %v5008_v43  ;;  %v6209_v28 = vld [vmem:[#allocation13 + $0xf4] ss:$12 sps:$4 sm:$0xff]  }
 0x2df   :  { %v1997_v38 = vadd.f32 %v1995_v34, %v1935_v61  ;;  %v4045_v41 = vmul.f32 -1.442695, %v1996_v40  ;;  %v1887_v47 = vsub.f32 1.0, %v5010_v46  ;;  %v1890_v53 = vmul.f32 %v5008_v43, %v6049_v30  ;;  %v6190_v30 = vld [vmem:[#allocation13 + $0xc0] ss:$12 sps:$4 sm:$0xff]  }
 0x2e0   :  { %5015 = vpow2.f32 %v4043_v35  ;;  %v4044_v39 = vmul.f32 -1.442695, %v1981_v36  ;;  %v1891_v57 = vmul.f32 %v5010_v46, %v6051_v4  ;;  %v6193_v4 = vld [vmem:[#allocation13 + $0xc8] ss:$12 sps:$4 sm:$0xff]   ;;  %v2012_v13 = vunpack.c.l.bf16 %v7258_v32  ;;  %v6218_v0 = vld [vmem:[#allocation13 + $0xf0] ss:$12 sps:$4 sm:$0xff]  }
 0x2e1   :  { %v4046_v49 = vmul.f32 -1.442695, %v1997_v38  ;;  %v1975_v14 = vadd.f32 %v6177_v37, %v6060_v27  ;;  %v6221_v33 = vld [vmem:[#allocation13 + $0xf8] ss:$12 sps:$4 sm:$0xff]   ;;  %v2013_v19 = vunpack.c.h.bf16 %v7258_v32  ;;  %v6229_v36 = vld [vmem:[#allocation13 + $0x108] ss:$12 sps:$4 sm:$0xff]  }
 0x2e2   :  { %5017 = vpow2.f32 %v4044_v39  ;;  %v6224_v40 = vld [vmem:[#allocation13 + $0x10c] ss:$12 sps:$4 sm:$0xff]   ;;  %v6232_v38 = vld [vmem:[#allocation13 + $0x110] ss:$12 sps:$4 sm:$0xff]  }
 0x2e3   :  { %5019 = vpow2.f32 %v4045_v41  ;;  %v6235_v39 = vld [vmem:[#allocation13 + $0x124] ss:$12 sps:$4 sm:$0xff]   ;;  %v6239_v43 = vld [vmem:[#allocation13 + $0x120] ss:$12 sps:$4 sm:$0xff]   ;;  %v6242_v41 = vld [vmem:[#allocation13 + $0x128] ss:$12 sps:$4 sm:$0xff]  }
 0x2e4   :  { %5021 = vpow2.f32 %v4046_v49  ;;  %v6245_v46 = vld [vmem:[#allocation13 + $0x13c] ss:$12 sps:$4 sm:$0xff]  }
 0x2e5   :  { %v6289_v32 = vld [vmem:[#allocation13 + $0x1c] ss:$12 sps:$4 sm:$0xff]  }
 0x2e6   :  { %v5012_v44 = vpop.eup %5011 }
 0x2e7   :  { %v1888_v6 = vmul.f32 %v5012_v44, %v1886_v42  ;;  %v6249_v44 = vld [vmem:[#allocation13 + $0x138] ss:$12 sps:$4 sm:$0xff]  }
 0x2e8   :  { %v5014_v56 = vpop.eup %5013 }
 0x2e9   :  { %v1889_v10 = vmul.f32 %v5014_v56, %v1887_v47  ;;  %v6184_v8 = vadd.f32 %v1890_v53, %v1888_v6  ;;  %v6252_v47 = vld [vmem:[#allocation13 + $0x140] ss:$12 sps:$4 sm:$0xff]  }
 0x2ea   :  { %v5016_v63 = vpop.eup %5015  ;;  %v6255_v6 = vld [vmem:[#allocation13 + $0x154] ss:$12 sps:$4 sm:$0xff]  }
 0x2eb   :  { %v1988_v25 = vadd.f32 1.0, %v5016_v63  ;;  %v6186_v16 = vadd.f32 %v1891_v57, %v1889_v10 }
 0x2ec   :  { %v5018_v3 = vpop.eup %5017 }
 0x2ed   :  { %5023 = vrcp.f32 %v1988_v25  ;;  %v1989_v15 = vadd.f32 1.0, %v5018_v3  ;;  %v2033_v22 = vpack.c.bf16 %v6186_v16, %v6184_v8  ;;  %v5020_v17 = vpop.eup %5019  ;;  %v6260_v3 = vld [vmem:[#allocation13 + $0x150] ss:$12 sps:$4 sm:$0xff]  }
 0x2ee   :  { %v5022_v58 = vpop.eup %5021  ;;  %v2004_v24 = vadd.f32 1.0, %v5020_v17 }
 0x2ef   :  { %5025 = vrcp.f32 %v1989_v15  ;;  %4169 = vst [vmem:[#allocation14 + $0x8] sm:$0xff] %v2033_v22   ;;  %2100 = vmatmul.mubr.bf16.vlgmr.msra.gmra.mrb[64].mxu0 %v2033_v22  ;;  %4572 = vmatmul.mubr.bf16.vlgmr.msra.gmra.mrb[64].mxu1 %v2033_v22  ;;  %v2005_v23 = vadd.f32 1.0, %v5022_v58  ;;  %v6263_v15 = vld [vmem:[#allocation13 + $0x158] ss:$12 sps:$4 sm:$0xff]  }
 0x2f0   :  { %2200 = vmatpush1.bf16.msra.mxu0 %v6190_v30  ;;  %4576 = vmatpush3.bf16.msra.mxu1 %v6193_v4  ;;  %5027 = vrcp.f32 %v2004_v24  ;;  %v6266_v22 = vld [vmem:[#allocation13 + $0x16c] ss:$12 sps:$4 sm:$0xff]  }
 0x2f1   :  { %2201 = vmatprep.subr.bf16.mxu0 %v6196_v55  ;;  %4577 = vmatprep.subr.bf16.mxu1 %v7233_v20  ;;  %5029 = vrcp.f32 %v2005_v23  ;;  %v6278_v23 = vld [vmem:[#allocation13 + $0x170] ss:$12 sps:$4 sm:$0xff]  }
 0x2f2   :  { %2231 = vmatprep.mubr.bf16.mxu0 %v7234_v26  ;;  %4591 = vmatprep.mubr.msk.bf16.mxu1 %vm5548_vm0, %v7233_v20 }
 0x2f4   :  { %2202 = vmatpush1.bf16.msra.mxu0 %v6203_v2  ;;  %4578 = vmatpush3.bf16.msra.mxu1 %v6206_v1 }
 0x2f5   :  { %2203 = vmatprep.subr.bf16.mxu0 %v6209_v28  ;;  %4579 = vmatprep.subr.bf16.mxu1 %v7233_v20 }
 0x2f7   :  { %v5024_v31 = vpop.eup %5023 }
 0x2f8   :  { %v2010_v62 = vmul.f32 %v5024_v31, %v1972_v60  ;;  %2204 = vmatpush1.bf16.msra.mxu0 %v6218_v0  ;;  %4580 = vmatpush3.bf16.msra.mxu1 %v6221_v33  ;;  %v6275_v60 = vld [vmem:[#allocation13 + $0x168] ss:$12 sps:$4 sm:$0xff]  }
 0x2f9   :  { %v5026_v34 = vpop.eup %5025  ;;  %2205 = vmatprep.subr.bf16.mxu0 %v6224_v40  ;;  %4581 = vmatprep.subr.bf16.mxu1 %v7233_v20 }
 0x2fa   :  { %v2014_v61 = vadd.f32 %v2012_v13, %v2010_v62  ;;  %v2011_v35 = vmul.f32 %v5026_v34, %v1975_v14  ;;  %v5028_v49 = vpop.eup %5027  ;;  %v6296_v13 = vld [vmem:[#allocation13 + $0x18] ss:$12 sps:$4 sm:$0xff]   ;;  %v6300_v62 = vld [vmem:[#allocation13 + $0x34] ss:$12 sps:$4 sm:$0xff]   ;;  %v6304_v14 = vld [vmem:[#allocation13 + $0x30] ss:$12 sps:$4 sm:$0xff]  }
 0x2fb   :  { %v5030_v42 = vpop.eup %5029  ;;  %v2018_v53 = vsub.f32 1.0, %v5028_v49  ;;  %v2022_v63 = vmul.f32 %v5028_v49, %v6097_v45  ;;  %7259 = vst [vmem:[#allocation27_spill] sm:$0xff] %v6300_v62  ;;  %7260 = vst [vmem:[#allocation28_spill] sm:$0xff] %v6304_v14  ;;  %v6308_v34 = vld [vmem:[#allocation13 + $0x4c] ss:$12 sps:$4 sm:$0xff]  }
 0x2fc   :  { %5031 = vtanh.f32 %v2014_v61  ;;  %v2015_v37 = vadd.f32 %v2013_v19, %v2011_v35  ;;  %2206 = vmatpush1.bf16.msra.mxu0 %v6229_v36  ;;  %4582 = vmatpush3.bf16.msra.mxu1 %v6232_v38  ;;  %v2019_v10 = vsub.f32 1.0, %v5030_v42  ;;  %v2023_v58 = vmul.f32 %v5030_v42, %v6099_v54  ;;  %v6285_v54 = vld [vmem:[#allocation13] ss:$12 sps:$4 sm:$0xff]   ;;  %7261 = vst [vmem:[#allocation29_spill] sm:$0xff] %v6308_v34  ;;  %v6312_v19 = vld [vmem:[#allocation13 + $0x48] ss:$12 sps:$4 sm:$0xff]  }
 0x2fd   :  { %2207 = vmatprep.subr.bf16.mxu0 %v6235_v39  ;;  %4583 = vmatprep.subr.bf16.mxu1 %v7233_v20  ;;  %7262 = vst [vmem:[#allocation30_spill] sm:$0xff] %v6312_v19  ;;  %v6316_v61 = vld [vmem:[#allocation13 + $0x64] ss:$12 sps:$4 sm:$0xff]   ;;  %v6320_v35 = vld [vmem:[#allocation13 + $0x60] ss:$12 sps:$4 sm:$0xff]  }
 0x2fe   :  { %5033 = vtanh.f32 %v2015_v37  ;;  %7263 = vst [vmem:[#allocation31_spill] sm:$0xff] %v6316_v61  ;;  %7264 = vst [vmem:[#allocation32_spill] sm:$0xff] %v6320_v35  ;;  %v6324_v37 = vld [vmem:[#allocation13 + $0x7c] ss:$12 sps:$4 sm:$0xff]   ;;  %v6328_v49 = vld [vmem:[#allocation13 + $0x78] ss:$12 sps:$4 sm:$0xff]  }
 0x2ff   :  { %7265 = vst [vmem:[#allocation22_spill] sm:$0xff] %v6324_v37  ;;  %7266 = vst [vmem:[#allocation33_spill] sm:$0xff] %v6328_v49  ;;  %v6332_v42 = vld [vmem:[#allocation13 + $0x94] ss:$12 sps:$4 sm:$0xff]  }
 0x300   :  { %2208 = vmatpush1.bf16.msra.mxu0 %v6239_v43  ;;  %4584 = vmatpush3.bf16.msra.mxu1 %v6242_v41  ;;  %7267 = vst [vmem:[#allocation34_spill] sm:$0xff] %v6332_v42 }
 0x301   :  { %2209 = vmatprep.subr.bf16.mxu0 %v6245_v46  ;;  %4585 = vmatprep.subr.bf16.mxu1 %v7233_v20 }
 0x304   :  { %2210 = vmatpush1.bf16.msra.mxu0 %v6249_v44  ;;  %4586 = vmatpush3.bf16.msra.mxu1 %v6252_v47 }
 0x305   :  { %2211 = vmatprep.subr.bf16.mxu0 %v6255_v6  ;;  %4587 = vmatprep.subr.bf16.mxu1 %v7233_v20 }
 0x306   :  { %v5032_v56 = vpop.eup %5031 }
 0x307   :  { %v2020_v57 = vmul.f32 %v5032_v56, %v2018_v53  ;;  %v6336_v53 = vld [vmem:[#allocation13 + $0x90] ss:$12 sps:$4 sm:$0xff]   ;;  %v6340_v56 = vld [vmem:[#allocation13 + $0xac] ss:$12 sps:$4 sm:$0xff]  }
 0x308   :  { %v5034_v25 = vpop.eup %5033  ;;  %2212 = vmatpush1.bf16.msra.mxu0 %v6260_v3  ;;  %4588 = vmatpush3.bf16.msra.mxu1 %v6263_v15  ;;  %7268 = vst [vmem:[#allocation35_spill] sm:$0xff] %v6336_v53  ;;  %7269 = vst [vmem:[#allocation36_spill] sm:$0xff] %v6340_v56 }
 0x309   :  { %2213 = vmatprep.subr.bf16.mxu0 %v6266_v22  ;;  %4589 = vmatprep.subr.bf16.mxu1 %v7233_v20  ;;  %v2021_v17 = vmul.f32 %v5034_v25, %v2019_v10  ;;  %v6271_v24 = vadd.f32 %v2022_v63, %v2020_v57  ;;  %v6344_v10 = vld [vmem:[#allocation13 + $0xa8] ss:$12 sps:$4 sm:$0xff]   ;;  %v6347_v57 = vld [vmem:[#allocation13 + $0xb0] ss:$12 sps:$4 sm:$0xff]  }
 0x30a   :  { %7270 = vst [vmem:[#allocation75_spill] sm:$0xff] %v6344_v10  ;;  %7271 = vst [vmem:[#allocation77_spill] sm:$0xff] %v6347_v57  ;;  %v6350_v63 = vld [vmem:[#allocation13 + $0xc4] ss:$12 sps:$4 sm:$0xff]  }
 0x30b   :  { %v6273_v45 = vadd.f32 %v2023_v58, %v2021_v17  ;;  %7272 = vst [vmem:[#allocation73_spill] sm:$0xff] %v6350_v63  ;;  %v7273_v58 = vld [vmem:[#allocation37_spill] sm:$0xff] }
 0x30c   :  { %2214 = vmatpush1.bf16.msra.mxu0 %v6275_v60  ;;  %4590 = vmatpush3.bf16.msra.mxu1 %v6278_v23 }
 0x30d   :  { %v2044_v31 = vpack.c.bf16 %v6273_v45, %v6271_v24  ;;  %2372 = vmatprep.subr.bf16.mxu0 %v6105_v52  ;;  %4595 = vmatprep.subr.bf16.mxu1 %v7233_v20 }
 0x30f   :  { %4174 = vst [vmem:[#allocation15 + $0x30] sm:$0xff] %v2044_v31   ;;  %2232 = vmatmul.mubr.bf16.vlgmr.msra.gmra.mrb[68].mxu0 %v2044_v31  ;;  %4592 = vmatmul.mubr.bf16.vlgmr.msra.gmra.mrb[68].mxu1 %v2044_v31  ;;  %v2151_v31 = vunpack.c.l.bf16 %v7273_v58 }
 0x310   :  { %2373 = vmatpush1.bf16.msra.mxu0 %v6285_v54  ;;  %4596 = vmatpush3.bf16.msra.mxu1 %v6110_v48 }
 0x311   :  { %2374 = vmatprep.subr.bf16.mxu0 %v6289_v32  ;;  %4597 = vmatprep.subr.bf16.mxu1 %v7233_v20 }
 0x312   :  { %2404 = vmatprep.mubr.bf16.mxu0 %v7234_v26  ;;  %4611 = vmatprep.mubr.msk.bf16.mxu1 %vm5548_vm0, %v7233_v20 }
 0x314   :  { %2375 = vmatpush1.bf16.msra.mxu0 %v6296_v13  ;;  %4598 = vmatpush3.bf16.msra.mxu1 %v6119_v50 }
 0x315   :  { %2376 = vmatprep.subr.bf16.mxu0 %v6300_v62  ;;  %4599 = vmatprep.subr.bf16.mxu1 %v7233_v20 }
 0x318   :  { %2377 = vmatpush1.bf16.msra.mxu0 %v6304_v14  ;;  %4600 = vmatpush3.bf16.msra.mxu1 %v6125_v5 }
 0x319   :  { %2378 = vmatprep.subr.bf16.mxu0 %v6308_v34  ;;  %4601 = vmatprep.subr.bf16.mxu1 %v7233_v20 }
 0x31c   :  { %2379 = vmatpush1.bf16.msra.mxu0 %v6312_v19  ;;  %4602 = vmatpush3.bf16.msra.mxu1 %v6131_v9 }
 0x31d   :  { %2380 = vmatprep.subr.bf16.mxu0 %v6316_v61  ;;  %4603 = vmatprep.subr.bf16.mxu1 %v7233_v20 }
 0x320   :  { %2381 = vmatpush1.bf16.msra.mxu0 %v6320_v35  ;;  %4604 = vmatpush3.bf16.msra.mxu1 %v6137_v12 }
 0x321   :  { %2382 = vmatprep.subr.bf16.mxu0 %v6324_v37  ;;  %4605 = vmatprep.subr.bf16.mxu1 %v7233_v20  ;;  %v2152_v37 = vunpack.c.h.bf16 %v7273_v58 }
 0x324   :  { %2383 = vmatpush1.bf16.msra.mxu0 %v6328_v49  ;;  %4606 = vmatpush3.bf16.msra.mxu1 %v6143_v11 }
 0x325   :  { %2384 = vmatprep.subr.bf16.mxu0 %v6332_v42  ;;  %4607 = vmatprep.subr.bf16.mxu1 %v7233_v20  ;;  %v7274_v42 = vld [vmem:[#allocation38_spill] sm:$0xff] }
 0x326   :  { %v2168_v9 = vunpack.c.h.bf16 %v7274_v42 }
 0x328   :  { %2385 = vmatpush1.bf16.msra.mxu0 %v6336_v53  ;;  %4608 = vmatpush3.bf16.msra.mxu1 %v6149_v21 }
 0x329   :  { %2386 = vmatprep.subr.bf16.mxu0 %v6340_v56  ;;  %4609 = vmatprep.subr.bf16.mxu1 %v7233_v20 }
 0x32c   :  { %2387 = vmatpush1.bf16.msra.mxu0 %v6344_v10  ;;  %4610 = vmatpush3.bf16.msra.mxu1 %v6347_v57  ;;  %v2167_v10 = vunpack.c.l.bf16 %v7274_v42 }
 0x32d   :  { %2504 = vmatprep.subr.bf16.mxu0 %v6350_v63  ;;  %4615 = vmatprep.subr.bf16.mxu1 %v7233_v20 }
 0x3c2   :  { %v2101_v25 = vpop.f32.mrb[64].mxu0  ;;  %v2144_v17 = vpop.f32.mrb[64].mxu1 }
 0x3c3   :  { %v2102_v56 = vadd.f32 %v2101_v25, %v7253_v7  ;;  %v2103_v21 = vpop.f32.mrb[65].mxu0  ;;  %v4573_v53 = vpop.f32.mrb[65].mxu1 }
 0x3c4   :  { %v2104_v11 = vadd.f32 %v2103_v21, %v6009_v29  ;;  %v2105_v49 = vpop.f32.mrb[66].mxu0  ;;  %v2147_v57 = vpop.f32.mrb[66].mxu1 }
 0x3c5   :  { %v2153_v12 = vadd.f32 %v2151_v31, %v2102_v56  ;;  %v2106_v63 = vadd.f32 %v2105_v49, %v7253_v7  ;;  %v2107_v35 = vpop.f32.mrb[67].mxu0  ;;  %v4574_v61 = vpop.f32.mrb[67].mxu1 }
 0x3c6   :  { %v2169_v19 = vadd.f32 %v2167_v10, %v2104_v11  ;;  %v2108_v25 = vadd.f32 %v2107_v35, %v6009_v29 }
 0x3c7   :  { %v4051_v34 = vmul.f32 -1.442695, %v2153_v12  ;;  %v2154_v53 = vadd.f32 %v2152_v37, %v2106_v63  ;;  %v2145_v12 = vadd.f32 %v2144_v17, %v6024_v18  ;;  %v7276_v63 = vld [vmem:[#allocation71_spill] sm:$0xff] }
 0x3c8   :  { %v2170_v5 = vadd.f32 %v2168_v9, %v2108_v25  ;;  %v4053_v21 = vmul.f32 -1.442695, %v2169_v19  ;;  %v2283_v31 = vunpack.c.l.bf16 %v7276_v63 }
 0x3c9   :  { %5035 = vpow2.f32 %v4051_v34  ;;  %v4052_v14 = vmul.f32 -1.442695, %v2154_v53  ;;  %v7275_v34 = vld [vmem:[#allocation40_spill] sm:$0xff] }
 0x3ca   :  { %v4054_v62 = vmul.f32 -1.442695, %v2170_v5  ;;  %v2185_v37 = vunpack.c.l.bf16 %v7275_v34  ;;  %v2148_v5 = vadd.f32 %v2147_v57, %v6024_v18  ;;  %v2186_v19 = vunpack.c.h.bf16 %v7275_v34 }
 0x3cb   :  { %5037 = vpow2.f32 %v4052_v14 }
 0x3cc   :  { %5039 = vpow2.f32 %v4053_v21 }
 0x3cd   :  { %5041 = vpow2.f32 %v4054_v62 }
 0x3d3   :  { %v5036_v56 = vpop.eup %5035 }
 0x3d4   :  { %v2161_v58 = vadd.f32 1.0, %v5036_v56 }
 0x3d5   :  { %v5038_v49 = vpop.eup %5037 }
 0x3d6   :  { %5043 = vrcp.f32 %v2161_v58  ;;  %v2162_v61 = vadd.f32 1.0, %v5038_v49  ;;  %v5040_v42 = vpop.eup %5039 }
 0x3d7   :  { %v5042_v11 = vpop.eup %5041  ;;  %v2177_v10 = vadd.f32 1.0, %v5040_v42  ;;  %v7277_v42 = vld [vmem:[#allocation72_spill] sm:$0xff] }
 0x3d8   :  { %5045 = vrcp.f32 %v2162_v61  ;;  %v2178_v35 = vadd.f32 1.0, %v5042_v11  ;;  %v2284_v61 = vunpack.c.h.bf16 %v7276_v63  ;;  %v2299_v11 = vunpack.c.l.bf16 %v7277_v42 }
 0x3d9   :  { %5047 = vrcp.f32 %v2177_v10 }
 0x3da   :  { %5049 = vrcp.f32 %v2178_v35  ;;  %v2300_v35 = vunpack.c.h.bf16 %v7277_v42 }
 0x3e0   :  { %v5044_v9 = vpop.eup %5043 }
 0x3e1   :  { %v2183_v14 = vmul.f32 %v5044_v9, %v2145_v12 }
 0x3e2   :  { %v5046_v62 = vpop.eup %5045  ;;  %v2233_v25 = vpop.f32.mrb[68].mxu0 }
 0x3e3   :  { %v6367_v53 = vpop.f32.mrb[68].mxu1  ;;  %v2187_v21 = vadd.f32 %v2185_v37, %v2183_v14  ;;  %v2184_v56 = vmul.f32 %v5046_v62, %v2148_v5  ;;  %v2234_v17 = vadd.f32 %v2233_v25, %v6035_v51  ;;  %v2235_v58 = vpop.f32.mrb[69].mxu0 }
 0x3e4   :  { %v4593_v49 = vpop.f32.mrb[69].mxu1  ;;  %v2236_v57 = vadd.f32 %v2235_v58, %v6038_v59  ;;  %v2237_v10 = vpop.f32.mrb[70].mxu0 }
 0x3e5   :  { %v2279_v12 = vpop.f32.mrb[70].mxu1  ;;  %5051 = vtanh.f32 %v2187_v21  ;;  %v2188_v9 = vadd.f32 %v2186_v19, %v2184_v56  ;;  %v2285_v34 = vadd.f32 %v2283_v31, %v2234_v17  ;;  %v2238_v18 = vadd.f32 %v2237_v10, %v6035_v51  ;;  %v2239_v37 = vpop.f32.mrb[71].mxu0 }
 0x3e6   :  { %v4594_v14 = vpop.f32.mrb[71].mxu1  ;;  %v2301_v5 = vadd.f32 %v2299_v11, %v2236_v57  ;;  %v2240_v62 = vadd.f32 %v2239_v37, %v6038_v59  ;;  %v5048_v29 = vpop.eup %5047 }
 0x3e7   :  { %5053 = vtanh.f32 %v2188_v9  ;;  %v4055_v63 = vmul.f32 -1.442695, %v2285_v34  ;;  %v2286_v25 = vadd.f32 %v2284_v61, %v2238_v18  ;;  %v5050_v19 = vpop.eup %5049  ;;  %v2191_v56 = vsub.f32 1.0, %v5048_v29 }
 0x3e8   :  { %v2302_v49 = vadd.f32 %v2300_v35, %v2240_v62  ;;  %v4057_v21 = vmul.f32 -1.442695, %v2301_v5  ;;  %v2192_v10 = vsub.f32 1.0, %v5050_v19  ;;  %v2195_v42 = vmul.f32 %v5048_v29, %v6184_v8 }
 0x3e9   :  { %5055 = vpow2.f32 %v4055_v63  ;;  %v4056_v58 = vmul.f32 -1.442695, %v2286_v25  ;;  %v2196_v18 = vmul.f32 %v5050_v19, %v6186_v16  ;;  %v2277_v63 = vadd.f32 %v6367_v53, %v6060_v27 }
 0x3ea   :  { %v4058_v31 = vmul.f32 -1.442695, %v2302_v49 }
 0x3eb   :  { %5057 = vpow2.f32 %v4056_v58  ;;  %v7278_v58 = vld [vmem:[#allocation69_spill] sm:$0xff] }
 0x3ec   :  { %5059 = vpow2.f32 %v4057_v21  ;;  %v2317_v21 = vunpack.c.l.bf16 %v7278_v58 }
 0x3ed   :  { %5061 = vpow2.f32 %v4058_v31  ;;  %v2280_v31 = vadd.f32 %v2279_v12, %v6060_v27 }
 0x3ef   :  { %v5052_v17 = vpop.eup %5051 }
 0x3f0   :  { %v2193_v14 = vmul.f32 %v5052_v17, %v2191_v56  ;;  %v2318_v17 = vunpack.c.h.bf16 %v7278_v58  ;;  %v7287_v58 = vld [vmem:[#allocation24_spill] sm:$0xff] }
 0x3f1   :  { %v5054_v11 = vpop.eup %5053 }
 0x3f2   :  { %v2194_v57 = vmul.f32 %v5054_v11, %v2192_v10  ;;  %v6378_v61 = vadd.f32 %v2195_v42, %v2193_v14 }
 0x3f3   :  { %v5056_v9 = vpop.eup %5055 }
 0x3f4   :  { %v2293_v34 = vadd.f32 1.0, %v5056_v9  ;;  %v6380_v37 = vadd.f32 %v2196_v18, %v2194_v57 }
 0x3f5   :  { %v5058_v35 = vpop.eup %5057 }
 0x3f6   :  { %5063 = vrcp.f32 %v2293_v34  ;;  %v2294_v5 = vadd.f32 1.0, %v5058_v35  ;;  %v2338_v62 = vpack.c.bf16 %v6380_v37, %v6378_v61  ;;  %v5060_v29 = vpop.eup %5059 }
 0x3f7   :  { %v5062_v8 = vpop.eup %5061  ;;  %v2309_v16 = vadd.f32 1.0, %v5060_v29 }
 0x3f8   :  { %5065 = vrcp.f32 %v2294_v5  ;;  %4179 = vst [vmem:[#allocation14 + $0x10] sm:$0xff] %v2338_v62   ;;  %2405 = vmatmul.mubr.bf16.vlgmr.msra.gmra.mrb[72].mxu0 %v2338_v62  ;;  %4612 = vmatmul.mubr.bf16.vlgmr.msra.gmra.mrb[72].mxu1 %v2338_v62  ;;  %v2310_v25 = vadd.f32 1.0, %v5062_v8 }
 0x3f9   :  { %2505 = vmatpush1.bf16.msra.mxu0 %v6190_v30  ;;  %4616 = vmatpush3.bf16.msra.mxu1 %v6193_v4  ;;  %5067 = vrcp.f32 %v2309_v16  ;;  %v7282_v16 = vld [vmem:[#allocation29_spill] sm:$0xff] }
 0x3fa   :  { %2506 = vmatprep.subr.bf16.mxu0 %v6196_v55  ;;  %4617 = vmatprep.subr.bf16.mxu1 %v7233_v20  ;;  %5069 = vrcp.f32 %v2310_v25  ;;  %v7284_v25 = vld [vmem:[#allocation23_spill] sm:$0xff] }
 0x3fb   :  { %2536 = vmatprep.mubr.bf16.mxu0 %v7234_v26  ;;  %4631 = vmatprep.mubr.msk.bf16.mxu1 %vm5548_vm0, %v7233_v20 }
 0x3fd   :  { %2507 = vmatpush1.bf16.msra.mxu0 %v6203_v2  ;;  %4618 = vmatpush3.bf16.msra.mxu1 %v6206_v1 }
 0x3fe   :  { %2508 = vmatprep.subr.bf16.mxu0 %v6209_v28  ;;  %4619 = vmatprep.subr.bf16.mxu1 %v7233_v20 }
 0x400   :  { %v5064_v49 = vpop.eup %5063 }
 0x401   :  { %v2315_v19 = vmul.f32 %v5064_v49, %v2277_v63  ;;  %2509 = vmatpush1.bf16.msra.mxu0 %v6218_v0  ;;  %4620 = vmatpush3.bf16.msra.mxu1 %v6221_v33  ;;  %v7283_v63 = vld [vmem:[#allocation30_spill] sm:$0xff]  ;;  %v7285_v49 = vld [vmem:[#allocation31_spill] sm:$0xff] }
 0x402   :  { %v5066_v56 = vpop.eup %5065  ;;  %2510 = vmatprep.subr.bf16.mxu0 %v6224_v40  ;;  %4621 = vmatprep.subr.bf16.mxu1 %v7233_v20 }
 0x403   :  { %v2319_v53 = vadd.f32 %v2317_v21, %v2315_v19  ;;  %v2316_v10 = vmul.f32 %v5066_v56, %v2280_v31  ;;  %v5068_v12 = vpop.eup %5067  ;;  %v7288_v21 = vld [vmem:[#allocation22_spill] sm:$0xff]  ;;  %v7289_v19 = vld [vmem:[#allocation33_spill] sm:$0xff] }
 0x404   :  { %v5070_v42 = vpop.eup %5069  ;;  %v2323_v11 = vsub.f32 1.0, %v5068_v12  ;;  %v2327_v34 = vmul.f32 %v5068_v12, %v6271_v24  ;;  %v7290_v31 = vld [vmem:[#allocation25_spill] sm:$0xff]  ;;  %v7291_v56 = vld [vmem:[#allocation34_spill] sm:$0xff] }
 0x405   :  { %5071 = vtanh.f32 %v2319_v53  ;;  %v2320_v14 = vadd.f32 %v2318_v17, %v2316_v10  ;;  %2511 = vmatpush1.bf16.msra.mxu0 %v6229_v36  ;;  %4622 = vmatpush3.bf16.msra.mxu1 %v6232_v38  ;;  %v2324_v18 = vsub.f32 1.0, %v5070_v42  ;;  %v2328_v62 = vmul.f32 %v5070_v42, %v6273_v45  ;;  %v7280_v45 = vld [vmem:[#allocation28_spill] sm:$0xff]  ;;  %v7292_v17 = vld [vmem:[#allocation35_spill] sm:$0xff]  ;;  %v7293_v53 = vld [vmem:[#allocation26_spill] sm:$0xff] }
 0x406   :  { %2512 = vmatprep.subr.bf16.mxu0 %v6235_v39  ;;  %4623 = vmatprep.subr.bf16.mxu1 %v7233_v20  ;;  %v7294_v10 = vld [vmem:[#allocation36_spill] sm:$0xff]  ;;  %v7296_v12 = vld [vmem:[#allocation77_spill] sm:$0xff] }
 0x407   :  { %5073 = vtanh.f32 %v2320_v14  ;;  %v7295_v14 = vld [vmem:[#allocation75_spill] sm:$0xff]  ;;  %v7297_v42 = vld [vmem:[#allocation73_spill] sm:$0xff] }
 0x409   :  { %2513 = vmatpush1.bf16.msra.mxu0 %v6239_v43  ;;  %4624 = vmatpush3.bf16.msra.mxu1 %v6242_v41 }
 0x40a   :  { %2514 = vmatprep.subr.bf16.mxu0 %v6245_v46  ;;  %4625 = vmatprep.subr.bf16.mxu1 %v7233_v20 }
 0x40d   :  { %2515 = vmatpush1.bf16.msra.mxu0 %v6249_v44  ;;  %4626 = vmatpush3.bf16.msra.mxu1 %v6252_v47 }
 0x40e   :  { %2516 = vmatprep.subr.bf16.mxu0 %v6255_v6  ;;  %4627 = vmatprep.subr.bf16.mxu1 %v7233_v20 }
 0x40f   :  { %v5072_v57 = vpop.eup %5071 }
 0x410   :  { %v2325_v9 = vmul.f32 %v5072_v57, %v2323_v11 }
 0x411   :  { %v5074_v35 = vpop.eup %5073  ;;  %2517 = vmatpush1.bf16.msra.mxu0 %v6260_v3  ;;  %4628 = vmatpush3.bf16.msra.mxu1 %v6263_v15 }
 0x412   :  { %2518 = vmatprep.subr.bf16.mxu0 %v6266_v22  ;;  %4629 = vmatprep.subr.bf16.mxu1 %v7233_v20  ;;  %v2326_v5 = vmul.f32 %v5074_v35, %v2324_v18  ;;  %v6422_v29 = vadd.f32 %v2327_v34, %v2325_v9  ;;  %v7298_v18 = vld [vmem:[#allocation41_spill] sm:$0xff] }
 0x413   :  { %v2456_v9 = vunpack.c.l.bf16 %v7298_v18 }
 0x414   :  { %v6424_v8 = vadd.f32 %v2328_v62, %v2326_v5  ;;  %v7299_v62 = vld [vmem:[#allocation42_spill] sm:$0xff] }
 0x415   :  { %2519 = vmatpush1.bf16.msra.mxu0 %v6275_v60  ;;  %4630 = vmatpush3.bf16.msra.mxu1 %v6278_v23 }
 0x416   :  { %v2349_v24 = vpack.c.bf16 %v6424_v8, %v6422_v29  ;;  %2671 = vmatprep.subr.bf16.mxu0 %v6105_v52  ;;  %4635 = vmatprep.subr.bf16.mxu1 %v7233_v20  ;;  %v7279_v52 = vld [vmem:[#allocation27_spill] sm:$0xff] }
 0x418   :  { %4184 = vst [vmem:[#allocation15 + $0x28] sm:$0xff] %v2349_v24   ;;  %2537 = vmatmul.mubr.bf16.vlgmr.msra.gmra.mrb[76].mxu0 %v2349_v24  ;;  %4632 = vmatmul.mubr.bf16.vlgmr.msra.gmra.mrb[76].mxu1 %v2349_v24  ;;  %v2472_v24 = vunpack.c.l.bf16 %v7299_v62 }
 0x419   :  { %2672 = vmatpush1.bf16.msra.mxu0 %v6285_v54  ;;  %4636 = vmatpush3.bf16.msra.mxu1 %v6110_v48  ;;  %v7281_v48 = vld [vmem:[#allocation79_spill] sm:$0xff] }
 0x41a   :  { %2673 = vmatprep.subr.bf16.mxu0 %v6289_v32  ;;  %4637 = vmatprep.subr.bf16.mxu1 %v7233_v20 }
 0x41b   :  { %2703 = vmatprep.mubr.bf16.mxu0 %v7234_v26  ;;  %4651 = vmatprep.mubr.msk.bf16.mxu1 %vm5548_vm0, %v7233_v20 }
 0x41d   :  { %2674 = vmatpush1.bf16.msra.mxu0 %v6296_v13  ;;  %4638 = vmatpush3.bf16.msra.mxu1 %v6119_v50  ;;  %v7286_v50 = vld [vmem:[#allocation32_spill] sm:$0xff] }
 0x41e   :  { %2675 = vmatprep.subr.bf16.mxu0 %v7279_v52  ;;  %4639 = vmatprep.subr.bf16.mxu1 %v7233_v20 }
 0x421   :  { %2676 = vmatpush1.bf16.msra.mxu0 %v7280_v45  ;;  %4640 = vmatpush3.bf16.msra.mxu1 %v7281_v48  ;;  %v7300_v48 = vld [vmem:[#allocation76_spill] sm:$0xff] }
 0x422   :  { %2677 = vmatprep.subr.bf16.mxu0 %v7282_v16  ;;  %4641 = vmatprep.subr.bf16.mxu1 %v7233_v20 }
 0x425   :  { %2678 = vmatpush1.bf16.msra.mxu0 %v7283_v63  ;;  %4642 = vmatpush3.bf16.msra.mxu1 %v7284_v25 }
 0x426   :  { %2679 = vmatprep.subr.bf16.mxu0 %v7285_v49  ;;  %4643 = vmatprep.subr.bf16.mxu1 %v7233_v20 }
 0x429   :  { %2680 = vmatpush1.bf16.msra.mxu0 %v7286_v50  ;;  %4644 = vmatpush3.bf16.msra.mxu1 %v7287_v58 }
 0x42a   :  { %2681 = vmatprep.subr.bf16.mxu0 %v7288_v21  ;;  %4645 = vmatprep.subr.bf16.mxu1 %v7233_v20 }
 0x42d   :  { %2682 = vmatpush1.bf16.msra.mxu0 %v7289_v19  ;;  %4646 = vmatpush3.bf16.msra.mxu1 %v7290_v31 }
 0x42e   :  { %2683 = vmatprep.subr.bf16.mxu0 %v7291_v56  ;;  %4647 = vmatprep.subr.bf16.mxu1 %v7233_v20 }
 0x431   :  { %2684 = vmatpush1.bf16.msra.mxu0 %v7292_v17  ;;  %4648 = vmatpush3.bf16.msra.mxu1 %v7293_v53  ;;  %v2457_v53 = vunpack.c.h.bf16 %v7298_v18  ;;  %v2473_v17 = vunpack.c.h.bf16 %v7299_v62 }
 0x432   :  { %2685 = vmatprep.subr.bf16.mxu0 %v7294_v10  ;;  %4649 = vmatprep.subr.bf16.mxu1 %v7233_v20 }
 0x435   :  { %2686 = vmatpush1.bf16.msra.mxu0 %v7295_v14  ;;  %4650 = vmatpush3.bf16.msra.mxu1 %v7296_v12 }
 0x436   :  { %2803 = vmatprep.subr.bf16.mxu0 %v7297_v42  ;;  %4655 = vmatprep.subr.bf16.mxu1 %v7233_v20 }
 0x4cb   :  { %v2406_v11 = vpop.f32.mrb[72].mxu0  ;;  %v2449_v57 = vpop.f32.mrb[72].mxu1 }
 0x4cc   :  { %v2407_v34 = vadd.f32 %v2406_v11, %v7253_v7  ;;  %v2408_v35 = vpop.f32.mrb[73].mxu0  ;;  %v4613_v5 = vpop.f32.mrb[73].mxu1 }
 0x4cd   :  { %v2409_v25 = vadd.f32 %v2408_v35, %v7300_v48  ;;  %v2410_v58 = vpop.f32.mrb[74].mxu0  ;;  %v2452_v31 = vpop.f32.mrb[74].mxu1 }
 0x4ce   :  { %v2458_v12 = vadd.f32 %v2456_v9, %v2407_v34  ;;  %v2411_v42 = vadd.f32 %v2410_v58, %v7253_v7  ;;  %v2412_v14 = vpop.f32.mrb[75].mxu0  ;;  %v4614_v10 = vpop.f32.mrb[75].mxu1 }
 0x4cf   :  { %v2474_v56 = vadd.f32 %v2472_v24, %v2409_v25  ;;  %v2413_v11 = vadd.f32 %v2412_v14, %v7300_v48  ;;  %v7301_v14 = vld [vmem:[#allocation78_spill] sm:$0xff] }
 0x4d0   :  { %v4063_v19 = vmul.f32 -1.442695, %v2458_v12  ;;  %v2459_v5 = vadd.f32 %v2457_v53, %v2411_v42  ;;  %v2450_v12 = vadd.f32 %v2449_v57, %v7301_v14  ;;  %v7303_v53 = vld [vmem:[#allocation67_spill] sm:$0xff] }
 0x4d1   :  { %v2475_v21 = vadd.f32 %v2473_v17, %v2413_v11  ;;  %v4065_v35 = vmul.f32 -1.442695, %v2474_v56  ;;  %v2588_v11 = vunpack.c.l.bf16 %v7303_v53 }
 0x4d2   :  { %5075 = vpow2.f32 %v4063_v19  ;;  %v4064_v50 = vmul.f32 -1.442695, %v2459_v5  ;;  %v7302_v19 = vld [vmem:[#allocation39_spill] sm:$0xff] }
 0x4d3   :  { %v4066_v49 = vmul.f32 -1.442695, %v2475_v21  ;;  %v2490_v58 = vunpack.c.l.bf16 %v7302_v19  ;;  %v2453_v21 = vadd.f32 %v2452_v31, %v7301_v14  ;;  %v2491_v56 = vunpack.c.h.bf16 %v7302_v19 }
 0x4d4   :  { %5077 = vpow2.f32 %v4064_v50 }
 0x4d5   :  { %5079 = vpow2.f32 %v4065_v35 }
 0x4d6   :  { %5081 = vpow2.f32 %v4066_v49 }
 0x4dc   :  { %v5076_v18 = vpop.eup %5075 }
 0x4dd   :  { %v2466_v9 = vadd.f32 1.0, %v5076_v18 }
 0x4de   :  { %v5078_v34 = vpop.eup %5077 }
 0x4df   :  { %5083 = vrcp.f32 %v2466_v9  ;;  %v2467_v10 = vadd.f32 1.0, %v5078_v34  ;;  %v5080_v62 = vpop.eup %5079 }
 0x4e0   :  { %v5082_v24 = vpop.eup %5081  ;;  %v2482_v25 = vadd.f32 1.0, %v5080_v62  ;;  %v2589_v62 = vunpack.c.h.bf16 %v7303_v53 }
 0x4e1   :  { %5085 = vrcp.f32 %v2467_v10  ;;  %v2483_v42 = vadd.f32 1.0, %v5082_v24  ;;  %v7304_v24 = vld [vmem:[#allocation68_spill] sm:$0xff] }
 0x4e2   :  { %5087 = vrcp.f32 %v2482_v25  ;;  %v2604_v25 = vunpack.c.l.bf16 %v7304_v24 }
 0x4e3   :  { %5089 = vrcp.f32 %v2483_v42  ;;  %v2605_v42 = vunpack.c.h.bf16 %v7304_v24 }
 0x4e9   :  { %v5084_v17 = vpop.eup %5083 }
 0x4ea   :  { %v2488_v50 = vmul.f32 %v5084_v17, %v2450_v12 }
 0x4eb   :  { %v5086_v49 = vpop.eup %5085  ;;  %v2538_v5 = vpop.f32.mrb[76].mxu0 }
 0x4ec   :  { %v6480_v35 = vpop.f32.mrb[76].mxu1  ;;  %v2492_v18 = vadd.f32 %v2490_v58, %v2488_v50  ;;  %v2489_v9 = vmul.f32 %v5086_v49, %v2453_v21  ;;  %v2539_v57 = vadd.f32 %v2538_v5, %v6035_v51  ;;  %v2540_v34 = vpop.f32.mrb[77].mxu0 }
 0x4ed   :  { %v4633_v10 = vpop.f32.mrb[77].mxu1  ;;  %v2541_v31 = vadd.f32 %v2540_v34, %v6038_v59  ;;  %v2542_v12 = vpop.f32.mrb[78].mxu0 }
 0x4ee   :  { %v2584_v17 = vpop.f32.mrb[78].mxu1  ;;  %5091 = vtanh.f32 %v2492_v18  ;;  %v2493_v19 = vadd.f32 %v2491_v56, %v2489_v9  ;;  %v2590_v14 = vadd.f32 %v2588_v11, %v2539_v57  ;;  %v2543_v48 = vadd.f32 %v2542_v12, %v6035_v51  ;;  %v2544_v58 = vpop.f32.mrb[79].mxu0 }
 0x4ef   :  { %v4634_v50 = vpop.f32.mrb[79].mxu1  ;;  %v2606_v21 = vadd.f32 %v2604_v25, %v2541_v31  ;;  %v2545_v49 = vadd.f32 %v2544_v58, %v6038_v59  ;;  %v5088_v7 = vpop.eup %5087 }
 0x4f0   :  { %5093 = vtanh.f32 %v2493_v19  ;;  %v4067_v53 = vmul.f32 -1.442695, %v2590_v14  ;;  %v2591_v5 = vadd.f32 %v2589_v62, %v2543_v48  ;;  %v5090_v56 = vpop.eup %5089  ;;  %v2496_v9 = vsub.f32 1.0, %v5088_v7 }
 0x4f1   :  { %v2607_v10 = vadd.f32 %v2605_v42, %v2545_v49  ;;  %v4069_v18 = vmul.f32 -1.442695, %v2606_v21  ;;  %v2497_v12 = vsub.f32 1.0, %v5090_v56  ;;  %v2500_v24 = vmul.f32 %v5088_v7, %v6378_v61 }
 0x4f2   :  { %5095 = vpow2.f32 %v4067_v53  ;;  %v4068_v34 = vmul.f32 -1.442695, %v2591_v5  ;;  %v2501_v48 = vmul.f32 %v5090_v56, %v6380_v37  ;;  %v7305_v53 = vld [vmem:[#allocation70_spill] sm:$0xff]  ;;  %v7317_v56 = vld [vmem:[#allocation36_spill] sm:$0xff] }
 0x4f3   :  { %v4070_v11 = vmul.f32 -1.442695, %v2607_v10  ;;  %v2622_v5 = vunpack.c.l.bf16 %v7305_v53 }
 0x4f4   :  { %5097 = vpow2.f32 %v4068_v34  ;;  %v2585_v34 = vadd.f32 %v2584_v17, %v6060_v27  ;;  %v6587_v17 = vld [vmem:[#allocation13 + $0x98] ss:$12 sps:$4 sm:$0xff]  }
 0x4f5   :  { %5099 = vpow2.f32 %v4069_v18  ;;  %7316 = vst [vmem:[#allocation72_spill] sm:$0xff] %v6587_v17 }
 0x4f6   :  { %5101 = vpow2.f32 %v4070_v11  ;;  %v7318_v11 = vld [vmem:[#allocation75_spill] sm:$0xff] }
 0x4f8   :  { %v5092_v57 = vpop.eup %5091 }
 0x4f9   :  { %v2498_v50 = vmul.f32 %v5092_v57, %v2496_v9  ;;  %v7319_v9 = vld [vmem:[#allocation77_spill] sm:$0xff] }
 0x4fa   :  { %v5094_v25 = vpop.eup %5093  ;;  %v7320_v57 = vld [vmem:[#allocation73_spill] sm:$0xff] }
 0x4fb   :  { %v2499_v31 = vmul.f32 %v5094_v25, %v2497_v12  ;;  %v6491_v14 = vadd.f32 %v2500_v24, %v2498_v50  ;;  %v7321_v24 = vld [vmem:[#allocation45_spill] sm:$0xff] }
 0x4fc   :  { %v5096_v62 = vpop.eup %5095  ;;  %v2755_v25 = vunpack.c.l.bf16 %v7321_v24 }
 0x4fd   :  { %v2598_v19 = vadd.f32 1.0, %v5096_v62  ;;  %v6493_v58 = vadd.f32 %v2501_v48, %v2499_v31  ;;  %v7322_v31 = vld [vmem:[#allocation74_spill] sm:$0xff] }
 0x4fe   :  { %v5098_v42 = vpop.eup %5097 }
 0x4ff   :  { %5103 = vrcp.f32 %v2598_v19  ;;  %v2599_v21 = vadd.f32 1.0, %v5098_v42  ;;  %v2643_v49 = vpack.c.bf16 %v6493_v58, %v6491_v14  ;;  %v5100_v7 = vpop.eup %5099  ;;  %v7323_v42 = vld [vmem:[#allocation46_spill] sm:$0xff] }
 0x500   :  { %v5102_v61 = vpop.eup %5101  ;;  %v2614_v37 = vadd.f32 1.0, %v5100_v7 }
 0x501   :  { %5105 = vrcp.f32 %v2599_v21  ;;  %4189 = vst [vmem:[#allocation14 + $0x18] sm:$0xff] %v2643_v49   ;;  %2704 = vmatmul.mubr.bf16.vlgmr.msra.gmra.mrb[80].mxu0 %v2643_v49  ;;  %4652 = vmatmul.mubr.bf16.vlgmr.msra.gmra.mrb[80].mxu1 %v2643_v49  ;;  %v2771_v21 = vunpack.c.l.bf16 %v7323_v42  ;;  %v7324_v49 = vld [vmem:[#allocation76_spill] sm:$0xff] }
 0x502   :  { %2804 = vmatpush1.bf16.msra.mxu0 %v6190_v30  ;;  %4656 = vmatpush3.bf16.msra.mxu1 %v6193_v4  ;;  %v2582_v30 = vadd.f32 %v6480_v35, %v6060_v27  ;;  %v2615_v4 = vadd.f32 1.0, %v5102_v61  ;;  %5107 = vrcp.f32 %v2614_v37 }
 0x503   :  { %2805 = vmatprep.subr.bf16.mxu0 %v6196_v55  ;;  %4657 = vmatprep.subr.bf16.mxu1 %v7233_v20 }
 0x504   :  { %2835 = vmatprep.mubr.bf16.mxu0 %v7234_v26  ;;  %4671 = vmatprep.mubr.msk.bf16.mxu1 %vm5548_vm0, %v7233_v20  ;;  %5109 = vrcp.f32 %v2615_v4 }
 0x506   :  { %2806 = vmatpush1.bf16.msra.mxu0 %v6203_v2  ;;  %4658 = vmatpush3.bf16.msra.mxu1 %v6206_v1  ;;  %v2623_v1 = vunpack.c.h.bf16 %v7305_v53 }
 0x507   :  { %2807 = vmatprep.subr.bf16.mxu0 %v6209_v28  ;;  %4659 = vmatprep.subr.bf16.mxu1 %v7233_v20 }
 0x509   :  { %v5104_v55 = vpop.eup %5103 }
 0x50a   :  { %v2620_v10 = vmul.f32 %v5104_v55, %v2582_v30  ;;  %2808 = vmatpush1.bf16.msra.mxu0 %v6218_v0  ;;  %4660 = vmatpush3.bf16.msra.mxu1 %v6221_v33  ;;  %v2756_v30 = vunpack.c.h.bf16 %v7321_v24 }
 0x50b   :  { %v5106_v2 = vpop.eup %5105  ;;  %2809 = vmatprep.subr.bf16.mxu0 %v6224_v40  ;;  %4661 = vmatprep.subr.bf16.mxu1 %v7233_v20 }
 0x50c   :  { %v2624_v28 = vadd.f32 %v2622_v5, %v2620_v10  ;;  %v2621_v35 = vmul.f32 %v5106_v2, %v2585_v34  ;;  %v5108_v0 = vpop.eup %5107  ;;  %v2772_v10 = vunpack.c.h.bf16 %v7323_v42 }
 0x50d   :  { %v2628_v40 = vsub.f32 1.0, %v5108_v0 }
 0x50e   :  { %5111 = vtanh.f32 %v2624_v28  ;;  %v2625_v18 = vadd.f32 %v2623_v1, %v2621_v35  ;;  %2810 = vmatpush1.bf16.msra.mxu0 %v6229_v36  ;;  %4662 = vmatpush3.bf16.msra.mxu1 %v6232_v38  ;;  %v5110_v33 = vpop.eup %5109 }
 0x50f   :  { %2811 = vmatprep.subr.bf16.mxu0 %v6235_v39  ;;  %4663 = vmatprep.subr.bf16.mxu1 %v7233_v20  ;;  %v2629_v38 = vsub.f32 1.0, %v5110_v33 }
 0x510   :  { %5113 = vtanh.f32 %v2625_v18 }
 0x512   :  { %2812 = vmatpush1.bf16.msra.mxu0 %v6239_v43  ;;  %4664 = vmatpush3.bf16.msra.mxu1 %v6242_v41  ;;  %v2632_v43 = vmul.f32 %v5108_v0, %v6422_v29  ;;  %v6543_v29 = vld [vmem:[#allocation13 + $0x4] ss:$12 sps:$4 sm:$0xff]  }
 0x513   :  { %2813 = vmatprep.subr.bf16.mxu0 %v6245_v46  ;;  %4665 = vmatprep.subr.bf16.mxu1 %v7233_v20 }
 0x516   :  { %2814 = vmatpush1.bf16.msra.mxu0 %v6249_v44  ;;  %4666 = vmatpush3.bf16.msra.mxu1 %v6252_v47  ;;  %v2633_v44 = vmul.f32 %v5110_v33, %v6424_v8  ;;  %v7311_v8 = vld [vmem:[#allocation22_spill] sm:$0xff] }
 0x517   :  { %2815 = vmatprep.subr.bf16.mxu0 %v6255_v6  ;;  %4667 = vmatprep.subr.bf16.mxu1 %v7233_v20 }
 0x518   :  { %v5112_v36 = vpop.eup %5111 }
 0x519   :  { %v2630_v39 = vmul.f32 %v5112_v36, %v2628_v40 }
 0x51a   :  { %v5114_v41 = vpop.eup %5113  ;;  %2816 = vmatpush1.bf16.msra.mxu0 %v6260_v3  ;;  %4668 = vmatpush3.bf16.msra.mxu1 %v6263_v15  ;;  %v6548_v15 = vld [vmem:[#allocation13 + $0x8] ss:$12 sps:$4 sm:$0xff]  }
 0x51b   :  { %2817 = vmatprep.subr.bf16.mxu0 %v6266_v22  ;;  %4669 = vmatprep.subr.bf16.mxu1 %v7233_v20  ;;  %v2631_v46 = vmul.f32 %v5114_v41, %v2629_v38  ;;  %v6535_v47 = vadd.f32 %v2632_v43, %v2630_v39  ;;  %v6557_v22 = vld [vmem:[#allocation13 + $0x20] ss:$12 sps:$4 sm:$0xff]  }
 0x51d   :  { %v6537_v6 = vadd.f32 %v2633_v44, %v2631_v46  ;;  %v7325_v44 = vld [vmem:[#allocation78_spill] sm:$0xff] }
 0x51e   :  { %2818 = vmatpush1.bf16.msra.mxu0 %v6275_v60  ;;  %4670 = vmatpush3.bf16.msra.mxu1 %v6278_v23  ;;  %v6563_v60 = vld [vmem:[#allocation13 + $0x38] ss:$12 sps:$4 sm:$0xff]   ;;  %v6569_v23 = vld [vmem:[#allocation13 + $0x50] ss:$12 sps:$4 sm:$0xff]  }
 0x51f   :  { %v2654_v3 = vpack.c.bf16 %v6537_v6, %v6535_v47  ;;  %2970 = vmatprep.subr.bf16.mxu0 %v6543_v29  ;;  %4675 = vmatprep.subr.bf16.mxu1 %v7233_v20  ;;  %7306 = vst [vmem:[#allocation37_spill] sm:$0xff] %v6563_v60  ;;  %7307 = vst [vmem:[#allocation38_spill] sm:$0xff] %v6569_v23 }
 0x521   :  { %4194 = vst [vmem:[#allocation15 + $0x20] sm:$0xff] %v2654_v3   ;;  %2836 = vmatmul.mubr.bf16.vlgmr.msra.gmra.mrb[84].mxu0 %v2654_v3  ;;  %4672 = vmatmul.mubr.bf16.vlgmr.msra.gmra.mrb[84].mxu1 %v2654_v3 }
 0x522   :  { %2971 = vmatpush1.bf16.msra.mxu0 %v6285_v54  ;;  %4676 = vmatpush3.bf16.msra.mxu1 %v6548_v15  ;;  %v7308_v54 = vld [vmem:[#allocation31_spill] sm:$0xff] }
 0x523   :  { %2972 = vmatprep.subr.bf16.mxu0 %v6289_v32  ;;  %4677 = vmatprep.subr.bf16.mxu1 %v7233_v20  ;;  %v7309_v32 = vld [vmem:[#allocation32_spill] sm:$0xff] }
 0x524   :  { %3002 = vmatprep.mubr.bf16.mxu0 %v7234_v26  ;;  %4691 = vmatprep.mubr.msk.bf16.mxu1 %vm5548_vm0, %v7233_v20 }
 0x526   :  { %2973 = vmatpush1.bf16.msra.mxu0 %v6296_v13  ;;  %4678 = vmatpush3.bf16.msra.mxu1 %v6557_v22  ;;  %v6575_v13 = vld [vmem:[#allocation13 + $0x68] ss:$12 sps:$4 sm:$0xff]  }
 0x527   :  { %2974 = vmatprep.subr.bf16.mxu0 %v7279_v52  ;;  %4679 = vmatprep.subr.bf16.mxu1 %v7233_v20  ;;  %7310 = vst [vmem:[#allocation40_spill] sm:$0xff] %v6575_v13  ;;  %v7312_v52 = vld [vmem:[#allocation33_spill] sm:$0xff] }
 0x52a   :  { %2975 = vmatpush1.bf16.msra.mxu0 %v7280_v45  ;;  %4680 = vmatpush3.bf16.msra.mxu1 %v6563_v60  ;;  %v6581_v45 = vld [vmem:[#allocation13 + $0x80] ss:$12 sps:$4 sm:$0xff]  }
 0x52b   :  { %2976 = vmatprep.subr.bf16.mxu0 %v7282_v16  ;;  %4681 = vmatprep.subr.bf16.mxu1 %v7233_v20  ;;  %7313 = vst [vmem:[#allocation71_spill] sm:$0xff] %v6581_v45  ;;  %v7314_v16 = vld [vmem:[#allocation34_spill] sm:$0xff] }
 0x52e   :  { %2977 = vmatpush1.bf16.msra.mxu0 %v7283_v63  ;;  %4682 = vmatpush3.bf16.msra.mxu1 %v6569_v23  ;;  %v7315_v63 = vld [vmem:[#allocation35_spill] sm:$0xff] }
 0x52f   :  { %2978 = vmatprep.subr.bf16.mxu0 %v7308_v54  ;;  %4683 = vmatprep.subr.bf16.mxu1 %v7233_v20 }
 0x532   :  { %2979 = vmatpush1.bf16.msra.mxu0 %v7309_v32  ;;  %4684 = vmatpush3.bf16.msra.mxu1 %v6575_v13 }
 0x533   :  { %2980 = vmatprep.subr.bf16.mxu0 %v7311_v8  ;;  %4685 = vmatprep.subr.bf16.mxu1 %v7233_v20  ;;  %v7326_v8 = vld [vmem:[#allocation44_spill] sm:$0xff] }
 0x536   :  { %2981 = vmatpush1.bf16.msra.mxu0 %v7312_v52  ;;  %4686 = vmatpush3.bf16.msra.mxu1 %v6581_v45  ;;  %v2789_v52 = vunpack.c.l.bf16 %v7326_v8 }
 0x537   :  { %2982 = vmatprep.subr.bf16.mxu0 %v7314_v16  ;;  %4687 = vmatprep.subr.bf16.mxu1 %v7233_v20 }
 0x53a   :  { %2983 = vmatpush1.bf16.msra.mxu0 %v7315_v63  ;;  %4688 = vmatpush3.bf16.msra.mxu1 %v6587_v17 }
 0x53b   :  { %2984 = vmatprep.subr.bf16.mxu0 %v7317_v56  ;;  %4689 = vmatprep.subr.bf16.mxu1 %v7233_v20 }
 0x53e   :  { %2985 = vmatpush1.bf16.msra.mxu0 %v7318_v11  ;;  %4690 = vmatpush3.bf16.msra.mxu1 %v7319_v9  ;;  %v2790_v11 = vunpack.c.h.bf16 %v7326_v8  ;;  %v7327_v9 = vld [vmem:[#allocation63_spill] sm:$0xff] }
 0x53f   :  { %3102 = vmatprep.subr.bf16.mxu0 %v7320_v57  ;;  %4695 = vmatprep.subr.bf16.mxu1 %v7233_v20  ;;  %v2887_v57 = vunpack.c.l.bf16 %v7327_v9  ;;  %v2888_v42 = vunpack.c.h.bf16 %v7327_v9 }
 0x5d4   :  { %v2705_v12 = vpop.f32.mrb[80].mxu0  ;;  %v2748_v50 = vpop.f32.mrb[80].mxu1 }
 0x5d5   :  { %v2706_v48 = vadd.f32 %v2705_v12, %v7322_v31  ;;  %v2707_v62 = vpop.f32.mrb[81].mxu0  ;;  %v4653_v19 = vpop.f32.mrb[81].mxu1  ;;  %v2749_v3 = vadd.f32 %v2748_v50, %v7325_v44 }
 0x5d6   :  { %v2708_v7 = vadd.f32 %v2707_v62, %v7324_v49  ;;  %v2709_v61 = vpop.f32.mrb[82].mxu0  ;;  %v2751_v37 = vpop.f32.mrb[82].mxu1 }
 0x5d7   :  { %v2757_v4 = vadd.f32 %v2755_v25, %v2706_v48  ;;  %v2710_v55 = vadd.f32 %v2709_v61, %v7322_v31  ;;  %v2711_v53 = vpop.f32.mrb[83].mxu0  ;;  %v4654_v5 = vpop.f32.mrb[83].mxu1  ;;  %v2752_v63 = vadd.f32 %v2751_v37, %v7325_v44 }
 0x5d8   :  { %v2773_v34 = vadd.f32 %v2771_v21, %v2708_v7  ;;  %v2712_v2 = vadd.f32 %v2711_v53, %v7324_v49  ;;  %v7328_v21 = vld [vmem:[#allocation64_spill] sm:$0xff] }
 0x5d9   :  { %v4075_v1 = vmul.f32 -1.442695, %v2757_v4  ;;  %v2758_v28 = vadd.f32 %v2756_v30, %v2710_v55  ;;  %v2903_v7 = vunpack.c.l.bf16 %v7328_v21 }
 0x5da   :  { %v2774_v35 = vadd.f32 %v2772_v10, %v2712_v2  ;;  %v4077_v0 = vmul.f32 -1.442695, %v2773_v34  ;;  %v2904_v34 = vunpack.c.h.bf16 %v7328_v21 }
 0x5db   :  { %5115 = vpow2.f32 %v4075_v1  ;;  %v4076_v18 = vmul.f32 -1.442695, %v2758_v28 }
 0x5dc   :  { %v4078_v33 = vmul.f32 -1.442695, %v2774_v35 }
 0x5dd   :  { %5117 = vpow2.f32 %v4076_v18 }
 0x5de   :  { %5119 = vpow2.f32 %v4077_v0 }
 0x5df   :  { %5121 = vpow2.f32 %v4078_v33 }
 0x5e5   :  { %v5116_v40 = vpop.eup %5115 }
 0x5e6   :  { %v2765_v36 = vadd.f32 1.0, %v5116_v40 }
 0x5e7   :  { %v5118_v38 = vpop.eup %5117 }
 0x5e8   :  { %5123 = vrcp.f32 %v2765_v36  ;;  %v2766_v39 = vadd.f32 1.0, %v5118_v38  ;;  %v5120_v43 = vpop.eup %5119 }
 0x5e9   :  { %v5122_v41 = vpop.eup %5121  ;;  %v2781_v46 = vadd.f32 1.0, %v5120_v43 }
 0x5ea   :  { %5125 = vrcp.f32 %v2766_v39  ;;  %v2782_v54 = vadd.f32 1.0, %v5122_v41 }
 0x5eb   :  { %5127 = vrcp.f32 %v2781_v46 }
 0x5ec   :  { %5129 = vrcp.f32 %v2782_v54 }
 0x5f2   :  { %v5124_v32 = vpop.eup %5123 }
 0x5f3   :  { %v2787_v16 = vmul.f32 %v5124_v32, %v2749_v3 }
 0x5f4   :  { %v5126_v56 = vpop.eup %5125  ;;  %v2837_v12 = vpop.f32.mrb[84].mxu0 }
 0x5f5   :  { %v6609_v24 = vpop.f32.mrb[84].mxu1  ;;  %v2791_v25 = vadd.f32 %v2789_v52, %v2787_v16  ;;  %v2788_v48 = vmul.f32 %v5126_v56, %v2752_v63  ;;  %v2838_v50 = vadd.f32 %v2837_v12, %v6035_v51  ;;  %v2839_v62 = vpop.f32.mrb[85].mxu0 }
 0x5f6   :  { %v4673_v19 = vpop.f32.mrb[85].mxu1  ;;  %v2840_v61 = vadd.f32 %v2839_v62, %v6038_v59  ;;  %v2841_v37 = vpop.f32.mrb[86].mxu0  ;;  %v6641_v62 = vld [vmem:[#allocation13 + $0xd8] ss:$12 sps:$4 sm:$0xff]   ;;  %v2881_v21 = vadd.f32 %v6609_v24, %v6060_v27 }
 0x5f7   :  { %v6615_v30 = vpop.f32.mrb[86].mxu1  ;;  %5131 = vtanh.f32 %v2791_v25  ;;  %v2792_v4 = vadd.f32 %v2790_v11, %v2788_v48  ;;  %v2889_v55 = vadd.f32 %v2887_v57, %v2838_v50  ;;  %v2842_v53 = vadd.f32 %v2841_v37, %v6035_v51  ;;  %v2843_v5 = vpop.f32.mrb[87].mxu0  ;;  %v6634_v25 = vld [vmem:[#allocation13 + $0xdc] ss:$12 sps:$4 sm:$0xff]   ;;  %v6644_v19 = vld [vmem:[#allocation13 + $0xe0] ss:$12 sps:$4 sm:$0xff]  }
 0x5f8   :  { %v4674_v10 = vpop.f32.mrb[87].mxu1  ;;  %v2905_v2 = vadd.f32 %v2903_v7, %v2840_v61  ;;  %v2844_v1 = vadd.f32 %v2843_v5, %v6038_v59  ;;  %v5128_v33 = vpop.eup %5127  ;;  %v7329_v37 = vld [vmem:[#allocation65_spill] sm:$0xff] }
 0x5f9   :  { %5133 = vtanh.f32 %v2792_v4  ;;  %v4079_v28 = vmul.f32 -1.442695, %v2889_v55  ;;  %v2890_v35 = vadd.f32 %v2888_v42, %v2842_v53  ;;  %v5130_v36 = vpop.eup %5129  ;;  %v2795_v39 = vsub.f32 1.0, %v5128_v33  ;;  %v6647_v42 = vld [vmem:[#allocation13 + $0xf4] ss:$12 sps:$4 sm:$0xff]  }
 0x5fa   :  { %v2906_v18 = vadd.f32 %v2904_v34, %v2844_v1  ;;  %v4081_v40 = vmul.f32 -1.442695, %v2905_v2  ;;  %v2796_v41 = vsub.f32 1.0, %v5130_v36  ;;  %v2799_v3 = vmul.f32 %v5128_v33, %v6491_v14  ;;  %v6628_v14 = vld [vmem:[#allocation13 + $0xc0] ss:$12 sps:$4 sm:$0xff]  }
 0x5fb   :  { %5135 = vpow2.f32 %v4079_v28  ;;  %v4080_v0 = vmul.f32 -1.442695, %v2890_v35  ;;  %v2800_v8 = vmul.f32 %v5130_v36, %v6493_v58  ;;  %v6631_v58 = vld [vmem:[#allocation13 + $0xc8] ss:$12 sps:$4 sm:$0xff]   ;;  %v2921_v4 = vunpack.c.l.bf16 %v7329_v37  ;;  %v6656_v5 = vld [vmem:[#allocation13 + $0xf0] ss:$12 sps:$4 sm:$0xff]  }
 0x5fc   :  { %v4082_v38 = vmul.f32 -1.442695, %v2906_v18  ;;  %v2884_v53 = vadd.f32 %v6615_v30, %v6060_v27  ;;  %v6659_v10 = vld [vmem:[#allocation13 + $0xf8] ss:$12 sps:$4 sm:$0xff]   ;;  %v2922_v24 = vunpack.c.h.bf16 %v7329_v37  ;;  %v6667_v35 = vld [vmem:[#allocation13 + $0x108] ss:$12 sps:$4 sm:$0xff]  }
 0x5fd   :  { %5137 = vpow2.f32 %v4080_v0  ;;  %v6662_v2 = vld [vmem:[#allocation13 + $0x10c] ss:$12 sps:$4 sm:$0xff]   ;;  %v6670_v18 = vld [vmem:[#allocation13 + $0x110] ss:$12 sps:$4 sm:$0xff]  }
 0x5fe   :  { %5139 = vpow2.f32 %v4081_v40  ;;  %v6673_v0 = vld [vmem:[#allocation13 + $0x124] ss:$12 sps:$4 sm:$0xff]   ;;  %v6677_v33 = vld [vmem:[#allocation13 + $0x120] ss:$12 sps:$4 sm:$0xff]   ;;  %v6680_v40 = vld [vmem:[#allocation13 + $0x128] ss:$12 sps:$4 sm:$0xff]  }
 0x5ff   :  { %5141 = vpow2.f32 %v4082_v38  ;;  %v6683_v36 = vld [vmem:[#allocation13 + $0x13c] ss:$12 sps:$4 sm:$0xff]  }
 0x600   :  { %v6727_v37 = vld [vmem:[#allocation13 + $0x1c] ss:$12 sps:$4 sm:$0xff]  }
 0x601   :  { %v5132_v43 = vpop.eup %5131 }
 0x602   :  { %v2797_v46 = vmul.f32 %v5132_v43, %v2795_v39  ;;  %v6687_v43 = vld [vmem:[#allocation13 + $0x138] ss:$12 sps:$4 sm:$0xff]  }
 0x603   :  { %v5134_v54 = vpop.eup %5133 }
 0x604   :  { %v2798_v32 = vmul.f32 %v5134_v54, %v2796_v41  ;;  %v6622_v52 = vadd.f32 %v2799_v3, %v2797_v46  ;;  %v6690_v41 = vld [vmem:[#allocation13 + $0x140] ss:$12 sps:$4 sm:$0xff]  }
 0x605   :  { %v5136_v16 = vpop.eup %5135  ;;  %v6693_v46 = vld [vmem:[#allocation13 + $0x154] ss:$12 sps:$4 sm:$0xff]  }
 0x606   :  { %v2897_v63 = vadd.f32 1.0, %v5136_v16  ;;  %v6624_v56 = vadd.f32 %v2800_v8, %v2798_v32 }
 0x607   :  { %v5138_v11 = vpop.eup %5137 }
 0x608   :  { %5143 = vrcp.f32 %v2897_v63  ;;  %v2898_v9 = vadd.f32 1.0, %v5138_v11  ;;  %v2942_v57 = vpack.c.bf16 %v6624_v56, %v6622_v52  ;;  %v5140_v12 = vpop.eup %5139  ;;  %v6698_v11 = vld [vmem:[#allocation13 + $0x150] ss:$12 sps:$4 sm:$0xff]  }
 0x609   :  { %v5142_v48 = vpop.eup %5141  ;;  %v2913_v50 = vadd.f32 1.0, %v5140_v12 }
 0x60a   :  { %5145 = vrcp.f32 %v2898_v9  ;;  %4199 = vst [vmem:[#allocation14 + $0x20] sm:$0xff] %v2942_v57   ;;  %3003 = vmatmul.mubr.bf16.vlgmr.msra.gmra.mrb[88].mxu0 %v2942_v57  ;;  %4692 = vmatmul.mubr.bf16.vlgmr.msra.gmra.mrb[88].mxu1 %v2942_v57  ;;  %v2914_v7 = vadd.f32 1.0, %v5142_v48  ;;  %v6701_v9 = vld [vmem:[#allocation13 + $0x158] ss:$12 sps:$4 sm:$0xff]  }
 0x60b   :  { %3103 = vmatpush1.bf16.msra.mxu0 %v6628_v14  ;;  %4696 = vmatpush3.bf16.msra.mxu1 %v6631_v58  ;;  %5147 = vrcp.f32 %v2913_v50  ;;  %v6704_v57 = vld [vmem:[#allocation13 + $0x16c] ss:$12 sps:$4 sm:$0xff]  }
 0x60c   :  { %3104 = vmatprep.subr.bf16.mxu0 %v6634_v25  ;;  %4697 = vmatprep.subr.bf16.mxu1 %v7233_v20  ;;  %5149 = vrcp.f32 %v2914_v7  ;;  %v6716_v7 = vld [vmem:[#allocation13 + $0x170] ss:$12 sps:$4 sm:$0xff]  }
 0x60d   :  { %3134 = vmatprep.mubr.bf16.mxu0 %v7234_v26  ;;  %4711 = vmatprep.mubr.msk.bf16.mxu1 %vm5548_vm0, %v7233_v20 }
 0x60f   :  { %3105 = vmatpush1.bf16.msra.mxu0 %v6641_v62  ;;  %4698 = vmatpush3.bf16.msra.mxu1 %v6644_v19 }
 0x610   :  { %3106 = vmatprep.subr.bf16.mxu0 %v6647_v42  ;;  %4699 = vmatprep.subr.bf16.mxu1 %v7233_v20 }
 0x612   :  { %v5144_v61 = vpop.eup %5143 }
 0x613   :  { %v2919_v55 = vmul.f32 %v5144_v61, %v2881_v21  ;;  %3107 = vmatpush1.bf16.msra.mxu0 %v6656_v5  ;;  %4700 = vmatpush3.bf16.msra.mxu1 %v6659_v10  ;;  %v6713_v21 = vld [vmem:[#allocation13 + $0x168] ss:$12 sps:$4 sm:$0xff]  }
 0x614   :  { %v5146_v34 = vpop.eup %5145  ;;  %3108 = vmatprep.subr.bf16.mxu0 %v6662_v2  ;;  %4701 = vmatprep.subr.bf16.mxu1 %v7233_v20 }
 0x615   :  { %v2923_v1 = vadd.f32 %v2921_v4, %v2919_v55  ;;  %v2920_v28 = vmul.f32 %v5146_v34, %v2884_v53  ;;  %v5148_v38 = vpop.eup %5147  ;;  %v6734_v4 = vld [vmem:[#allocation13 + $0x18] ss:$12 sps:$4 sm:$0xff]   ;;  %v6738_v55 = vld [vmem:[#allocation13 + $0x34] ss:$12 sps:$4 sm:$0xff]   ;;  %v6742_v53 = vld [vmem:[#allocation13 + $0x30] ss:$12 sps:$4 sm:$0xff]  }
 0x616   :  { %v5150_v39 = vpop.eup %5149  ;;  %v2927_v3 = vsub.f32 1.0, %v5148_v38  ;;  %v2931_v16 = vmul.f32 %v5148_v38, %v6535_v47  ;;  %7330 = vst [vmem:[#allocation69_spill] sm:$0xff] %v6738_v55  ;;  %7331 = vst [vmem:[#allocation27_spill] sm:$0xff] %v6742_v53  ;;  %v6746_v34 = vld [vmem:[#allocation13 + $0x4c] ss:$12 sps:$4 sm:$0xff]  }
 0x617   :  { %5151 = vtanh.f32 %v2923_v1  ;;  %v2924_v30 = vadd.f32 %v2922_v24, %v2920_v28  ;;  %3109 = vmatpush1.bf16.msra.mxu0 %v6667_v35  ;;  %4702 = vmatpush3.bf16.msra.mxu1 %v6670_v18  ;;  %v2928_v32 = vsub.f32 1.0, %v5150_v39  ;;  %v2932_v48 = vmul.f32 %v5150_v39, %v6537_v6  ;;  %v6723_v6 = vld [vmem:[#allocation13] ss:$12 sps:$4 sm:$0xff]   ;;  %7332 = vst [vmem:[#allocation28_spill] sm:$0xff] %v6746_v34  ;;  %v6750_v24 = vld [vmem:[#allocation13 + $0x48] ss:$12 sps:$4 sm:$0xff]  }
 0x618   :  { %3110 = vmatprep.subr.bf16.mxu0 %v6673_v0  ;;  %4703 = vmatprep.subr.bf16.mxu1 %v7233_v20  ;;  %7333 = vst [vmem:[#allocation79_spill] sm:$0xff] %v6750_v24  ;;  %v6754_v1 = vld [vmem:[#allocation13 + $0x64] ss:$12 sps:$4 sm:$0xff]   ;;  %v6758_v28 = vld [vmem:[#allocation13 + $0x60] ss:$12 sps:$4 sm:$0xff]  }
 0x619   :  { %5153 = vtanh.f32 %v2924_v30  ;;  %7334 = vst [vmem:[#allocation29_spill] sm:$0xff] %v6754_v1  ;;  %7335 = vst [vmem:[#allocation30_spill] sm:$0xff] %v6758_v28  ;;  %v6762_v30 = vld [vmem:[#allocation13 + $0x7c] ss:$12 sps:$4 sm:$0xff]   ;;  %v6766_v38 = vld [vmem:[#allocation13 + $0x78] ss:$12 sps:$4 sm:$0xff]  }
 0x61a   :  { %7336 = vst [vmem:[#allocation23_spill] sm:$0xff] %v6762_v30  ;;  %7337 = vst [vmem:[#allocation24_spill] sm:$0xff] %v6766_v38  ;;  %v6770_v39 = vld [vmem:[#allocation13 + $0x94] ss:$12 sps:$4 sm:$0xff]  }
 0x61b   :  { %3111 = vmatpush1.bf16.msra.mxu0 %v6677_v33  ;;  %4704 = vmatpush3.bf16.msra.mxu1 %v6680_v40  ;;  %7338 = vst [vmem:[#allocation25_spill] sm:$0xff] %v6770_v39 }
 0x61c   :  { %3112 = vmatprep.subr.bf16.mxu0 %v6683_v36  ;;  %4705 = vmatprep.subr.bf16.mxu1 %v7233_v20 }
 0x61f   :  { %3113 = vmatpush1.bf16.msra.mxu0 %v6687_v43  ;;  %4706 = vmatpush3.bf16.msra.mxu1 %v6690_v41 }
 0x620   :  { %3114 = vmatprep.subr.bf16.mxu0 %v6693_v46  ;;  %4707 = vmatprep.subr.bf16.mxu1 %v7233_v20 }
 0x621   :  { %v5152_v54 = vpop.eup %5151 }
 0x622   :  { %v2929_v8 = vmul.f32 %v5152_v54, %v2927_v3  ;;  %v6774_v3 = vld [vmem:[#allocation13 + $0x90] ss:$12 sps:$4 sm:$0xff]   ;;  %v6778_v54 = vld [vmem:[#allocation13 + $0xac] ss:$12 sps:$4 sm:$0xff]  }
 0x623   :  { %v5154_v63 = vpop.eup %5153  ;;  %3115 = vmatpush1.bf16.msra.mxu0 %v6698_v11  ;;  %4708 = vmatpush3.bf16.msra.mxu1 %v6701_v9  ;;  %7339 = vst [vmem:[#allocation26_spill] sm:$0xff] %v6774_v3  ;;  %7340 = vst [vmem:[#allocation41_spill] sm:$0xff] %v6778_v54 }
 0x624   :  { %3116 = vmatprep.subr.bf16.mxu0 %v6704_v57  ;;  %4709 = vmatprep.subr.bf16.mxu1 %v7233_v20  ;;  %v2930_v12 = vmul.f32 %v5154_v63, %v2928_v32  ;;  %v6709_v50 = vadd.f32 %v2931_v16, %v2929_v8  ;;  %v6782_v32 = vld [vmem:[#allocation13 + $0xa8] ss:$12 sps:$4 sm:$0xff]   ;;  %v6785_v8 = vld [vmem:[#allocation13 + $0xb0] ss:$12 sps:$4 sm:$0xff]  }
 0x625   :  { %7341 = vst [vmem:[#allocation42_spill] sm:$0xff] %v6782_v32  ;;  %7342 = vst [vmem:[#allocation39_spill] sm:$0xff] %v6785_v8  ;;  %v6788_v16 = vld [vmem:[#allocation13 + $0xc4] ss:$12 sps:$4 sm:$0xff]  }
 0x626   :  { %v6711_v47 = vadd.f32 %v2932_v48, %v2930_v12  ;;  %7343 = vst [vmem:[#allocation67_spill] sm:$0xff] %v6788_v16  ;;  %v7344_v48 = vld [vmem:[#allocation49_spill] sm:$0xff] }
 0x627   :  { %3117 = vmatpush1.bf16.msra.mxu0 %v6713_v21  ;;  %4710 = vmatpush3.bf16.msra.mxu1 %v6716_v7 }
 0x628   :  { %v2953_v61 = vpack.c.bf16 %v6711_v47, %v6709_v50  ;;  %3269 = vmatprep.subr.bf16.mxu0 %v6543_v29  ;;  %4715 = vmatprep.subr.bf16.mxu1 %v7233_v20 }
 0x62a   :  { %4204 = vst [vmem:[#allocation15 + $0x18] sm:$0xff] %v2953_v61   ;;  %3135 = vmatmul.mubr.bf16.vlgmr.msra.gmra.mrb[92].mxu0 %v2953_v61  ;;  %4712 = vmatmul.mubr.bf16.vlgmr.msra.gmra.mrb[92].mxu1 %v2953_v61  ;;  %v3054_v61 = vunpack.c.l.bf16 %v7344_v48 }
 0x62b   :  { %3270 = vmatpush1.bf16.msra.mxu0 %v6723_v6  ;;  %4716 = vmatpush3.bf16.msra.mxu1 %v6548_v15 }
 0x62c   :  { %3271 = vmatprep.subr.bf16.mxu0 %v6727_v37  ;;  %4717 = vmatprep.subr.bf16.mxu1 %v7233_v20 }
 0x62d   :  { %3301 = vmatprep.mubr.bf16.mxu0 %v7234_v26  ;;  %4731 = vmatprep.mubr.msk.bf16.mxu1 %vm5548_vm0, %v7233_v20 }
 0x62f   :  { %3272 = vmatpush1.bf16.msra.mxu0 %v6734_v4  ;;  %4718 = vmatpush3.bf16.msra.mxu1 %v6557_v22 }
 0x630   :  { %3273 = vmatprep.subr.bf16.mxu0 %v6738_v55  ;;  %4719 = vmatprep.subr.bf16.mxu1 %v7233_v20 }
 0x633   :  { %3274 = vmatpush1.bf16.msra.mxu0 %v6742_v53  ;;  %4720 = vmatpush3.bf16.msra.mxu1 %v6563_v60 }
 0x634   :  { %3275 = vmatprep.subr.bf16.mxu0 %v6746_v34  ;;  %4721 = vmatprep.subr.bf16.mxu1 %v7233_v20 }
 0x637   :  { %3276 = vmatpush1.bf16.msra.mxu0 %v6750_v24  ;;  %4722 = vmatpush3.bf16.msra.mxu1 %v6569_v23 }
 0x638   :  { %3277 = vmatprep.subr.bf16.mxu0 %v6754_v1  ;;  %4723 = vmatprep.subr.bf16.mxu1 %v7233_v20 }
 0x63b   :  { %3278 = vmatpush1.bf16.msra.mxu0 %v6758_v28  ;;  %4724 = vmatpush3.bf16.msra.mxu1 %v6575_v13 }
 0x63c   :  { %3279 = vmatprep.subr.bf16.mxu0 %v6762_v30  ;;  %4725 = vmatprep.subr.bf16.mxu1 %v7233_v20  ;;  %v3055_v30 = vunpack.c.h.bf16 %v7344_v48 }
 0x63f   :  { %3280 = vmatpush1.bf16.msra.mxu0 %v6766_v38  ;;  %4726 = vmatpush3.bf16.msra.mxu1 %v6581_v45 }
 0x640   :  { %3281 = vmatprep.subr.bf16.mxu0 %v6770_v39  ;;  %4727 = vmatprep.subr.bf16.mxu1 %v7233_v20  ;;  %v7345_v39 = vld [vmem:[#allocation50_spill] sm:$0xff] }
 0x641   :  { %v3071_v23 = vunpack.c.h.bf16 %v7345_v39 }
 0x643   :  { %3282 = vmatpush1.bf16.msra.mxu0 %v6774_v3  ;;  %4728 = vmatpush3.bf16.msra.mxu1 %v6587_v17 }
 0x644   :  { %3283 = vmatprep.subr.bf16.mxu0 %v6778_v54  ;;  %4729 = vmatprep.subr.bf16.mxu1 %v7233_v20 }
 0x647   :  { %3284 = vmatpush1.bf16.msra.mxu0 %v6782_v32  ;;  %4730 = vmatpush3.bf16.msra.mxu1 %v6785_v8  ;;  %v3070_v32 = vunpack.c.l.bf16 %v7345_v39 }
 0x648   :  { %3401 = vmatprep.subr.bf16.mxu0 %v6788_v16  ;;  %4735 = vmatprep.subr.bf16.mxu1 %v7233_v20 }
 0x6dd   :  { %v3004_v63 = vpop.f32.mrb[88].mxu0  ;;  %v3047_v12 = vpop.f32.mrb[88].mxu1 }
 0x6de   :  { %v3005_v54 = vadd.f32 %v3004_v63, %v7322_v31  ;;  %v3006_v17 = vpop.f32.mrb[89].mxu0  ;;  %v4693_v3 = vpop.f32.mrb[89].mxu1 }
 0x6df   :  { %v3007_v45 = vadd.f32 %v3006_v17, %v7324_v49  ;;  %v3008_v38 = vpop.f32.mrb[90].mxu0  ;;  %v3050_v8 = vpop.f32.mrb[90].mxu1 }
 0x6e0   :  { %v3056_v13 = vadd.f32 %v3054_v61, %v3005_v54  ;;  %v3009_v16 = vadd.f32 %v3008_v38, %v7322_v31  ;;  %v3010_v28 = vpop.f32.mrb[91].mxu0  ;;  %v4694_v1 = vpop.f32.mrb[91].mxu1 }
 0x6e1   :  { %v3072_v24 = vadd.f32 %v3070_v32, %v3007_v45  ;;  %v3011_v63 = vadd.f32 %v3010_v28, %v7324_v49 }
 0x6e2   :  { %v4087_v34 = vmul.f32 -1.442695, %v3056_v13  ;;  %v3057_v3 = vadd.f32 %v3055_v30, %v3009_v16  ;;  %v3048_v13 = vadd.f32 %v3047_v12, %v7325_v44  ;;  %v7347_v16 = vld [vmem:[#allocation59_spill] sm:$0xff] }
 0x6e3   :  { %v3073_v60 = vadd.f32 %v3071_v23, %v3011_v63  ;;  %v4089_v17 = vmul.f32 -1.442695, %v3072_v24  ;;  %v3186_v61 = vunpack.c.l.bf16 %v7347_v16 }
 0x6e4   :  { %5155 = vpow2.f32 %v4087_v34  ;;  %v4088_v53 = vmul.f32 -1.442695, %v3057_v3  ;;  %v7346_v34 = vld [vmem:[#allocation43_spill] sm:$0xff] }
 0x6e5   :  { %v4090_v55 = vmul.f32 -1.442695, %v3073_v60  ;;  %v3088_v30 = vunpack.c.l.bf16 %v7346_v34  ;;  %v3051_v60 = vadd.f32 %v3050_v8, %v7325_v44  ;;  %v3089_v24 = vunpack.c.h.bf16 %v7346_v34 }
 0x6e6   :  { %5157 = vpow2.f32 %v4088_v53 }
 0x6e7   :  { %5159 = vpow2.f32 %v4089_v17 }
 0x6e8   :  { %5161 = vpow2.f32 %v4090_v55 }
 0x6ee   :  { %v5156_v54 = vpop.eup %5155 }
 0x6ef   :  { %v3064_v48 = vadd.f32 1.0, %v5156_v54 }
 0x6f0   :  { %v5158_v38 = vpop.eup %5157 }
 0x6f1   :  { %5163 = vrcp.f32 %v3064_v48  ;;  %v3065_v1 = vadd.f32 1.0, %v5158_v38  ;;  %v5160_v39 = vpop.eup %5159 }
 0x6f2   :  { %v5162_v45 = vpop.eup %5161  ;;  %v3080_v32 = vadd.f32 1.0, %v5160_v39  ;;  %v7348_v39 = vld [vmem:[#allocation60_spill] sm:$0xff] }
 0x6f3   :  { %5165 = vrcp.f32 %v3065_v1  ;;  %v3081_v28 = vadd.f32 1.0, %v5162_v45  ;;  %v3187_v1 = vunpack.c.h.bf16 %v7347_v16  ;;  %v3202_v45 = vunpack.c.l.bf16 %v7348_v39 }
 0x6f4   :  { %5167 = vrcp.f32 %v3080_v32 }
 0x6f5   :  { %5169 = vrcp.f32 %v3081_v28  ;;  %v3203_v28 = vunpack.c.h.bf16 %v7348_v39 }
 0x6fb   :  { %v5164_v23 = vpop.eup %5163 }
 0x6fc   :  { %v3086_v53 = vmul.f32 %v5164_v23, %v3048_v13 }
 0x6fd   :  { %v5166_v55 = vpop.eup %5165  ;;  %v3136_v63 = vpop.f32.mrb[92].mxu0 }
 0x6fe   :  { %v6805_v3 = vpop.f32.mrb[92].mxu1  ;;  %v3090_v17 = vadd.f32 %v3088_v30, %v3086_v53  ;;  %v3087_v54 = vmul.f32 %v5166_v55, %v3051_v60  ;;  %v3137_v12 = vadd.f32 %v3136_v63, %v6035_v51  ;;  %v3138_v48 = vpop.f32.mrb[93].mxu0 }
 0x6ff   :  { %v4713_v38 = vpop.f32.mrb[93].mxu1  ;;  %v3139_v8 = vadd.f32 %v3138_v48, %v6038_v59  ;;  %v3140_v32 = vpop.f32.mrb[94].mxu0 }
 0x700   :  { %v3182_v13 = vpop.f32.mrb[94].mxu1  ;;  %5171 = vtanh.f32 %v3090_v17  ;;  %v3091_v23 = vadd.f32 %v3089_v24, %v3087_v54  ;;  %v3188_v34 = vadd.f32 %v3186_v61, %v3137_v12  ;;  %v3141_v44 = vadd.f32 %v3140_v32, %v6035_v51  ;;  %v3142_v30 = vpop.f32.mrb[95].mxu0 }
 0x701   :  { %v4714_v53 = vpop.f32.mrb[95].mxu1  ;;  %v3204_v60 = vadd.f32 %v3202_v45, %v3139_v8  ;;  %v3143_v55 = vadd.f32 %v3142_v30, %v6038_v59  ;;  %v5168_v49 = vpop.eup %5167 }
 0x702   :  { %5173 = vtanh.f32 %v3091_v23  ;;  %v4091_v16 = vmul.f32 -1.442695, %v3188_v34  ;;  %v3189_v63 = vadd.f32 %v3187_v1, %v3141_v44  ;;  %v5170_v24 = vpop.eup %5169  ;;  %v3094_v54 = vsub.f32 1.0, %v5168_v49 }
 0x703   :  { %v3205_v38 = vadd.f32 %v3203_v28, %v3143_v55  ;;  %v4093_v17 = vmul.f32 -1.442695, %v3204_v60  ;;  %v3095_v32 = vsub.f32 1.0, %v5170_v24  ;;  %v3098_v39 = vmul.f32 %v5168_v49, %v6622_v52 }
 0x704   :  { %5175 = vpow2.f32 %v4091_v16  ;;  %v4092_v48 = vmul.f32 -1.442695, %v3189_v63  ;;  %v3099_v44 = vmul.f32 %v5170_v24, %v6624_v56  ;;  %v3180_v16 = vadd.f32 %v6805_v3, %v6060_v27 }
 0x705   :  { %v4094_v61 = vmul.f32 -1.442695, %v3205_v38 }
 0x706   :  { %5177 = vpow2.f32 %v4092_v48  ;;  %v7349_v48 = vld [vmem:[#allocation66_spill] sm:$0xff] }
 0x707   :  { %5179 = vpow2.f32 %v4093_v17  ;;  %v3220_v17 = vunpack.c.l.bf16 %v7349_v48 }
 0x708   :  { %5181 = vpow2.f32 %v4094_v61  ;;  %v3183_v61 = vadd.f32 %v3182_v13, %v6060_v27 }
 0x70a   :  { %v5172_v12 = vpop.eup %5171 }
 0x70b   :  { %v3096_v53 = vmul.f32 %v5172_v12, %v3094_v54  ;;  %v3221_v12 = vunpack.c.h.bf16 %v7349_v48  ;;  %v7361_v48 = vld [vmem:[#allocation71_spill] sm:$0xff] }
 0x70c   :  { %v5174_v45 = vpop.eup %5173 }
 0x70d   :  { %v3097_v8 = vmul.f32 %v5174_v45, %v3095_v32  ;;  %v6816_v1 = vadd.f32 %v3098_v39, %v3096_v53 }
 0x70e   :  { %v5176_v23 = vpop.eup %5175 }
 0x70f   :  { %v3196_v34 = vadd.f32 1.0, %v5176_v23  ;;  %v6818_v30 = vadd.f32 %v3099_v44, %v3097_v8 }
 0x710   :  { %v5178_v28 = vpop.eup %5177 }
 0x711   :  { %5183 = vrcp.f32 %v3196_v34  ;;  %v3197_v60 = vadd.f32 1.0, %v5178_v28  ;;  %v3241_v55 = vpack.c.bf16 %v6818_v30, %v6816_v1  ;;  %v5180_v49 = vpop.eup %5179 }
 0x712   :  { %v5182_v52 = vpop.eup %5181  ;;  %v3212_v56 = vadd.f32 1.0, %v5180_v49 }
 0x713   :  { %5185 = vrcp.f32 %v3197_v60  ;;  %4209 = vst [vmem:[#allocation14 + $0x28] sm:$0xff] %v3241_v55   ;;  %3302 = vmatmul.mubr.bf16.vlgmr.msra.gmra.mrb[96].mxu0 %v3241_v55  ;;  %4732 = vmatmul.mubr.bf16.vlgmr.msra.gmra.mrb[96].mxu1 %v3241_v55  ;;  %v3213_v63 = vadd.f32 1.0, %v5182_v52 }
 0x714   :  { %3402 = vmatpush1.bf16.msra.mxu0 %v6628_v14  ;;  %4736 = vmatpush3.bf16.msra.mxu1 %v6631_v58  ;;  %5187 = vrcp.f32 %v3212_v56  ;;  %v7355_v56 = vld [vmem:[#allocation38_spill] sm:$0xff] }
 0x715   :  { %3403 = vmatprep.subr.bf16.mxu0 %v6634_v25  ;;  %4737 = vmatprep.subr.bf16.mxu1 %v7233_v20  ;;  %5189 = vrcp.f32 %v3213_v63  ;;  %v7359_v63 = vld [vmem:[#allocation23_spill] sm:$0xff] }
 0x716   :  { %3433 = vmatprep.mubr.bf16.mxu0 %v7234_v26  ;;  %4751 = vmatprep.mubr.msk.bf16.mxu1 %vm5548_vm0, %v7233_v20 }
 0x718   :  { %3404 = vmatpush1.bf16.msra.mxu0 %v6641_v62  ;;  %4738 = vmatpush3.bf16.msra.mxu1 %v6644_v19 }
 0x719   :  { %3405 = vmatprep.subr.bf16.mxu0 %v6647_v42  ;;  %4739 = vmatprep.subr.bf16.mxu1 %v7233_v20 }
 0x71b   :  { %v5184_v38 = vpop.eup %5183 }
 0x71c   :  { %v3218_v24 = vmul.f32 %v5184_v38, %v3180_v16  ;;  %3406 = vmatpush1.bf16.msra.mxu0 %v6656_v5  ;;  %4740 = vmatpush3.bf16.msra.mxu1 %v6659_v10  ;;  %v7356_v16 = vld [vmem:[#allocation29_spill] sm:$0xff]  ;;  %v7360_v38 = vld [vmem:[#allocation24_spill] sm:$0xff] }
 0x71d   :  { %v5186_v54 = vpop.eup %5185  ;;  %3407 = vmatprep.subr.bf16.mxu0 %v6662_v2  ;;  %4741 = vmatprep.subr.bf16.mxu1 %v7233_v20 }
 0x71e   :  { %v3222_v3 = vadd.f32 %v3220_v17, %v3218_v24  ;;  %v3219_v32 = vmul.f32 %v5186_v54, %v3183_v61  ;;  %v5188_v13 = vpop.eup %5187  ;;  %v7362_v17 = vld [vmem:[#allocation25_spill] sm:$0xff]  ;;  %v7363_v24 = vld [vmem:[#allocation26_spill] sm:$0xff]  ;;  %v7364_v61 = vld [vmem:[#allocation72_spill] sm:$0xff] }
 0x71f   :  { %v5190_v39 = vpop.eup %5189  ;;  %v3226_v45 = vsub.f32 1.0, %v5188_v13  ;;  %v3230_v34 = vmul.f32 %v5188_v13, %v6709_v50  ;;  %v7365_v54 = vld [vmem:[#allocation41_spill] sm:$0xff] }
 0x720   :  { %5191 = vtanh.f32 %v3222_v3  ;;  %v3223_v53 = vadd.f32 %v3221_v12, %v3219_v32  ;;  %3408 = vmatpush1.bf16.msra.mxu0 %v6667_v35  ;;  %4742 = vmatpush3.bf16.msra.mxu1 %v6670_v18  ;;  %v3227_v44 = vsub.f32 1.0, %v5190_v39  ;;  %v3231_v55 = vmul.f32 %v5190_v39, %v6711_v47  ;;  %v7351_v47 = vld [vmem:[#allocation27_spill] sm:$0xff]  ;;  %v7366_v12 = vld [vmem:[#allocation42_spill] sm:$0xff]  ;;  %v7369_v39 = vld [vmem:[#allocation53_spill] sm:$0xff] }
 0x721   :  { %3409 = vmatprep.subr.bf16.mxu0 %v6673_v0  ;;  %4743 = vmatprep.subr.bf16.mxu1 %v7233_v20  ;;  %v7367_v3 = vld [vmem:[#allocation39_spill] sm:$0xff] }
 0x722   :  { %5193 = vtanh.f32 %v3223_v53  ;;  %v7368_v32 = vld [vmem:[#allocation67_spill] sm:$0xff] }
 0x724   :  { %3410 = vmatpush1.bf16.msra.mxu0 %v6677_v33  ;;  %4744 = vmatpush3.bf16.msra.mxu1 %v6680_v40 }
 0x725   :  { %3411 = vmatprep.subr.bf16.mxu0 %v6683_v36  ;;  %4745 = vmatprep.subr.bf16.mxu1 %v7233_v20 }
 0x728   :  { %3412 = vmatpush1.bf16.msra.mxu0 %v6687_v43  ;;  %4746 = vmatpush3.bf16.msra.mxu1 %v6690_v41 }
 0x729   :  { %3413 = vmatprep.subr.bf16.mxu0 %v6693_v46  ;;  %4747 = vmatprep.subr.bf16.mxu1 %v7233_v20 }
 0x72a   :  { %v5192_v8 = vpop.eup %5191 }
 0x72b   :  { %v3228_v23 = vmul.f32 %v5192_v8, %v3226_v45  ;;  %v3353_v45 = vunpack.c.l.bf16 %v7369_v39 }
 0x72c   :  { %v5194_v28 = vpop.eup %5193  ;;  %3414 = vmatpush1.bf16.msra.mxu0 %v6698_v11  ;;  %4748 = vmatpush3.bf16.msra.mxu1 %v6701_v9 }
 0x72d   :  { %3415 = vmatprep.subr.bf16.mxu0 %v6704_v57  ;;  %4749 = vmatprep.subr.bf16.mxu1 %v7233_v20  ;;  %v3229_v60 = vmul.f32 %v5194_v28, %v3227_v44  ;;  %v6860_v49 = vadd.f32 %v3230_v34, %v3228_v23  ;;  %v7370_v34 = vld [vmem:[#allocation54_spill] sm:$0xff] }
 0x72e   :  { %v3369_v28 = vunpack.c.l.bf16 %v7370_v34 }
 0x72f   :  { %v6862_v52 = vadd.f32 %v3231_v55, %v3229_v60  ;;  %v7371_v60 = vld [vmem:[#allocation76_spill] sm:$0xff] }
 0x730   :  { %3416 = vmatpush1.bf16.msra.mxu0 %v6713_v21  ;;  %4750 = vmatpush3.bf16.msra.mxu1 %v6716_v7 }
 0x731   :  { %v3252_v50 = vpack.c.bf16 %v6862_v52, %v6860_v49  ;;  %3568 = vmatprep.subr.bf16.mxu0 %v6543_v29  ;;  %4755 = vmatprep.subr.bf16.mxu1 %v7233_v20  ;;  %v7350_v29 = vld [vmem:[#allocation69_spill] sm:$0xff] }
 0x733   :  { %4214 = vst [vmem:[#allocation15 + $0x10] sm:$0xff] %v3252_v50   ;;  %3434 = vmatmul.mubr.bf16.vlgmr.msra.gmra.mrb[100].mxu0 %v3252_v50  ;;  %4752 = vmatmul.mubr.bf16.vlgmr.msra.gmra.mrb[100].mxu1 %v3252_v50 }
 0x734   :  { %3569 = vmatpush1.bf16.msra.mxu0 %v6723_v6  ;;  %4756 = vmatpush3.bf16.msra.mxu1 %v6548_v15  ;;  %v7352_v15 = vld [vmem:[#allocation37_spill] sm:$0xff]  ;;  %v7353_v6 = vld [vmem:[#allocation28_spill] sm:$0xff] }
 0x735   :  { %3570 = vmatprep.subr.bf16.mxu0 %v6727_v37  ;;  %4757 = vmatprep.subr.bf16.mxu1 %v7233_v20  ;;  %v7354_v37 = vld [vmem:[#allocation79_spill] sm:$0xff] }
 0x736   :  { %3600 = vmatprep.mubr.bf16.mxu0 %v7234_v26  ;;  %4771 = vmatprep.mubr.msk.bf16.mxu1 %vm5548_vm0, %v7233_v20 }
 0x738   :  { %3571 = vmatpush1.bf16.msra.mxu0 %v6734_v4  ;;  %4758 = vmatpush3.bf16.msra.mxu1 %v6557_v22  ;;  %v7357_v22 = vld [vmem:[#allocation30_spill] sm:$0xff]  ;;  %v7358_v4 = vld [vmem:[#allocation40_spill] sm:$0xff] }
 0x739   :  { %3572 = vmatprep.subr.bf16.mxu0 %v7350_v29  ;;  %4759 = vmatprep.subr.bf16.mxu1 %v7233_v20 }
 0x73c   :  { %3573 = vmatpush1.bf16.msra.mxu0 %v7351_v47  ;;  %4760 = vmatpush3.bf16.msra.mxu1 %v7352_v15  ;;  %v3354_v47 = vunpack.c.h.bf16 %v7369_v39 }
 0x73d   :  { %3574 = vmatprep.subr.bf16.mxu0 %v7353_v6  ;;  %4761 = vmatprep.subr.bf16.mxu1 %v7233_v20 }
 0x740   :  { %3575 = vmatpush1.bf16.msra.mxu0 %v7354_v37  ;;  %4762 = vmatpush3.bf16.msra.mxu1 %v7355_v56 }
 0x741   :  { %3576 = vmatprep.subr.bf16.mxu0 %v7356_v16  ;;  %4763 = vmatprep.subr.bf16.mxu1 %v7233_v20  ;;  %v3370_v16 = vunpack.c.h.bf16 %v7370_v34 }
 0x744   :  { %3577 = vmatpush1.bf16.msra.mxu0 %v7357_v22  ;;  %4764 = vmatpush3.bf16.msra.mxu1 %v7358_v4 }
 0x745   :  { %3578 = vmatprep.subr.bf16.mxu0 %v7359_v63  ;;  %4765 = vmatprep.subr.bf16.mxu1 %v7233_v20 }
 0x748   :  { %3579 = vmatpush1.bf16.msra.mxu0 %v7360_v38  ;;  %4766 = vmatpush3.bf16.msra.mxu1 %v7361_v48 }
 0x749   :  { %3580 = vmatprep.subr.bf16.mxu0 %v7362_v17  ;;  %4767 = vmatprep.subr.bf16.mxu1 %v7233_v20 }
 0x74c   :  { %3581 = vmatpush1.bf16.msra.mxu0 %v7363_v24  ;;  %4768 = vmatpush3.bf16.msra.mxu1 %v7364_v61 }
 0x74d   :  { %3582 = vmatprep.subr.bf16.mxu0 %v7365_v54  ;;  %4769 = vmatprep.subr.bf16.mxu1 %v7233_v20 }
 0x750   :  { %3583 = vmatpush1.bf16.msra.mxu0 %v7366_v12  ;;  %4770 = vmatpush3.bf16.msra.mxu1 %v7367_v3 }
 0x751   :  { %3700 = vmatprep.subr.bf16.mxu0 %v7368_v32  ;;  %4775 = vmatprep.subr.bf16.mxu1 %v7233_v20 }
 0x7e6   :  { %v3303_v53 = vpop.f32.mrb[96].mxu0  ;;  %v3346_v13 = vpop.f32.mrb[96].mxu1 }
 0x7e7   :  { %v3304_v8 = vadd.f32 %v3303_v53, %v7322_v31  ;;  %v3305_v44 = vpop.f32.mrb[97].mxu0  ;;  %v4733_v23 = vpop.f32.mrb[97].mxu1 }
 0x7e8   :  { %v3306_v55 = vadd.f32 %v3305_v44, %v7371_v60  ;;  %v3307_v50 = vpop.f32.mrb[98].mxu0  ;;  %v3349_v29 = vpop.f32.mrb[98].mxu1 }
 0x7e9   :  { %v3355_v15 = vadd.f32 %v3353_v45, %v3304_v8  ;;  %v3308_v6 = vadd.f32 %v3307_v50, %v7322_v31  ;;  %v3309_v37 = vpop.f32.mrb[99].mxu0  ;;  %v4734_v56 = vpop.f32.mrb[99].mxu1  ;;  %v7372_v8 = vld [vmem:[#allocation78_spill] sm:$0xff] }
 0x7ea   :  { %v3371_v22 = vadd.f32 %v3369_v28, %v3306_v55  ;;  %v3310_v4 = vadd.f32 %v3309_v37, %v7371_v60  ;;  %v3347_v44 = vadd.f32 %v3346_v13, %v7372_v8  ;;  %v7373_v28 = vld [vmem:[#allocation48_spill] sm:$0xff]  ;;  %v7374_v37 = vld [vmem:[#allocation55_spill] sm:$0xff] }
 0x7eb   :  { %v4099_v63 = vmul.f32 -1.442695, %v3355_v15  ;;  %v3356_v38 = vadd.f32 %v3354_v47, %v3308_v6  ;;  %v3387_v55 = vunpack.c.l.bf16 %v7373_v28  ;;  %v3350_v47 = vadd.f32 %v3349_v29, %v7372_v8 }
 0x7ec   :  { %v3372_v48 = vadd.f32 %v3370_v16, %v3310_v4  ;;  %v4101_v24 = vmul.f32 -1.442695, %v3371_v22  ;;  %v3388_v6 = vunpack.c.h.bf16 %v7373_v28  ;;  %v3485_v56 = vunpack.c.l.bf16 %v7374_v37 }
 0x7ed   :  { %5195 = vpow2.f32 %v4099_v63  ;;  %v4100_v17 = vmul.f32 -1.442695, %v3356_v38 }
 0x7ee   :  { %v4102_v61 = vmul.f32 -1.442695, %v3372_v48 }
 0x7ef   :  { %5197 = vpow2.f32 %v4100_v17  ;;  %v3486_v17 = vunpack.c.h.bf16 %v7374_v37 }
 0x7f0   :  { %5199 = vpow2.f32 %v4101_v24  ;;  %v7375_v24 = vld [vmem:[#allocation56_spill] sm:$0xff] }
 0x7f1   :  { %5201 = vpow2.f32 %v4102_v61  ;;  %v3501_v61 = vunpack.c.l.bf16 %v7375_v24 }
 0x7f7   :  { %v5196_v54 = vpop.eup %5195 }
 0x7f8   :  { %v3363_v12 = vadd.f32 1.0, %v5196_v54 }
 0x7f9   :  { %v5198_v3 = vpop.eup %5197 }
 0x7fa   :  { %5203 = vrcp.f32 %v3363_v12  ;;  %v3364_v32 = vadd.f32 1.0, %v5198_v3  ;;  %v5200_v53 = vpop.eup %5199 }
 0x7fb   :  { %v5202_v39 = vpop.eup %5201  ;;  %v3379_v45 = vadd.f32 1.0, %v5200_v53 }
 0x7fc   :  { %5205 = vrcp.f32 %v3364_v32  ;;  %v3380_v23 = vadd.f32 1.0, %v5202_v39 }
 0x7fd   :  { %5207 = vrcp.f32 %v3379_v45 }
 0x7fe   :  { %5209 = vrcp.f32 %v3380_v23 }
 0x804   :  { %v5204_v34 = vpop.eup %5203 }
 0x805   :  { %v3385_v50 = vmul.f32 %v5204_v34, %v3347_v44  ;;  %v3502_v44 = vunpack.c.h.bf16 %v7375_v24 }
 0x806   :  { %v5206_v15 = vpop.eup %5205  ;;  %v3435_v16 = vpop.f32.mrb[100].mxu0 }
 0x807   :  { %v6918_v22 = vpop.f32.mrb[100].mxu1  ;;  %v3389_v4 = vadd.f32 %v3387_v55, %v3385_v50  ;;  %v3386_v63 = vmul.f32 %v5206_v15, %v3350_v47  ;;  %v3436_v13 = vadd.f32 %v3435_v16, %v6035_v51  ;;  %v3437_v38 = vpop.f32.mrb[101].mxu0 }
 0x808   :  { %v4753_v48 = vpop.f32.mrb[101].mxu1  ;;  %v3438_v29 = vadd.f32 %v3437_v38, %v6038_v59  ;;  %v3439_v54 = vpop.f32.mrb[102].mxu0 }
 0x809   :  { %v3481_v12 = vpop.f32.mrb[102].mxu1  ;;  %5211 = vtanh.f32 %v3389_v4  ;;  %v3390_v3 = vadd.f32 %v3388_v6, %v3386_v63  ;;  %v3487_v32 = vadd.f32 %v3485_v56, %v3436_v13  ;;  %v3440_v53 = vadd.f32 %v3439_v54, %v6035_v51  ;;  %v3441_v39 = vpop.f32.mrb[103].mxu0 }
 0x80a   :  { %v4754_v45 = vpop.f32.mrb[103].mxu1  ;;  %v3503_v23 = vadd.f32 %v3501_v61, %v3438_v29  ;;  %v3442_v34 = vadd.f32 %v3441_v39, %v6038_v59  ;;  %v5208_v15 = vpop.eup %5207 }
 0x80b   :  { %5213 = vtanh.f32 %v3390_v3  ;;  %v4103_v28 = vmul.f32 -1.442695, %v3487_v32  ;;  %v3488_v55 = vadd.f32 %v3486_v17, %v3440_v53  ;;  %v5210_v6 = vpop.eup %5209  ;;  %v3393_v16 = vsub.f32 1.0, %v5208_v15 }
 0x80c   :  { %v3504_v50 = vadd.f32 %v3502_v44, %v3442_v34  ;;  %v4105_v37 = vmul.f32 -1.442695, %v3503_v23  ;;  %v3394_v63 = vsub.f32 1.0, %v5210_v6  ;;  %v3397_v38 = vmul.f32 %v5208_v15, %v6816_v1  ;;  %v7376_v44 = vld [vmem:[#allocation61_spill] sm:$0xff] }
 0x80d   :  { %5215 = vpow2.f32 %v4103_v28  ;;  %v4104_v47 = vmul.f32 -1.442695, %v3488_v55  ;;  %v3398_v17 = vmul.f32 %v5210_v6, %v6818_v30  ;;  %v3482_v34 = vadd.f32 %v3481_v12, %v6060_v27 }
 0x80e   :  { %v4106_v56 = vmul.f32 -1.442695, %v3504_v50  ;;  %v7378_v50 = vld [vmem:[#allocation58_spill] sm:$0xff] }
 0x80f   :  { %5217 = vpow2.f32 %v4104_v47  ;;  %v3668_v47 = vunpack.c.l.bf16 %v7378_v50 }
 0x810   :  { %5219 = vpow2.f32 %v4105_v37 }
 0x811   :  { %5221 = vpow2.f32 %v4106_v56 }
 0x813   :  { %v5212_v4 = vpop.eup %5211 }
 0x814   :  { %v3395_v13 = vmul.f32 %v5212_v4, %v3393_v16 }
 0x815   :  { %v5214_v48 = vpop.eup %5213 }
 0x816   :  { %v3396_v24 = vmul.f32 %v5214_v48, %v3394_v63  ;;  %v6929_v61 = vadd.f32 %v3397_v38, %v3395_v13  ;;  %v3669_v63 = vunpack.c.h.bf16 %v7378_v50 }
 0x817   :  { %v5216_v29 = vpop.eup %5215 }
 0x818   :  { %v3495_v54 = vadd.f32 1.0, %v5216_v29  ;;  %v6931_v3 = vadd.f32 %v3398_v17, %v3396_v24 }
 0x819   :  { %v5218_v32 = vpop.eup %5217 }
 0x81a   :  { %5223 = vrcp.f32 %v3495_v54  ;;  %v3496_v53 = vadd.f32 1.0, %v5218_v32  ;;  %v3540_v39 = vpack.c.bf16 %v6931_v3, %v6929_v61  ;;  %v5220_v1 = vpop.eup %5219 }
 0x81b   :  { %v5222_v30 = vpop.eup %5221  ;;  %v3511_v45 = vadd.f32 1.0, %v5220_v1 }
 0x81c   :  { %5225 = vrcp.f32 %v3496_v53  ;;  %4219 = vst [vmem:[#allocation14 + $0x30] sm:$0xff] %v3540_v39   ;;  %3601 = vmatmul.mubr.bf16.vlgmr.msra.gmra.mrb[104].mxu0 %v3540_v39  ;;  %4772 = vmatmul.mubr.bf16.vlgmr.msra.gmra.mrb[104].mxu1 %v3540_v39 }
 0x81d   :  { %3701 = vmatpush1.bf16.msra.mxu0 %v6628_v14  ;;  %4776 = vmatpush3.bf16.msra.mxu1 %v6631_v58  ;;  %v3479_v14 = vadd.f32 %v6918_v22, %v6060_v27  ;;  %v3512_v58 = vadd.f32 1.0, %v5222_v30  ;;  %5227 = vrcp.f32 %v3511_v45 }
 0x81e   :  { %3702 = vmatprep.subr.bf16.mxu0 %v6634_v25  ;;  %4777 = vmatprep.subr.bf16.mxu1 %v7233_v20 }
 0x81f   :  { %3732 = vmatprep.mubr.bf16.mxu0 %v7234_v26  ;;  %4791 = vmatprep.mubr.msk.bf16.mxu1 %vm5548_vm0, %v7233_v20  ;;  %v3519_v26 = vunpack.c.l.bf16 %v7376_v44  ;;  %5229 = vrcp.f32 %v3512_v58 }
 0x821   :  { %3703 = vmatpush1.bf16.msra.mxu0 %v6641_v62  ;;  %4778 = vmatpush3.bf16.msra.mxu1 %v6644_v19  ;;  %v3520_v19 = vunpack.c.h.bf16 %v7376_v44  ;;  %v7379_v44 = vld [vmem:[#allocation47_spill] sm:$0xff] }
 0x822   :  { %3704 = vmatprep.subr.bf16.mxu0 %v6647_v42  ;;  %4779 = vmatprep.subr.bf16.mxu1 %v7233_v20 }
 0x824   :  { %v5224_v25 = vpop.eup %5223 }
 0x825   :  { %v3517_v23 = vmul.f32 %v5224_v25, %v3479_v14  ;;  %3705 = vmatpush1.bf16.msra.mxu0 %v6656_v5  ;;  %4780 = vmatpush3.bf16.msra.mxu1 %v6659_v10 }
 0x826   :  { %v5226_v62 = vpop.eup %5225  ;;  %3706 = vmatprep.subr.bf16.mxu0 %v6662_v2  ;;  %4781 = vmatprep.subr.bf16.mxu1 %v7233_v20 }
 0x827   :  { %v3521_v42 = vadd.f32 %v3519_v26, %v3517_v23  ;;  %v3518_v22 = vmul.f32 %v5226_v62, %v3482_v34  ;;  %v5228_v5 = vpop.eup %5227  ;;  %v3686_v26 = vunpack.c.l.bf16 %v7379_v44 }
 0x828   :  { %v3525_v2 = vsub.f32 1.0, %v5228_v5 }
 0x829   :  { %5231 = vtanh.f32 %v3521_v42  ;;  %v3522_v28 = vadd.f32 %v3520_v19, %v3518_v22  ;;  %3707 = vmatpush1.bf16.msra.mxu0 %v6667_v35  ;;  %4782 = vmatpush3.bf16.msra.mxu1 %v6670_v18  ;;  %v5230_v10 = vpop.eup %5229  ;;  %v3687_v19 = vunpack.c.h.bf16 %v7379_v44  ;;  %v7380_v42 = vld [vmem:[#allocation51_spill] sm:$0xff] }
 0x82a   :  { %3708 = vmatprep.subr.bf16.mxu0 %v6673_v0  ;;  %4783 = vmatprep.subr.bf16.mxu1 %v7233_v20  ;;  %v3526_v18 = vsub.f32 1.0, %v5230_v10  ;;  %v3784_v22 = vunpack.c.l.bf16 %v7380_v42 }
 0x82b   :  { %5233 = vtanh.f32 %v3522_v28 }
 0x82d   :  { %3709 = vmatpush1.bf16.msra.mxu0 %v6677_v33  ;;  %4784 = vmatpush3.bf16.msra.mxu1 %v6680_v40  ;;  %v3529_v33 = vmul.f32 %v5228_v5, %v6860_v49 }
 0x82e   :  { %3710 = vmatprep.subr.bf16.mxu0 %v6683_v36  ;;  %4785 = vmatprep.subr.bf16.mxu1 %v7233_v20 }
 0x831   :  { %3711 = vmatpush1.bf16.msra.mxu0 %v6687_v43  ;;  %4786 = vmatpush3.bf16.msra.mxu1 %v6690_v41  ;;  %v3530_v43 = vmul.f32 %v5230_v10, %v6862_v52 }
 0x832   :  { %3712 = vmatprep.subr.bf16.mxu0 %v6693_v46  ;;  %4787 = vmatprep.subr.bf16.mxu1 %v7233_v20 }
 0x833   :  { %v5232_v35 = vpop.eup %5231 }
 0x834   :  { %v3527_v0 = vmul.f32 %v5232_v35, %v3525_v2 }
 0x835   :  { %v5234_v40 = vpop.eup %5233  ;;  %3713 = vmatpush1.bf16.msra.mxu0 %v6698_v11  ;;  %4788 = vmatpush3.bf16.msra.mxu1 %v6701_v9 }
 0x836   :  { %3714 = vmatprep.subr.bf16.mxu0 %v6704_v57  ;;  %4789 = vmatprep.subr.bf16.mxu1 %v7233_v20  ;;  %v3528_v36 = vmul.f32 %v5234_v40, %v3526_v18  ;;  %v6973_v41 = vadd.f32 %v3529_v33, %v3527_v0  ;;  %v7377_v20 = vld [vmem:[#allocation57_spill] sm:$0xff]  ;;  %v3785_v33 = vunpack.c.h.bf16 %v7380_v42  ;;  %v7381_v40 = vld [vmem:[#allocation52_spill] sm:$0xff] }
 0x837   :  { %v3652_v49 = vunpack.c.l.bf16 %v7377_v20  ;;  %v3653_v37 = vunpack.c.h.bf16 %v7377_v20 }
 0x838   :  { %v6975_v46 = vadd.f32 %v3530_v43, %v3528_v36  ;;  %v3800_v36 = vunpack.c.l.bf16 %v7381_v40 }
 0x839   :  { %3715 = vmatpush1.bf16.msra.mxu0 %v6713_v21  ;;  %4790 = vmatpush3.bf16.msra.mxu1 %v6716_v7 }
 0x83a   :  { %v3551_v11 = vpack.c.bf16 %v6975_v46, %v6973_v41 }
 0x83c   :  { %4224 = vst [vmem:[#allocation15 + $0x8] sm:$0xff] %v3551_v11   ;;  %3733 = vmatmul.mubr.bf16.vlgmr.msra.gmra.mrb[108].mxu0 %v3551_v11  ;;  %4792 = vmatmul.mubr.bf16.vlgmr.msra.gmra.mrb[108].mxu1 %v3551_v11 }
 0x8ef   :  { %v3602_v9 = vpop.f32.mrb[104].mxu0  ;;  %v3645_v57 = vpop.f32.mrb[104].mxu1 }
 0x8f0   :  { %v3603_v52 = vadd.f32 %v3602_v9, %v7322_v31  ;;  %v3604_v12 = vpop.f32.mrb[105].mxu0  ;;  %v4773_v55 = vpop.f32.mrb[105].mxu1 }
 0x8f1   :  { %v3605_v21 = vadd.f32 %v3604_v12, %v7371_v60  ;;  %v3606_v15 = vpop.f32.mrb[106].mxu0  ;;  %v3648_v7 = vpop.f32.mrb[106].mxu1  ;;  %v3801_v12 = vunpack.c.h.bf16 %v7381_v40 }
 0x8f2   :  { %v3654_v6 = vadd.f32 %v3652_v49, %v3603_v52  ;;  %v3607_v56 = vadd.f32 %v3606_v15, %v7322_v31  ;;  %v3608_v16 = vpop.f32.mrb[107].mxu0  ;;  %v4774_v4 = vpop.f32.mrb[107].mxu1  ;;  %v3649_v34 = vadd.f32 %v3648_v7, %v7372_v8 }
 0x8f3   :  { %v3670_v13 = vadd.f32 %v3668_v47, %v3605_v21  ;;  %v3609_v38 = vadd.f32 %v3608_v16, %v7371_v60  ;;  %v3646_v60 = vadd.f32 %v3645_v57, %v7372_v8 }
 0x8f4   :  { %v4111_v48 = vmul.f32 -1.442695, %v3654_v6  ;;  %v3655_v24 = vadd.f32 %v3653_v37, %v3607_v56 }
 0x8f5   :  { %v3671_v17 = vadd.f32 %v3669_v63, %v3609_v38  ;;  %v4113_v54 = vmul.f32 -1.442695, %v3670_v13 }
 0x8f6   :  { %5235 = vpow2.f32 %v4111_v48  ;;  %v4112_v29 = vmul.f32 -1.442695, %v3655_v24 }
 0x8f7   :  { %v4114_v32 = vmul.f32 -1.442695, %v3671_v17 }
 0x8f8   :  { %5237 = vpow2.f32 %v4112_v29 }
 0x8f9   :  { %5239 = vpow2.f32 %v4113_v54 }
 0x8fa   :  { %5241 = vpow2.f32 %v4114_v32 }
 0x900   :  { %v5236_v53 = vpop.eup %5235 }
 0x901   :  { %v3662_v39 = vadd.f32 1.0, %v5236_v53 }
 0x902   :  { %v5238_v31 = vpop.eup %5237 }
 0x903   :  { %5243 = vrcp.f32 %v3662_v39  ;;  %v3663_v1 = vadd.f32 1.0, %v5238_v31  ;;  %v5240_v30 = vpop.eup %5239 }
 0x904   :  { %v5242_v45 = vpop.eup %5241  ;;  %v3678_v14 = vadd.f32 1.0, %v5240_v30 }
 0x905   :  { %5245 = vrcp.f32 %v3663_v1  ;;  %v3679_v58 = vadd.f32 1.0, %v5242_v45 }
 0x906   :  { %5247 = vrcp.f32 %v3678_v14 }
 0x907   :  { %5249 = vrcp.f32 %v3679_v58 }
 0x90d   :  { %v5244_v25 = vpop.eup %5243 }
 0x90e   :  { %v3684_v23 = vmul.f32 %v5244_v25, %v3646_v60 }
 0x90f   :  { %v5246_v62 = vpop.eup %5245  ;;  %v3734_v28 = vpop.f32.mrb[108].mxu0 }
 0x910   :  { %v6994_v5 = vpop.f32.mrb[108].mxu1  ;;  %v3688_v10 = vadd.f32 %v3686_v26, %v3684_v23  ;;  %v3685_v2 = vmul.f32 %v5246_v62, %v3649_v34  ;;  %v3735_v35 = vadd.f32 %v3734_v28, %v6035_v51  ;;  %v3736_v18 = vpop.f32.mrb[109].mxu0 }
 0x911   :  { %v4793_v0 = vpop.f32.mrb[109].mxu1  ;;  %v3737_v8 = vadd.f32 %v3736_v18, %v6038_v59  ;;  %v3738_v43 = vpop.f32.mrb[110].mxu0 }
 0x912   :  { %v7000_v11 = vpop.f32.mrb[110].mxu1  ;;  %5251 = vtanh.f32 %v3688_v10  ;;  %v3689_v9 = vadd.f32 %v3687_v19, %v3685_v2  ;;  %v3786_v57 = vadd.f32 %v3784_v22, %v3735_v35  ;;  %v3739_v20 = vadd.f32 %v3738_v43, %v6035_v51  ;;  %v3740_v49 = vpop.f32.mrb[111].mxu0 }
 0x913   :  { %v4794_v52 = vpop.f32.mrb[111].mxu1  ;;  %v3802_v55 = vadd.f32 %v3800_v36, %v3737_v8  ;;  %v3741_v50 = vadd.f32 %v3740_v49, %v6038_v59  ;;  %v5248_v37 = vpop.eup %5247 }
 0x914   :  { %5253 = vtanh.f32 %v3689_v9  ;;  %v4115_v47 = vmul.f32 -1.442695, %v3786_v57  ;;  %v3787_v21 = vadd.f32 %v3785_v33, %v3739_v20  ;;  %v5250_v56 = vpop.eup %5249  ;;  %v3692_v16 = vsub.f32 1.0, %v5248_v37 }
 0x915   :  { %v3803_v15 = vadd.f32 %v3801_v12, %v3741_v50  ;;  %v4117_v6 = vmul.f32 -1.442695, %v3802_v55  ;;  %v3696_v13 = vmul.f32 %v5248_v37, %v6929_v61  ;;  %v3693_v38 = vsub.f32 1.0, %v5250_v56 }
 0x916   :  { %5255 = vpow2.f32 %v4115_v47  ;;  %v4116_v7 = vmul.f32 -1.442695, %v3787_v21  ;;  %v3697_v17 = vmul.f32 %v5250_v56, %v6931_v3 }
 0x917   :  { %v4118_v4 = vmul.f32 -1.442695, %v3803_v15 }
 0x918   :  { %5257 = vpow2.f32 %v4116_v7 }
 0x919   :  { %5259 = vpow2.f32 %v4117_v6 }
 0x91a   :  { %5261 = vpow2.f32 %v4118_v4 }
 0x91c   :  { %v5252_v51 = vpop.eup %5251 }
 0x91d   :  { %v3694_v63 = vmul.f32 %v5252_v51, %v3692_v16 }
 0x91e   :  { %v5254_v48 = vpop.eup %5253 }
 0x91f   :  { %v3698_v59 = vadd.f32 %v3696_v13, %v3694_v63  ;;  %v3695_v24 = vmul.f32 %v5254_v48, %v3693_v38 }
 0x920   :  { %v5256_v29 = vpop.eup %5255 }
 0x921   :  { %v3699_v54 = vadd.f32 %v3697_v17, %v3695_v24  ;;  %v3794_v32 = vadd.f32 1.0, %v5256_v29 }
 0x922   :  { %v5258_v53 = vpop.eup %5257 }
 0x923   :  { %v4228_v39 = vpack.c.bf16 %v3699_v54, %v3698_v59  ;;  %5263 = vrcp.f32 %v3794_v32  ;;  %v3795_v31 = vadd.f32 1.0, %v5258_v53 }
 0x925   :  { %4229 = vst [vmem:[#allocation14 + $0x38] sm:$0xff] %v4228_v39   ;;  %5265 = vrcp.f32 %v3795_v31 }
 0x926   :  { %5492 = shalt.err (!%p5489_p2)
}
 0x927   :  { %s5493_s28 = scalar_lea.hbm %s7051_s6, 1024 }
 0x928   :  { %p5494_p3 = scmp.ne.s32.totalorder %s7051_s6, %s5493_s28  ;;  %p5497_p4 = scmp.lt.u32.totalorder %s5493_s28, %s7051_s6 }
 0x92a   :  { %p5499_p5 = pnand %p5497_p4, %p5494_p3 }
 0x92c   :  { %5502 = shalt.err (!%p5499_p5)
}
 0x92d   :  { %3874 = dma.vmem_to_hbm [thread:$0]  %s3869_s22, 1024, %s7051_s6, [#allocation7], %s5537_s13, %s5537_s13, %s5538_s14   ;;  %v5260_v61 = vpop.eup %5259  ;;  %v3778_v30 = vadd.f32 %v6994_v5, %v6060_v27  ;;  %v7382_v60 = vld [vmem:[#allocation62_spill] sm:$0xff]  ;;  %v3781_v44 = vadd.f32 %v7000_v11, %v6060_v27 }
 0x92e   :  { %v5262_v3 = vpop.eup %5261  ;;  %v3810_v1 = vadd.f32 1.0, %v5260_v61  ;;  %v3818_v58 = vunpack.c.l.bf16 %v7382_v60  ;;  %v3819_v23 = vunpack.c.h.bf16 %v7382_v60  ;;  %s5550_s6 = smov [#allocation15]  }
 0x92f   :  { %v3811_v45 = vadd.f32 1.0, %v5262_v3  ;;  %v5264_v14 = vpop.eup %5263  ;;  %s3885_s12 = sshll.u32 %s5550_s6, 4  ;;  %s3886_s12 = int_to_ptr.vmem [resolvable:$true] %s3885_s12 }
 0x930   :  { %v3816_v25 = vmul.f32 %v5264_v14, %v3778_v30  ;;  %5267 = vrcp.f32 %v3810_v1  ;;  %v5266_v26 = vpop.eup %5265  ;;  %s5503_s15 = scalar_lea.vmem %s3886_s12, 1024  ;;  %p5508_p7 = scmp.lt.s32.totalorder %s3886_s12, %s3886_s12 }
 0x931   :  { %v3817_v62 = vmul.f32 %v5266_v26, %v3781_v44  ;;  %5269 = vrcp.f32 %v3811_v45  ;;  %p5504_p6 = scmp.ne.s32.totalorder %s3886_s12, %s5503_s15  ;;  %p5509_p8 = scmp.lt.s32.totalorder %s5503_s15, %s5503_s15 }
 0x932   :  { %v3820_v34 = vadd.f32 %v3818_v58, %v3816_v25 }
 0x933   :  { %v3821_v19 = vadd.f32 %v3819_v23, %v3817_v62  ;;  %p5510_p9 = por %p5509_p8, %p5508_p7 }
 0x934   :  { %5271 = vtanh.f32 %v3820_v34 }
 0x935   :  { %5273 = vtanh.f32 %v3821_v19  ;;  %p5511_p10 = pnand %p5510_p9, %p5504_p6 }
 0x93a   :  { %v5268_v42 = vpop.eup %5267 }
 0x93b   :  { %v5270_v22 = vpop.eup %5269  ;;  %v3824_v28 = vsub.f32 1.0, %v5268_v42  ;;  %v3828_v2 = vmul.f32 %v5268_v42, %v6973_v41 }
 0x93c   :  { %v3825_v35 = vsub.f32 1.0, %v5270_v22  ;;  %v3829_v33 = vmul.f32 %v5270_v22, %v6975_v46 }
 0x93e   :  { %v5272_v5 = vpop.eup %5271 }
 0x93f   :  { %v3826_v10 = vmul.f32 %v5272_v5, %v3824_v28  ;;  %v5274_v18 = vpop.eup %5273 }
 0x940   :  { %v3827_v27 = vmul.f32 %v5274_v18, %v3825_v35 }
 0x941   :  { %v3830_v0 = vadd.f32 %v3828_v2, %v3826_v10 }
 0x942   :  { %v3831_v40 = vadd.f32 %v3829_v33, %v3827_v27 }
 0x944   :  { %v4233_v36 = vpack.c.bf16 %v3831_v40, %v3830_v0 }
 0x946   :  { %4234 = vst [vmem:[#allocation15] sm:$0xff] %v4233_v36  }
 0x947   :  { %5514 = shalt.err (!%p5511_p10)
}
 0x948   :  { %s5515_s18 = scalar_lea.hbm %s7052_s7, 1024 }
 0x949   :  { %p5516_p11 = scmp.ne.s32.totalorder %s7052_s7, %s5515_s18  ;;  %p5519_p12 = scmp.lt.u32.totalorder %s5515_s18, %s7052_s7 }
 0x94b   :  { %p5521_p13 = pnand %p5519_p12, %p5516_p11 }
 0x94d   :  { %5524 = shalt.err (!%p5521_p13)
}
 0x94e   :  { %3891 = dma.vmem_to_hbm [thread:$0]  %s3886_s12, 1024, %s7052_s7, [#allocation16], %s5537_s13, %s5537_s13, %s5538_s14  }
 0x94f   :  { %5531 = dma.done.wait [#allocation7], 1024  }
 0x950   :  { %5532 = vsyncadd [#allocation7], 4294966272 }
 0x951   :  { %5533 = dma.done.wait [#allocation16], 1024  }
 0x952   :  { %5534 = vsyncadd [#allocation16], 4294966272 }
 0x953   :  { %3898 = vsyncpa [#allocation6], 1 }
 0x954   :  { %3899 = vsyncpa [#allocation9], 1 }
 0x955   :  { %3900 = vsyncpa [#allocation12], 1 }
 0x956   :  { %3901 = vsyncpa [#allocation7], 1 }
 0x957   :  { %3902 = vsyncpa [#allocation16], 1 }

</bundles_post_ra>
